<compile_context>
chip_gen: v7x
topology: tpu7x:2x2x1
jax: 0.10.0
libtpu: 0.0.40
codegen_flags: <defaults>
</compile_context>

<pallas_src>
import jax
import jax.numpy as jnp
from jax.experimental import pallas as pl
from jax.experimental.pallas import tpu as pltpu

BN_EPS = 1e-5


def _pair(v):
    if isinstance(v, (list, tuple)):
        if len(v) == 1:
            return (v[0], v[0])
        assert len(v) == 2
        return (v[0], v[1])
    assert isinstance(v, int)
    return (v, v)


# ------------------------------ Pallas kernel -------------------------------- #
def _fused_conv_bn_relu_kernel(mrows_ref, p_ref, w_ref, g_ref, b_ref, im_ref,
                               o_ref):
    """One grid step == one branch: im2col GEMM + training BN + ReLU, fused.

      mrows_ref : (nb,)         int32 SMEM  true (unpadded) row count per branch
      p_ref     : (M_pad, K)    bf16  VMEM  im2col patches (zero-padded rows)
      w_ref     : (K, Cout)     bf16  VMEM  conv weights of this branch
      g_ref     : (1, Cout)     f32   VMEM  BN gamma
      b_ref     : (1, Cout)     f32   VMEM  BN beta
      im_ref    : (1, 1)        f32   VMEM  1 / true_row_count
      o_ref     : (M_pad, Cout) f32   VMEM  output (pad rows sliced off outside)
    """
    branch = pl.program_id(0)
    m_true = mrows_ref[branch]
    inv_m = im_ref[...]                       # (1, 1) f32

    # Conv as im2col GEMM on the MXU: bf16 inputs, f32 accumulation.  Output is
    # narrow (Cout lanes) -- no 128-lane zero padding, no recompute later.
    y = jnp.dot(p_ref[...], w_ref[...], preferred_element_type=jnp.float32)

    # Training-mode batch statistics over the true rows.  Zero-padded patch
    # rows give y == 0, so the mean is exact without masking; the centered
    # second moment masks pad rows explicitly (better conditioned than
    # E[y^2] - E[y]^2).
    mean = jnp.sum(y, axis=0, keepdims=True) * inv_m          # (1, Cout)
    rows = jax.lax.broadcasted_iota(jnp.int32, (y.shape[0], 1), 0)
    valid = (rows < m_true).astype(jnp.float32)               # (M_pad, 1)
    cent = (y - mean) * valid
    var = jnp.sum(cent * cent, axis=0, keepdims=True) * inv_m

    # Fold BN into a single FMA.  The conv bias cancels under the mean
    # subtraction and is never added.
    scale = g_ref[...] * jax.lax.rsqrt(var + BN_EPS)
    shift = b_ref[...] - mean * scale
    o_ref[...] = jnp.maximum(y * scale + shift, 0.0).astype(o_ref.dtype)


# ------------------------------- JAX wrappers -------------------------------- #
def _im2col(x, kh, kw, sh, sw):
    """SAME-padded strided patch extraction (layout glue, no FLOPs).
    Returns ((B*Ho*Wo, kh*kw*Cin) patches, Ho, Wo); k-order = (kh, kw, cin),
    matching w.reshape(kh*kw*Cin, Cout)."""
    B, H, W, Cin = x.shape
    ph, pw = (kh - 1) // 2, (kw - 1) // 2
    Ho = (H + 2 * ph - kh) // sh + 1
    Wo = (W + 2 * pw - kw) // sw + 1
    xp = jnp.pad(x, ((0, 0), (ph, ph), (pw, pw), (0, 0)))
    cols = []
    for ih in range(kh):
        for iw in range(kw):
            cols.append(xp[:, ih:ih + (Ho - 1) * sh + 1:sh,
                           iw:iw + (Wo - 1) * sw + 1:sw, :])
    patches = jnp.concatenate(cols, axis=-1).reshape(B * Ho * Wo, kh * kw * Cin)
    return patches, Ho, Wo


def fused_conv_bn_relu_layer(xs, layer_params, stride):
    """One Conv2d+BN+ReLU layer applied to all four branches with ONE
    pallas_call (grid over branches).  xs: list of NHWC activations.
    layer_params: matching list of dicts with 'w' (KH,KW,Cin,Cout), 'gamma',
    'beta'.  Returns the list of NHWC outputs."""
    num_branch = len(xs)
    sh, sw = stride
    KH, KW, Cin, Cout = layer_params[0]["w"].shape
    K = KH * KW * Cin

    patches_list, geom, m_true = [], [], []
    for x in xs:
        pmat, Ho, Wo = _im2col(x, KH, KW, sh, sw)
        patches_list.append(pmat)
        geom.append((x.shape[0], Ho, Wo))
        m_true.append(pmat.shape[0])

    # All branches padded (with zero rows) to a common, sublane-aligned row
    # count so they stack into one (nb, M_pad, K) operand.
    m_pad = max(-(-m // 8) * 8 for m in m_true)
    patches = jnp.stack(
        [jnp.pad(p, ((0, m_pad - p.shape[0]), (0, 0))) for p in patches_list]
    ).astype(jnp.bfloat16)                                        # (nb, M_pad, K)

    w_stk = jnp.stack([lp["w"].reshape(K, Cout)
                       for lp in layer_params]).astype(jnp.bfloat16)   # (nb, K, Cout)
    gamma = jnp.stack([lp["gamma"][None, :]
                       for lp in layer_params]).astype(jnp.float32)    # (nb, 1, Cout)
    beta = jnp.stack([lp["beta"][None, :]
                      for lp in layer_params]).astype(jnp.float32)     # (nb, 1, Cout)
    inv_m = jnp.asarray([[[1.0 / m]] for m in m_true], jnp.float32)    # (nb, 1, 1)
    mrows = jnp.asarray(m_true, jnp.int32)                             # (nb,)

    out = pl.pallas_call(
        _fused_conv_bn_relu_kernel,
        out_shape=jax.ShapeDtypeStruct((num_branch, m_pad, Cout), jnp.float32),
        grid_spec=pltpu.PrefetchScalarGridSpec(
            num_scalar_prefetch=1,
            grid=(num_branch,),
            in_specs=[
                pl.BlockSpec((None, m_pad, K), lambda b, mr: (b, 0, 0)),
                pl.BlockSpec((None, K, Cout), lambda b, mr: (b, 0, 0)),
                pl.BlockSpec((None, 1, Cout), lambda b, mr: (b, 0, 0)),
                pl.BlockSpec((None, 1, Cout), lambda b, mr: (b, 0, 0)),
                pl.BlockSpec((None, 1, 1), lambda b, mr: (b, 0, 0)),
            ],
            out_specs=pl.BlockSpec((None, m_pad, Cout), lambda b, mr: (b, 0, 0)),
        ),
        compiler_params=pltpu.CompilerParams(
            # Branches are fully independent -> shardable across the two
            # TensorCores of a v7x megacore (no effect on v5e/v6e).
            dimension_semantics=("parallel",),
            vmem_limit_bytes=32 * 1024 * 1024,
        ),
        cost_estimate=pl.CostEstimate(
            flops=int(2 * num_branch * m_pad * K * Cout),
            transcendentals=int(num_branch * Cout),        # rsqrt
            bytes_accessed=int(patches.size * 2 + w_stk.size * 2
                               + num_branch * m_pad * Cout * 4),
        ),
    )(mrows, patches, w_stk, gamma, beta, inv_m)

    outs = []
    for b, ((bsz, Ho, Wo), m) in enumerate(zip(geom, m_true)):
        outs.append(out[b, :m, :].reshape(bsz, Ho, Wo, Cout))
    return outs


# ---------------------------- parameter creation ------------------------------ #
def init_params(key, out_channels, kernel_sizes, in_channels):
    params = {}
    for name in ("main", "b1", "b2", "b3"):
        layers = []
        cin = in_channels
        for i, cout in enumerate(out_channels):
            kh, kw = _pair(kernel_sizes[i])
            key, k1, k2, k3, k4 = jax.random.split(key, 5)
            bound = 1.0 / (cin * kh * kw) ** 0.5
            layers.append(dict(
                w=jax.random.uniform(k1, (kh, kw, cin, cout), jnp.float32,
                                     -bound, bound),
                # Conv bias exists in the PyTorch module but cancels exactly
                # under train-mode BatchNorm, so the kernel never consumes it.
                b=jax.random.uniform(k2, (cout,), jnp.float32, -bound, bound),
                gamma=jax.random.uniform(k3, (cout,), jnp.float32, 0.5, 1.5),
                beta=jax.random.uniform(k4, (cout,), jnp.float32, -0.5, 0.5),
            ))
            cin = cout
        params[name] = layers
    return params


# ---------------------------------- forward ----------------------------------- #
def conv_bn_relu_forward(params, src, src_lengths, strides, in_channels):
    # TODO(synk): FairseqDropout (dropout_in_module) and the `frac` nn.Parameter
    # are created in the reference __init__ but never used in forward ->
    # intentionally omitted.
    B, T, feat = src.shape
    Fw = feat // in_channels
    # PyTorch: src.view(B,T,Cin,F).transpose(1,2) -> NCHW (B,Cin,T,F);
    # here NHWC: (B, T, F, Cin).
    x = src.reshape(B, T, in_channels, Fw).transpose(0, 1, 3, 2)
    xs = [x, x[:, :, :30, :], x[:, :, 30:60, :], x[:, :, 60:83, :]]

    for i, s in enumerate(strides):
        st = _pair(s)
        layer_params = [params["main"][i], params["b1"][i],
                        params["b2"][i], params["b3"][i]]
        xs = fused_conv_bn_relu_layer(xs, layer_params, st)

    x, x1, x2, x3 = xs
    x_ = jnp.concatenate((x1, x2, x3), axis=2)[:, :, :21, :]
    x = x + x_

    # NHWC (B,Ho,Wo,C) -> PyTorch (B,Ho,C,Wo) -> (B, Ho, C*Wo)
    Bo, Ho, Wo, C = x.shape
    x = x.transpose(0, 1, 3, 2).reshape(Bo, Ho, C * Wo)

    x_lengths = src_lengths
    for s in strides:
        s0 = _pair(s)[0]
        x_lengths = (x_lengths + s0 - 1) // s0

    pos = jnp.arange(Ho, dtype=x_lengths.dtype)[None, :]
    padding_mask = pos >= x_lengths[:, None]   # True = padded position
    x = jnp.where(padding_mask[:, :, None], 0.0, x)
    return x, x_lengths, padding_mask


# ------------------------------------ main ------------------------------------ #
if __name__ == "__main__":
    out_channels = [8, 8]
    kernel_sizes = [3, 3]
    strides = [2, 2]
    in_channels = 1

    B, T = 2, 16
    feat = 83 * in_channels  # forward slices the feature axis at 30/60/83

    key = jax.random.PRNGKey(0)
    kp, kx = jax.random.split(key)
    params = init_params(kp, out_channels, kernel_sizes, in_channels)
    src = jax.random.normal(kx, (B, T, feat), jnp.float32)
    src_lengths = jnp.array([16, 11], jnp.int32)

    x, x_lengths, padding_mask = conv_bn_relu_forward(
        params, src, src_lengths, strides, in_channels)

    jax.block_until_ready(x)
    jax.block_until_ready(x_lengths)
    jax.block_until_ready(padding_mask)

    assert x.shape == (B, 4, out_channels[-1] * 21), x.shape
    assert padding_mask.shape == (B, 4)
    print("KERNEL_OK")
</pallas_src>

<mosaic_0001>
module attributes {stable_mosaic.version = 11 : i64} {
  func.func @_fused_conv_bn_relu_kernel(%arg0: i32, %arg1: memref<4xi32, #tpu.memory_space<smem>>, %arg2: memref<1x672x9xbf16, #tpu.memory_space<vmem>>, %arg3: memref<1x9x8xbf16, #tpu.memory_space<vmem>>, %arg4: memref<1x1x8xf32, #tpu.memory_space<vmem>>, %arg5: memref<1x1x8xf32, #tpu.memory_space<vmem>>, %arg6: memref<1x1x1xf32, #tpu.memory_space<vmem>>, %arg7: memref<1x672x8xf32, #tpu.memory_space<vmem>>) attributes {dimension_semantics = [#tpu.dimension_semantics<parallel>], iteration_bounds = array<i64: 4>, scalar_prefetch = 1 : i64, scratch_operands = 0 : i64, tpu.core_type = #tpu.core_type<tc>, window_params = [{transform_indices = @transform_0, window_bounds = array<i64: 1, 672, 9>}, {transform_indices = @transform_1, window_bounds = array<i64: 1, 9, 8>}, {transform_indices = @transform_2, window_bounds = array<i64: 1, 1, 8>}, {transform_indices = @transform_3, window_bounds = array<i64: 1, 1, 8>}, {transform_indices = @transform_4, window_bounds = array<i64: 1, 1, 1>}, {transform_indices = @transform_5, window_bounds = array<i64: 1, 672, 8>}]} {
    %0 = arith.index_cast %arg0 : i32 to index
    %1 = memref.load %arg1[%0] : memref<4xi32, #tpu.memory_space<smem>>
    %c0 = arith.constant 0 : index
    %c0_0 = arith.constant 0 : index
    %c0_1 = arith.constant 0 : index
    %2 = vector.load %arg6[%c0, %c0_0, %c0_1] : memref<1x1x1xf32, #tpu.memory_space<vmem>>, vector<1x1x1xf32>
    %3 = vector.shape_cast %2 : vector<1x1x1xf32> to vector<1x1xf32>
    %c0_2 = arith.constant 0 : index
    %c0_3 = arith.constant 0 : index
    %c0_4 = arith.constant 0 : index
    %4 = vector.load %arg2[%c0_2, %c0_3, %c0_4] : memref<1x672x9xbf16, #tpu.memory_space<vmem>>, vector<1x672x9xbf16>
    %5 = vector.shape_cast %4 : vector<1x672x9xbf16> to vector<672x9xbf16>
    %c0_5 = arith.constant 0 : index
    %c0_6 = arith.constant 0 : index
    %c0_7 = arith.constant 0 : index
    %6 = vector.load %arg3[%c0_5, %c0_6, %c0_7] : memref<1x9x8xbf16, #tpu.memory_space<vmem>>, vector<1x9x8xbf16>
    %7 = vector.shape_cast %6 : vector<1x9x8xbf16> to vector<9x8xbf16>
    %cst = arith.constant dense<0.000000e+00> : vector<672x8xf32>
    %8 = tpu.matmul %5, %7, %cst {dimension_numbers = #tpu.dot_dimension_numbers<[1], [0], [0], [1], [0, 0, 1, 1], [], []>} : vector<672x9xbf16>, vector<9x8xbf16>, vector<672x8xf32> -> vector<672x8xf32>
    %cst_8 = arith.constant dense<0.000000e+00> : vector<8xf32>
    %9 = vector.multi_reduction <add>, %8, %cst_8 [0] : vector<672x8xf32> to vector<8xf32>
    %10 = vector.shape_cast %9 : vector<8xf32> to vector<1x8xf32>
    %11 = vector.broadcast %3 : vector<1x1xf32> to vector<1x8xf32>
    %12 = arith.mulf %10, %11 : vector<1x8xf32>
    %13 = tpu.iota {dimensions = array<i32: 0>} : vector<672x1xi32>
    %14 = vector.broadcast %1 : i32 to vector<672x1xi32>
    %15 = arith.cmpi slt, %13, %14 : vector<672x1xi32>
    %16 = arith.extui %15 : vector<672x1xi1> to vector<672x1xi32>
    %17 = arith.sitofp %16 : vector<672x1xi32> to vector<672x1xf32>
    %18 = vector.broadcast %12 : vector<1x8xf32> to vector<672x8xf32>
    %19 = arith.subf %8, %18 : vector<672x8xf32>
    %20 = vector.broadcast %17 : vector<672x1xf32> to vector<672x8xf32>
    %21 = arith.mulf %19, %20 : vector<672x8xf32>
    %22 = arith.mulf %21, %21 : vector<672x8xf32>
    %cst_9 = arith.constant dense<0.000000e+00> : vector<8xf32>
    %23 = vector.multi_reduction <add>, %22, %cst_9 [0] : vector<672x8xf32> to vector<8xf32>
    %24 = vector.shape_cast %23 : vector<8xf32> to vector<1x8xf32>
    %25 = vector.broadcast %3 : vector<1x1xf32> to vector<1x8xf32>
    %26 = arith.mulf %24, %25 : vector<1x8xf32>
    %c0_10 = arith.constant 0 : index
    %c0_11 = arith.constant 0 : index
    %c0_12 = arith.constant 0 : index
    %27 = vector.load %arg4[%c0_10, %c0_11, %c0_12] : memref<1x1x8xf32, #tpu.memory_space<vmem>>, vector<1x1x8xf32>
    %28 = vector.shape_cast %27 : vector<1x1x8xf32> to vector<1x8xf32>
    %cst_13 = arith.constant 9.99999974E-6 : f32
    %29 = vector.broadcast %cst_13 : f32 to vector<1x8xf32>
    %30 = arith.addf %26, %29 : vector<1x8xf32>
    %31 = math.rsqrt %30 : vector<1x8xf32>
    %32 = arith.mulf %28, %31 : vector<1x8xf32>
    %c0_14 = arith.constant 0 : index
    %c0_15 = arith.constant 0 : index
    %c0_16 = arith.constant 0 : index
    %33 = vector.load %arg5[%c0_14, %c0_15, %c0_16] : memref<1x1x8xf32, #tpu.memory_space<vmem>>, vector<1x1x8xf32>
    %34 = vector.shape_cast %33 : vector<1x1x8xf32> to vector<1x8xf32>
    %35 = arith.mulf %12, %32 : vector<1x8xf32>
    %36 = arith.subf %34, %35 : vector<1x8xf32>
    %37 = vector.broadcast %32 : vector<1x8xf32> to vector<672x8xf32>
    %38 = arith.mulf %8, %37 : vector<672x8xf32>
    %39 = vector.broadcast %36 : vector<1x8xf32> to vector<672x8xf32>
    %40 = arith.addf %38, %39 : vector<672x8xf32>
    %cst_17 = arith.constant 0.000000e+00 : f32
    %41 = vector.broadcast %cst_17 : f32 to vector<672x8xf32>
    %42 = arith.maximumf %40, %41 : vector<672x8xf32>
    %c0_18 = arith.constant 0 : index
    %c0_19 = arith.constant 0 : index
    %c0_20 = arith.constant 0 : index
    %43 = vector.load %arg7[%c0_18, %c0_19, %c0_20] : memref<1x672x8xf32, #tpu.memory_space<vmem>>, vector<1x672x8xf32>
    %44 = vector.shape_cast %43 : vector<1x672x8xf32> to vector<672x8xf32>
    %45 = vector.shape_cast %42 : vector<672x8xf32> to vector<1x672x8xf32>
    tpu.vector_store %arg7[%c0_18, %c0_19, %c0_20], %45 {strides = array<i32>} : memref<1x672x8xf32, #tpu.memory_space<vmem>>, vector<1x672x8xf32>,
    return
  }
  func.func @transform_0(%arg0: i32, %arg1: memref<4xi32, #tpu.memory_space<smem>>) -> (i32, i32, i32) {
    %c0_i32 = arith.constant 0 : i32
    %c0_i32_0 = arith.constant 0 : i32
    %c0_i32_1 = arith.constant 0 : i32
    return %arg0, %c0_i32, %c0_i32_0 : i32, i32, i32
  }
  func.func @transform_1(%arg0: i32, %arg1: memref<4xi32, #tpu.memory_space<smem>>) -> (i32, i32, i32) {
    %c0_i32 = arith.constant 0 : i32
    %c0_i32_0 = arith.constant 0 : i32
    %c0_i32_1 = arith.constant 0 : i32
    return %arg0, %c0_i32, %c0_i32_0 : i32, i32, i32
  }
  func.func @transform_2(%arg0: i32, %arg1: memref<4xi32, #tpu.memory_space<smem>>) -> (i32, i32, i32) {
    %c0_i32 = arith.constant 0 : i32
    %c0_i32_0 = arith.constant 0 : i32
    %c0_i32_1 = arith.constant 0 : i32
    return %arg0, %c0_i32, %c0_i32_0 : i32, i32, i32
  }
  func.func @transform_3(%arg0: i32, %arg1: memref<4xi32, #tpu.memory_space<smem>>) -> (i32, i32, i32) {
    %c0_i32 = arith.constant 0 : i32
    %c0_i32_0 = arith.constant 0 : i32
    %c0_i32_1 = arith.constant 0 : i32
    return %arg0, %c0_i32, %c0_i32_0 : i32, i32, i32
  }
  func.func @transform_4(%arg0: i32, %arg1: memref<4xi32, #tpu.memory_space<smem>>) -> (i32, i32, i32) {
    %c0_i32 = arith.constant 0 : i32
    %c0_i32_0 = arith.constant 0 : i32
    %c0_i32_1 = arith.constant 0 : i32
    return %arg0, %c0_i32, %c0_i32_0 : i32, i32, i32
  }
  func.func @transform_5(%arg0: i32, %arg1: memref<4xi32, #tpu.memory_space<smem>>) -> (i32, i32, i32) {
    %c0_i32 = arith.constant 0 : i32
    %c0_i32_0 = arith.constant 0 : i32
    %c0_i32_1 = arith.constant 0 : i32
    return %arg0, %c0_i32, %c0_i32_0 : i32, i32, i32
  }
}

</mosaic_0001>

<bundles_post_ra>
// kernel: tpu_custom_call.1
= control target key start
LH: loop header
LB: loop body
LE: loop exit
PB: predicated region body
PF: predicated region fallthrough
CT: control target
= control target key end

     0   :  { %s5942_s0 = inlined_call_operand.hbm [shape: s32[4], index: 0, kind: input, shape index: {}]   ;;  %s5943_s1 = inlined_call_operand.vmem [shape: bf16[4,672,9], index: 1, kind: input, shape index: {}]   ;;  %s5944_s2 = inlined_call_operand.vmem [shape: bf16[4,9,8], index: 2, kind: input, shape index: {}]   ;;  %s5945_s3 = inlined_call_operand.hbm [shape: f32[4,1,8], index: 3, kind: input, shape index: {}]   ;;  %s5946_s4 = inlined_call_operand.hbm [shape: f32[4,1,8], index: 4, kind: input, shape index: {}]   ;;  %s5947_s5 = inlined_call_operand.vmem [shape: f32[4,1,1], index: 5, kind: input, shape index: {}]   ;;  %s5948_s6 = inlined_call_operand.vmem [shape: f32[4,672,8], index: 6, kind: output, shape index: {}]  }
   0x1   :  { %s2968_s23 = scalar_lea.hbm %s5942_s0, 16 }
   0x2   :  { %p2969_p0 = scmp.ne.s32.totalorder %s5942_s0, %s2968_s23  ;;  %p2972_p1 = scmp.lt.u32.totalorder %s2968_s23, %s5942_s0 }
   0x4   :  { %p2974_p2 = pnand %p2972_p1, %p2969_p0 }
   0x6   :  { %2977 = shalt.err (!%p2974_p2)  }
   0x7   :  { %s3080_s28 = smov [#allocation3]  }
   0x8   :  { %12 = dma.hbm_to_smem %s5942_s0, 16, %s3080_s28, [#allocation2] }
   0x9   :  { %3054 = dma.done.wait [#allocation2], 16 }
   0xa   :  { %3055 = vsyncadd [#allocation2], 4294967280 }
   0xb   :  { %14 = sfence }
   0xc   :  { %15 = vsyncpa [#allocation5], 0 }
   0xd   :  { %17 = vsyncpa [#allocation5 + $0x1], 0 }
   0xe   :  { %18 = vsyncpa [#allocation7], 0 }
   0xf   :  { %20 = vsyncpa [#allocation7 + $0x1], 0  ;;  %s3133_s7 = smov 0   ;;  %s3135_s8 = smov 0  }
  0x10   :  { %s3137_s9 = smov 0   ;;  %s3139_s10 = smov 0  }
  0x11 LB: > { %s3152_s0 = sadd.s32 4294967295, %s3078_s10   ;;  %s3155_s11 = sadd.s32 1, %s3078_s10   ;;  %s3078_s10 = sphi %s3139_s10, %s6720_s10   ;;  %s3074_s9 = sphi %s3137_s9, %s6719_s9   ;;  %s3070_s8 = sphi %s3135_s8, %s6718_s8   ;;  %s3066_s7 = sphi %s3133_s7, %s6717_s7  }
  0x12   : > { %s82_s12 = ssub.s32 %s3078_s10, %s3155_s11  ;;  %s85_s13 = sadd.s32 1, %s3074_s9 }
  0x13   : > { %p83_p3 = scmp.eq.s32.totalorder %s82_s12, 0  ;;  %p92_p4 = scmp.ne.s32.totalorder %s3074_s9, %s3070_s8 }
  0x14   : > { %p93_p5 = scmp.eq.s32.totalorder %s3078_s10, 0  ;;  %p98_p6 = scmp.ne.s32.totalorder %s3070_s8, %s3066_s7 }
  0x15   : > { %s3165_s14 = scalar_select %p83_p3, %s3074_s9, %s85_s13  }
  0x16   : > { %p94_p7 = por %p93_p5, %p92_p4  ;;  %p99_p8 = scmp.eq.s32.totalorder %s3152_s0, 0 }
  0x17   : > { %p2885_p9 = scmp.lt.s32.totalorder %s3078_s10, 4  ;;  %s3174_s16 = sand.u32 1, %s3074_s9  }
  0x18   : > { %p3169_p10 = por %p99_p8, %p98_p6  ;;  %s2562_s17 = sshll.u32 %s3078_s10, 4 }
  0x19   : > { %s219_s18 = scalar_lea.vmem [#allocation4], %s3174_s16  ;;  %s3183_s22 = scalar_lea.hbm %s5945_s3, %s2562_s17 }
  0x1a   : > { %s6130_s15 = scalar_select %p3169_p10, 1, 0 }
  0x1b   : > { %s226_s19 = sshll.u32 %s219_s18, 4  ;;  %p3187_p11 = pnand %p2885_p9, %p94_p7  ;;  %s3185_s19 = int_to_ptr.vmem [resolvable:$true] %s226_s19 }
  0x1c   : > { %s217_s24 = scalar_lea.sflag [#allocation5], %s3174_s16  ;;  %s2978_s25 = scalar_lea.hbm %s3183_s22, 16 }
  0x1d   : > { %p2979_p0 = scmp.ne.s32.totalorder %s3183_s22, %s2978_s25  ;;  %p2980_p1 = pneg %p3187_p11 }
  0x1e   : > { %s2983_s28 = scalar_lea.hbm %s5945_s3, 64  ;;  %p2984_p4 = scmp.lt.u32.totalorder %s3183_s22, %s5945_s3 }
  0x1f   : > { %p2981_p2 = pnand %p2980_p1, %p2979_p0  ;;  %p2985_p5 = scmp.lt.u32.totalorder %s2983_s28, %s2978_s25 }
  0x20   : > { %p2987_p7 = scmp.lt.u32.totalorder %s2978_s25, %s3183_s22 }
  0x21   : > { %p2982_p3 = pneg %p2981_p2  ;;  %p2986_p6 = por %p2985_p5, %p2984_p4 }
  0x23   : > { %p2988_p8 = por %p2987_p7, %p2986_p6 }
  0x25   : > { %p2989_p9 = pnand %p2988_p8, %p2982_p3 }
  0x27   : > { %2992 = shalt.err (!%p2989_p9)
}
  0x28   : > { %s2993_s7 = scalar_lea.vmem %s3185_s19, 16  ;;  %s3081_s12 = smov [#allocation4]  }
  0x29   : > { %p2994_p0 = scmp.ne.s32.totalorder %s3185_s19, %s2993_s7  ;;  %s2998_s13 = sshll.u32 %s3081_s12, 4  ;;  %s2999_s13 = int_to_ptr.vmem [resolvable:$false] %s2998_s13 }
  0x2a   : > { %s3000_s18 = scalar_lea.vmem %s2999_s13, 32  ;;  %p3001_p13 = scmp.lt.s32.totalorder %s3185_s19, %s2999_s13 }
  0x2b   : > { %p2996_p2 = pnand %p2994_p0, %p2980_p1  ;;  %p3002_p4 = scmp.lt.s32.totalorder %s3000_s18, %s2993_s7 }
  0x2d   : > { %p2997_p12 = pneg %p2996_p2  ;;  %p3003_p5 = por %p3002_p4, %p3001_p13 }
  0x2f   : > { %p3004_p6 = pnand %p3003_p5, %p2997_p12 }
  0x31   : > { %3007 = shalt.err (!%p3004_p6)
}
  0x32   : > { %2881 = dma.hbm_to_vmem [thread:$0]  (!%p3187_p11), %s3183_s22, 16, %s3185_s19, %s217_s24  }
  0x33   : > { %p6132_p3 = scmp.lt.s32.totalorder %s3078_s10, 5  ;;  %p6133_p7 = scmp.ge.s32.totalorder %s3078_s10, 1 }
  0x34   : > { %s3232_s26 = scalar_lea.hbm %s5946_s4, %s2562_s17  ;;  %s236_s27 = scalar_lea.vmem [#allocation6], %s3174_s16 }
  0x35   : > { %p3223_p8 = pnand %p6133_p7, %p6132_p3  ;;  %s243_s28 = sshll.u32 %s236_s27, 4  ;;  %s244_s28 = int_to_ptr.vmem [resolvable:$true] %s243_s28 }
  0x36   : > { %s234_s19 = scalar_lea.sflag [#allocation7], %s3174_s16  ;;  %s3008_s22 = scalar_lea.hbm %s3232_s26, 16 }
  0x37   : > { %s6134_s20 = scalar_select %p3223_p8, 1, 0 }
  0x38   : > { %p3009_p12 = scmp.ne.s32.totalorder %s3232_s26, %s3008_s22  ;;  %s3013_s29 = scalar_lea.hbm %s5946_s4, 64 }
  0x39   : > { %p3014_p0 = scmp.lt.u32.totalorder %s3232_s26, %s5946_s4  ;;  %p3015_p2 = scmp.lt.u32.totalorder %s3013_s29, %s3008_s22 }
  0x3a   : > { %p3011_p13 = pnand %p3009_p12, %p2980_p1  ;;  %p3017_p5 = scmp.lt.u32.totalorder %s3008_s22, %s3232_s26 }
  0x3b   : > { %p3016_p4 = por %p3015_p2, %p3014_p0 }
  0x3c   : > { %p3012_p9 = pneg %p3011_p13 }
  0x3d   : > { %p3018_p6 = por %p3017_p5, %p3016_p4 }
  0x3f   : > { %p3019_p3 = pnand %p3018_p6, %p3012_p9 }
  0x41   : > { %3022 = shalt.err (!%p3019_p3)
}
  0x42   : > { %s3023_s16 = scalar_lea.vmem %s244_s28, 16  ;;  %s3082_s7 = smov [#allocation6]  }
  0x43   : > { %p3024_p7 = scmp.ne.s32.totalorder %s244_s28, %s3023_s16  ;;  %s3028_s12 = sshll.u32 %s3082_s7, 4  ;;  %s3029_s12 = int_to_ptr.vmem [resolvable:$false] %s3028_s12 }
  0x44   : > { %s3030_s13 = scalar_lea.vmem %s3029_s12, 32  ;;  %p3031_p10 = scmp.lt.s32.totalorder %s244_s28, %s3029_s12 }
  0x45   : > { %p3026_p12 = pnand %p3024_p7, %p2980_p1  ;;  %p3032_p8 = scmp.lt.s32.totalorder %s3030_s13, %s3023_s16 }
  0x47   : > { %p3027_p13 = pneg %p3026_p12  ;;  %p3033_p0 = por %p3032_p8, %p3031_p10 }
  0x49   : > { %p3034_p2 = pnand %p3033_p0, %p3027_p13 }
  0x4b   : > { %3037 = shalt.err (!%p3034_p2)
}
  0x4c   : > { %2884 = dma.hbm_to_vmem [thread:$0]  (!%p3187_p11), %s3232_s26, 16, %s244_s28, %s234_s19  }
  0x4d   : > { %p6135_p9 = scmp.ne.s32.totalorder %s6134_s20, 0 }
  0x4f   : > { %258 = sbr.rel (%p6135_p9) target bundleno = 846 (0x34e), region = 40 }
  0x56   : > { %s3258_s18 = sand.u32 1, %s3070_s8   ;;  %p6136_p1 = scmp.ne.s32.totalorder %s6130_s15, 0 }
  0x57   : > { %s261_s21 = scalar_lea.sflag [#allocation5], %s3258_s18  ;;  %s263_s25 = scalar_lea.vmem [#allocation4], %s3258_s18 }
  0x58   : > { %3057 = dma.done.wait (%p6136_p1), %s261_s21, 16  }
  0x59   : > { %3059 = vsyncadd (%p6136_p1), %s261_s21, 4294967280  ;;  %s269_s23 = scalar_lea.sflag [#allocation7], %s3258_s18  ;;  %s271_s26 = scalar_lea.vmem [#allocation6], %s3258_s18 }
  0x5a   : > { %3061 = dma.done.wait (%p6136_p1), %s269_s23, 16  }
  0x5b   : > { %3063 = vsyncadd (%p6136_p1), %s269_s23, 4294967280  ;;  %p314_p10 = scmp.lt.s32.totalorder %s3152_s0, 3  ;;  %vm763_vm0 = vcmask 1043456   ;;  %vm764_vm1 = vcmask 1044480   ;;  %v3083_v0 = vmov 65535   ;;  %vm636_vm2 = vcmask 72704  }
  0x5c   : > { %v765_v1 = vsel %vm763_vm0, 4294967295, %v3083_v0  ;;  %v3084_v47 = vmov 0   ;;  %vm1139_vm3 = vcmask 64512   ;;  %s3721_s7 = sld [smem:[#allocation3 + %s3152_s0]] }
  0x5d   : > { %s3274_s20 = scalar_select %p314_p10, %s3152_s0, 3  ;;  %v766_v2 = vsel %vm764_vm1, %v765_v1, 0  ;;  %2922 = vset.pattern.permute.xlu0 %v3084_v47 }
  0x5f   : > { %s2872_s27 = smul.u32 336, %s3274_s20  ;;  %s2740_s28 = sshll.u32 %s3274_s20, 3 }
  0x60   : > { %s323_s10 = scalar_lea.vmem %s5944_s2, %s2740_s28  ;;  %s326_s16 = scalar_lea.vmem %s5947_s5, %s3274_s20 }
  0x61   : > { %s3284_s29 = scalar_lea.vmem %s5943_s1, %s2872_s27  ;;  %v2923_v3 = vld [vmem:[%s323_s10] sm:$0x1f]   ;;  %s2873_s0 = smul.u32 672, %s3274_s20 }
  0x62   : > { %v2924_v4 = vld [vmem:[%s3284_s29] sm:$0xff]   ;;  %v768_v5 = vand.u32 %v2923_v3, %v766_v2  ;;  %v2925_v6 = vld [vmem:[%s3284_s29 + $0x8] sm:$0xff]   ;;  %v2926_v7 = vld [vmem:[%s3284_s29 + $0x10] sm:$0xff]  }
  0x63   : > { %2786 = vmatprep.mubr.msk.bf16.mxu0 %vm636_vm2, %v2924_v4  ;;  %v2927_v8 = vld [vmem:[%s3284_s29 + $0x18] sm:$0xff]   ;;  %v2928_v9 = vld [vmem:[%s3284_s29 + $0x20] sm:$0xff]   ;;  %v2929_v10 = vld [vmem:[%s3284_s29 + $0x28] sm:$0xff]   ;;  %s5659_s18 = scalar_lea.vmem %s5948_s6, %s2873_s0 }
  0x64   : > { %2784 = vmatprep.subr.bf16.mxu0 %v768_v5  ;;  %2870 = vmatprep.subr.bf16.mxu1 %v768_v5  ;;  %v2930_v11 = vld [vmem:[%s3284_s29 + $0x30] sm:$0xff]   ;;  %v2947_v13 = vld [vmem:[%s3284_s29 + $0xb8] sm:$0xff]   ;;  %v2948_v14 = vld [vmem:[%s3284_s29 + $0xc0] sm:$0xff]  }
  0x65   : > { %2785 = vmatpush3.bf16.msra.mxu0 %v768_v5  ;;  %2871 = vmatpush3.bf16.msra.mxu1 %v768_v5  ;;  %v2946_v12 = vld [vmem:[%s3284_s29 + $0xb0] sm:$0xff]   ;;  %v2931_v15 = vld [vmem:[%s3284_s29 + $0x38] sm:$0xff]   ;;  %v2932_v16 = vld [vmem:[%s3284_s29 + $0x40] sm:$0xff]  }
  0x66   : > { %2830 = vmatprep.mubr.msk.bf16.mxu1 %vm636_vm2, %v2946_v12  ;;  %v2949_v17 = vld [vmem:[%s3284_s29 + $0xc8] sm:$0xff]   ;;  %v2950_v18 = vld [vmem:[%s3284_s29 + $0xd0] sm:$0xff]   ;;  %v2951_v21 = vld [vmem:[%s3284_s29 + $0xd8] sm:$0xff]  }
  0x67   : > { %v2933_v19 = vld [vmem:[%s3284_s29 + $0x48] sm:$0xff]   ;;  %v2934_v20 = vld [vmem:[%s3284_s29 + $0x50] sm:$0xff]   ;;  %v2952_v22 = vld [vmem:[%s3284_s29 + $0xe0] sm:$0xff]  }
  0x68   : > { %2787 = vmatmul.mubr.msk.bf16.vlgmr.msra.gmra.mrb[0].mxu0 %vm636_vm2, %v2925_v6  ;;  %2831 = vmatmul.mubr.msk.bf16.vlgmr.msra.gmra.mrb[0].mxu1 %vm636_vm2, %v2947_v13  ;;  %v2935_v23 = vld [vmem:[%s3284_s29 + $0x58] sm:$0xff]   ;;  %v2936_v24 = vld [vmem:[%s3284_s29 + $0x60] sm:$0xff]   ;;  %v2953_v25 = vld [vmem:[%s3284_s29 + $0xe8] sm:$0xff]  }
  0x69   : > { %2790 = vmatprep.mubr.msk.bf16.mxu0 %vm636_vm2, %v2926_v7  ;;  %2834 = vmatprep.mubr.msk.bf16.mxu1 %vm636_vm2, %v2948_v14  ;;  %v2954_v26 = vld [vmem:[%s3284_s29 + $0xf0] sm:$0xff]   ;;  %v2937_v27 = vld [vmem:[%s3284_s29 + $0x68] sm:$0xff]   ;;  %v2955_v29 = vld [vmem:[%s3284_s29 + $0xf8] sm:$0xff]  }
  0x6a   : > { %v2938_v28 = vld [vmem:[%s3284_s29 + $0x70] sm:$0xff]   ;;  %v2956_v30 = vld [vmem:[%s3284_s29 + $0x100] sm:$0xff]   ;;  %v2939_v31 = vld [vmem:[%s3284_s29 + $0x78] sm:$0xff]  }
  0x6b   : > { %v2940_v32 = vld [vmem:[%s3284_s29 + $0x80] sm:$0xff]   ;;  %v2957_v33 = vld [vmem:[%s3284_s29 + $0x108] sm:$0xff]   ;;  %v2958_v34 = vld [vmem:[%s3284_s29 + $0x110] sm:$0xff]  }
  0x6c   : > { %v2941_v35 = vld [vmem:[%s3284_s29 + $0x88] sm:$0xff]   ;;  %v2942_v36 = vld [vmem:[%s3284_s29 + $0x90] sm:$0xff]   ;;  %v2959_v37 = vld [vmem:[%s3284_s29 + $0x118] sm:$0xff]  }
  0x6d   : > { %v2960_v38 = vld [vmem:[%s3284_s29 + $0x120] sm:$0xff]   ;;  %v2943_v39 = vld [vmem:[%s3284_s29 + $0x98] sm:$0xff]   ;;  %v2961_v41 = vld [vmem:[%s3284_s29 + $0x128] sm:$0xff]  }
  0x6e   : > { %v2944_v40 = vld [vmem:[%s3284_s29 + $0xa0] sm:$0xff]   ;;  %v2962_v42 = vld [vmem:[%s3284_s29 + $0x130] sm:$0xff]   ;;  %v2945_v43 = vld [vmem:[%s3284_s29 + $0xa8] sm:$0xff]  }
  0x6f   : > { %v2963_v44 = vld [vmem:[%s3284_s29 + $0x138] sm:$0xff]   ;;  %v2964_v45 = vld [vmem:[%s3284_s29 + $0x140] sm:$0xff]   ;;  %v2965_v46 = vld [vmem:[%s3284_s29 + $0x148] sm:$0xff]  }
  0x70   : > { %2791 = vmatmul.mubr.msk.bf16.gmra.mrb[4].mxu0 %vm636_vm2, %v2927_v8  ;;  %2835 = vmatmul.mubr.msk.bf16.gmra.mrb[4].mxu1 %vm636_vm2, %v2949_v17  ;;  %v334_v48 = vld [vmem:[%s326_s16] sm:$0x1] }
  0x71   : > { %2794 = vmatprep.mubr.msk.bf16.mxu0 %vm636_vm2, %v2928_v9  ;;  %2838 = vmatprep.mubr.msk.bf16.mxu1 %vm636_vm2, %v2950_v18 }
  0x72   : > { %1315 = vperm.xlu0 %2922, %v334_v48  }
  0x78   : > { %2795 = vmatmul.mubr.msk.bf16.gmra.mrb[8].mxu0 %vm636_vm2, %v2929_v10  ;;  %2839 = vmatmul.mubr.msk.bf16.gmra.mrb[8].mxu1 %vm636_vm2, %v2951_v21 }
  0x79   : > { %2798 = vmatprep.mubr.msk.bf16.mxu0 %vm636_vm2, %v2930_v11  ;;  %2842 = vmatprep.mubr.msk.bf16.mxu1 %vm636_vm2, %v2952_v22 }
  0x80   : > { %2799 = vmatmul.mubr.msk.bf16.gmra.mrb[12].mxu0 %vm636_vm2, %v2931_v15  ;;  %2843 = vmatmul.mubr.msk.bf16.gmra.mrb[12].mxu1 %vm636_vm2, %v2953_v25 }
  0x81   : > { %2802 = vmatprep.mubr.msk.bf16.mxu0 %vm636_vm2, %v2932_v16  ;;  %2846 = vmatprep.mubr.msk.bf16.mxu1 %vm636_vm2, %v2954_v26 }
  0x88   : > { %2803 = vmatmul.mubr.msk.bf16.gmra.mrb[16].mxu0 %vm636_vm2, %v2933_v19  ;;  %2847 = vmatmul.mubr.msk.bf16.gmra.mrb[16].mxu1 %vm636_vm2, %v2955_v29 }
  0x89   : > { %2806 = vmatprep.mubr.msk.bf16.mxu0 %vm636_vm2, %v2934_v20  ;;  %2850 = vmatprep.mubr.msk.bf16.mxu1 %vm636_vm2, %v2956_v30 }
  0x90   : > { %2807 = vmatmul.mubr.msk.bf16.gmra.mrb[20].mxu0 %vm636_vm2, %v2935_v23  ;;  %2851 = vmatmul.mubr.msk.bf16.gmra.mrb[20].mxu1 %vm636_vm2, %v2957_v33 }
  0x91   : > { %2810 = vmatprep.mubr.msk.bf16.mxu0 %vm636_vm2, %v2936_v24  ;;  %2854 = vmatprep.mubr.msk.bf16.mxu1 %vm636_vm2, %v2958_v34 }
  0x98   : > { %2811 = vmatmul.mubr.msk.bf16.gmra.mrb[24].mxu0 %vm636_vm2, %v2937_v27  ;;  %2855 = vmatmul.mubr.msk.bf16.gmra.mrb[24].mxu1 %vm636_vm2, %v2959_v37 }
  0x99   : > { %2814 = vmatprep.mubr.msk.bf16.mxu0 %vm636_vm2, %v2938_v28  ;;  %2858 = vmatprep.mubr.msk.bf16.mxu1 %vm636_vm2, %v2960_v38 }
  0xa0   : > { %2815 = vmatmul.mubr.msk.bf16.gmra.mrb[28].mxu0 %vm636_vm2, %v2939_v31  ;;  %2859 = vmatmul.mubr.msk.bf16.gmra.mrb[28].mxu1 %vm636_vm2, %v2961_v41 }
  0xa1   : > { %2818 = vmatprep.mubr.msk.bf16.mxu0 %vm636_vm2, %v2940_v32  ;;  %2862 = vmatprep.mubr.msk.bf16.mxu1 %vm636_vm2, %v2962_v42 }
  0xa8   : > { %2819 = vmatmul.mubr.msk.bf16.gmra.mrb[32].mxu0 %vm636_vm2, %v2941_v35  ;;  %2863 = vmatmul.mubr.msk.bf16.gmra.mrb[32].mxu1 %vm636_vm2, %v2963_v44 }
  0xa9   : > { %2822 = vmatprep.mubr.msk.bf16.mxu0 %vm636_vm2, %v2942_v36  ;;  %2866 = vmatprep.mubr.msk.bf16.mxu1 %vm636_vm2, %v2964_v45 }
  0xb0   : > { %2823 = vmatmul.mubr.msk.bf16.gmra.mrb[36].mxu0 %vm636_vm2, %v2943_v39  ;;  %2867 = vmatmul.mubr.msk.bf16.gmra.mrb[36].mxu1 %vm636_vm2, %v2965_v46 }
  0xb1   : > { %2826 = vmatprep.mubr.msk.bf16.mxu0 %vm636_vm2, %v2944_v40 }
  0xb8   : > { %2827 = vmatmul.mubr.msk.bf16.gmra.mrb[40].mxu0 %vm636_vm2, %v2945_v43 }
 0x13b   : > { %v3374_v49 = vpop.f32.mrb[0].mxu0  ;;  %v3414_v12 = vpop.f32.mrb[0].mxu1 }
 0x13c   : > { %6137 = vst [vmem:[#allocation11_spill] sm:$0xff] %v3374_v49  ;;  %v3376_v50 = vpop.f32.mrb[1].mxu0  ;;  %v1143_v56 = vsel %vm1139_vm3, %v3374_v49, 0.0  ;;  %6148 = vst [vmem:[#allocation22_spill] sm:$0xff] %v3414_v12  ;;  %v3418_v15 = vpop.f32.mrb[1].mxu1 }
 0x13d   : > { %6138 = vst [vmem:[#allocation12_spill] sm:$0xff] %v3376_v50  ;;  %v3378_v51 = vpop.f32.mrb[2].mxu0  ;;  %v1140_v53 = vsel %vm1139_vm3, %v3376_v50, 0.0  ;;  %6150 = vst [vmem:[#allocation24_spill] sm:$0xff] %v3418_v15  ;;  %v3422_v17 = vpop.f32.mrb[2].mxu1 }
 0x13e   : > { %6139 = vst [vmem:[#allocation13_spill] sm:$0xff] %v3378_v51  ;;  %v3380_v52 = vpop.f32.mrb[3].mxu0  ;;  %v1145_v58 = vsel %vm1139_vm3, %v3378_v51, 0.0  ;;  %6151 = vst [vmem:[#allocation25_spill] sm:$0xff] %v3422_v17  ;;  %v3424_v19 = vpop.f32.mrb[3].mxu1 }
 0x13f   : > { %6140 = vst [vmem:[#allocation14_spill] sm:$0xff] %v3380_v52  ;;  %v1141_v54 = vsel %vm1139_vm3, %v3380_v52, 0.0  ;;  %6152 = vst [vmem:[#allocation26_spill] sm:$0xff] %v3424_v19 }
 0x140   : > { %v1142_v55 = vadd.f32 %v1141_v54, %v1140_v53 }
 0x142   : > { %v1144_v57 = vadd.f32 %v1143_v56, %v1142_v55 }
 0x143   : > { %v3390_v59 = vpop.f32.mrb[4].mxu0  ;;  %v3438_v28 = vpop.f32.mrb[4].mxu1 }
 0x144   : > { %6141 = vst [vmem:[#allocation15_spill] sm:$0xff] %v3390_v59  ;;  %v3392_v60 = vpop.f32.mrb[5].mxu0  ;;  %v1146_v61 = vadd.f32 %v1145_v58, %v1144_v57  ;;  %v1151_v4 = vsel %vm1139_vm3, %v3390_v59, 0.0  ;;  %6156 = vst [vmem:[#allocation30_spill] sm:$0xff] %v3438_v28  ;;  %v3442_v31 = vpop.f32.mrb[5].mxu1 }
 0x145   : > { %6142 = vst [vmem:[#allocation16_spill] sm:$0xff] %v3392_v60  ;;  %v1147_v62 = vsel %vm1139_vm3, %v3392_v60, 0.0  ;;  %v3396_v63 = vpop.f32.mrb[6].mxu0  ;;  %6158 = vst [vmem:[#allocation32_spill] sm:$0xff] %v3442_v31  ;;  %v3446_v33 = vpop.f32.mrb[6].mxu1 }
 0x146   : > { %6143 = vst [vmem:[#allocation17_spill] sm:$0xff] %v3396_v63  ;;  %v1148_v0 = vadd.f32 %v1147_v62, %v1146_v61  ;;  %v3398_v1 = vpop.f32.mrb[7].mxu0  ;;  %v1153_v6 = vsel %vm1139_vm3, %v3396_v63, 0.0  ;;  %6159 = vst [vmem:[#allocation33_spill] sm:$0xff] %v3446_v33  ;;  %v3448_v35 = vpop.f32.mrb[7].mxu1 }
 0x147   : > { %6144 = vst [vmem:[#allocation18_spill] sm:$0xff] %v3398_v1  ;;  %v1149_v2 = vsel %vm1139_vm3, %v3398_v1, 0.0  ;;  %6160 = vst [vmem:[#allocation34_spill] sm:$0xff] %v3448_v35 }
 0x148   : > { %v1150_v3 = vadd.f32 %v1149_v2, %v1148_v0 }
 0x14a   : > { %v1152_v5 = vadd.f32 %v1151_v4, %v1150_v3 }
 0x14b   : > { %v3406_v7 = vpop.f32.mrb[8].mxu0  ;;  %v3462_v44 = vpop.f32.mrb[8].mxu1 }
 0x14c   : > { %6145 = vst [vmem:[#allocation19_spill] sm:$0xff] %v3406_v7  ;;  %v3408_v8 = vpop.f32.mrb[9].mxu0  ;;  %v1154_v9 = vadd.f32 %v1153_v6, %v1152_v5  ;;  %v1159_v20 = vsel %vm1139_vm3, %v3406_v7, 0.0  ;;  %6164 = vst [vmem:[#allocation38_spill] sm:$0xff] %v3462_v44  ;;  %v3466_v47 = vpop.f32.mrb[9].mxu1  ;;  %v3636_v63 = vsel %vm1139_vm3, %v3462_v44, 0.0 }
 0x14d   : > { %6146 = vst [vmem:[#allocation20_spill] sm:$0xff] %v3408_v8  ;;  %v1155_v10 = vsel %vm1139_vm3, %v3408_v8, 0.0  ;;  %v3412_v11 = vpop.f32.mrb[10].mxu0  ;;  %6166 = vst [vmem:[#allocation40_spill] sm:$0xff] %v3466_v47  ;;  %v3470_v53 = vpop.f32.mrb[10].mxu1  ;;  %v3640_v59 = vsel %vm1139_vm3, %v3466_v47, 0.0 }
 0x14e   : > { %6147 = vst [vmem:[#allocation21_spill] sm:$0xff] %v3412_v11  ;;  %v1156_v13 = vadd.f32 %v1155_v10, %v1154_v9  ;;  %v3416_v14 = vpop.f32.mrb[11].mxu0  ;;  %v1161_v22 = vsel %vm1139_vm3, %v3412_v11, 0.0  ;;  %6167 = vst [vmem:[#allocation41_spill] sm:$0xff] %v3470_v53  ;;  %v3472_v55 = vpop.f32.mrb[11].mxu1  ;;  %v3644_v1 = vsel %vm1139_vm3, %v3470_v53, 0.0 }
 0x14f   : > { %6149 = vst [vmem:[#allocation23_spill] sm:$0xff] %v3416_v14  ;;  %v1157_v16 = vsel %vm1139_vm3, %v3416_v14, 0.0  ;;  %6168 = vst [vmem:[#allocation42_spill] sm:$0xff] %v3472_v55 }
 0x150   : > { %v1158_v18 = vadd.f32 %v1157_v16, %v1156_v13 }
 0x152   : > { %v1160_v21 = vadd.f32 %v1159_v20, %v1158_v18 }
 0x153   : > { %v3430_v23 = vpop.f32.mrb[12].mxu0  ;;  %v3486_v4 = vpop.f32.mrb[12].mxu1 }
 0x154   : > { %6153 = vst [vmem:[#allocation27_spill] sm:$0xff] %v3430_v23  ;;  %v3432_v24 = vpop.f32.mrb[13].mxu0  ;;  %v1162_v25 = vadd.f32 %v1161_v22, %v1160_v21  ;;  %v1167_v36 = vsel %vm1139_vm3, %v3430_v23, 0.0  ;;  %6172 = vst [vmem:[#allocation46_spill] sm:$0xff] %v3486_v4  ;;  %v3490_v9 = vpop.f32.mrb[13].mxu1 }
 0x155   : > { %6154 = vst [vmem:[#allocation28_spill] sm:$0xff] %v3432_v24  ;;  %v1163_v26 = vsel %vm1139_vm3, %v3432_v24, 0.0  ;;  %v3436_v27 = vpop.f32.mrb[14].mxu0  ;;  %6174 = vst [vmem:[#allocation48_spill] sm:$0xff] %v3490_v9  ;;  %v3494_v13 = vpop.f32.mrb[14].mxu1 }
 0x156   : > { %6155 = vst [vmem:[#allocation29_spill] sm:$0xff] %v3436_v27  ;;  %v1164_v29 = vadd.f32 %v1163_v26, %v1162_v25  ;;  %v3440_v30 = vpop.f32.mrb[15].mxu0  ;;  %v1169_v38 = vsel %vm1139_vm3, %v3436_v27, 0.0  ;;  %6175 = vst [vmem:[#allocation49_spill] sm:$0xff] %v3494_v13  ;;  %v3496_v18 = vpop.f32.mrb[15].mxu1  ;;  %v3598_v27 = vsel %vm1139_vm3, %v3414_v12, 0.0 }
 0x157   : > { %6157 = vst [vmem:[#allocation31_spill] sm:$0xff] %v3440_v30  ;;  %v1165_v32 = vsel %vm1139_vm3, %v3440_v30, 0.0  ;;  %6176 = vst [vmem:[#allocation50_spill] sm:$0xff] %v3496_v18  ;;  %v3616_v30 = vsel %vm1139_vm3, %v3442_v31, 0.0 }
 0x158   : > { %v1166_v34 = vadd.f32 %v1165_v32, %v1164_v29 }
 0x15a   : > { %v1168_v37 = vadd.f32 %v1167_v36, %v1166_v34 }
 0x15b   : > { %v3454_v39 = vpop.f32.mrb[16].mxu0  ;;  %v3510_v36 = vpop.f32.mrb[16].mxu1 }
 0x15c   : > { %6161 = vst [vmem:[#allocation35_spill] sm:$0xff] %v3454_v39  ;;  %v3456_v40 = vpop.f32.mrb[17].mxu0  ;;  %v1170_v41 = vadd.f32 %v1169_v38, %v1168_v37  ;;  %v1175_v56 = vsel %vm1139_vm3, %v3454_v39, 0.0  ;;  %6180 = vst [vmem:[#allocation54_spill] sm:$0xff] %v3510_v36 }
 0x15d   : > { %6162 = vst [vmem:[#allocation36_spill] sm:$0xff] %v3456_v40  ;;  %v1171_v42 = vsel %vm1139_vm3, %v3456_v40, 0.0  ;;  %v3460_v43 = vpop.f32.mrb[18].mxu0 }
 0x15e   : > { %6163 = vst [vmem:[#allocation37_spill] sm:$0xff] %v3460_v43  ;;  %v1172_v45 = vadd.f32 %v1171_v42, %v1170_v41  ;;  %v3464_v46 = vpop.f32.mrb[19].mxu0  ;;  %v1177_v58 = vsel %vm1139_vm3, %v3460_v43, 0.0  ;;  %v3514_v41 = vpop.f32.mrb[17].mxu1 }
 0x15f   : > { %6165 = vst [vmem:[#allocation39_spill] sm:$0xff] %v3464_v46  ;;  %v1173_v48 = vsel %vm1139_vm3, %v3464_v46, 0.0  ;;  %6182 = vst [vmem:[#allocation56_spill] sm:$0xff] %v3514_v41  ;;  %v1318_v46 = vlaneseq }
 0x160   : > { %v1174_v54 = vadd.f32 %v1173_v48, %v1172_v45  ;;  %v3518_v45 = vpop.f32.mrb[18].mxu1 }
 0x161   : > { %6183 = vst [vmem:[#allocation57_spill] sm:$0xff] %v3518_v45  ;;  %v3630_v7 = vshrl.u32 %v1318_v46, 7 }
 0x162   : > { %v1176_v57 = vadd.f32 %v1175_v56, %v1174_v54  ;;  %v3520_v54 = vpop.f32.mrb[19].mxu1 }
 0x163   : > { %v3478_v61 = vpop.f32.mrb[20].mxu0  ;;  %6184 = vst [vmem:[#allocation58_spill] sm:$0xff] %v3520_v54  ;;  %6210 = vst [vmem:[#allocation84_spill] sm:$0xff] %v3630_v7  ;;  %v3661_v49 = vadd.s32 264, %v3630_v7  ;;  %v3668_v44 = vadd.s32 272, %v3630_v7  ;;  %v3674_v47 = vadd.s32 288, %v3630_v7 }
 0x164   : > { %6169 = vst [vmem:[#allocation43_spill] sm:$0xff] %v3478_v61  ;;  %v3480_v62 = vpop.f32.mrb[21].mxu0  ;;  %v1178_v0 = vadd.f32 %v1177_v58, %v1176_v57  ;;  %v1183_v20 = vsel %vm1139_vm3, %v3478_v61, 0.0  ;;  %v3695_v12 = vadd.s32 328, %v3630_v7  ;;  %v3817_v54 = vadd.s32 600, %v3630_v7 }
 0x165   : > { %6170 = vst [vmem:[#allocation44_spill] sm:$0xff] %v3480_v62  ;;  %v1179_v2 = vsel %vm1139_vm3, %v3480_v62, 0.0  ;;  %v3484_v3 = vpop.f32.mrb[22].mxu0  ;;  %v3820_v45 = vadd.s32 608, %v3630_v7  ;;  %v3823_v41 = vadd.s32 616, %v3630_v7  ;;  %v3826_v36 = vadd.s32 624, %v3630_v7 }
 0x166   : > { %6171 = vst [vmem:[#allocation45_spill] sm:$0xff] %v3484_v3  ;;  %v1180_v5 = vadd.f32 %v1179_v2, %v1178_v0  ;;  %v3488_v6 = vpop.f32.mrb[23].mxu0  ;;  %v1185_v22 = vsel %vm1139_vm3, %v3484_v3, 0.0  ;;  %v3833_v13 = vadd.s32 640, %v3630_v7  ;;  %v3836_v4 = vadd.s32 648, %v3630_v7 }
 0x167   : > { %6173 = vst [vmem:[#allocation47_spill] sm:$0xff] %v3488_v6  ;;  %v1181_v10 = vsel %vm1139_vm3, %v3488_v6, 0.0  ;;  %6224 = vst [vmem:[#allocation98_spill] sm:$0xff] %v3823_v41  ;;  %v3839_v18 = vadd.s32 656, %v3630_v7 }
 0x168   : > { %v1182_v16 = vadd.f32 %v1181_v10, %v1180_v5  ;;  %6225 = vst [vmem:[#allocation99_spill] sm:$0xff] %v3826_v36  ;;  %6227 = vst [vmem:[#allocation101_spill] sm:$0xff] %v3833_v13 }
 0x169   : > { %6228 = vst [vmem:[#allocation102_spill] sm:$0xff] %v3836_v4  ;;  %6229 = vst [vmem:[#allocation103_spill] sm:$0xff] %v3839_v18 }
 0x16a   : > { %v1184_v21 = vadd.f32 %v1183_v20, %v1182_v16  ;;  %v3534_v20 = vpop.f32.mrb[20].mxu1 }
 0x16b   : > { %v3502_v25 = vpop.f32.mrb[24].mxu0  ;;  %6188 = vst [vmem:[#allocation62_spill] sm:$0xff] %v3534_v20  ;;  %v3814_v20 = vstv %s3721_s7 }
 0x16c   : > { %6177 = vst [vmem:[#allocation51_spill] sm:$0xff] %v3502_v25  ;;  %v3504_v26 = vpop.f32.mrb[25].mxu0  ;;  %v1186_v29 = vadd.f32 %v1185_v22, %v1184_v21  ;;  %v1191_v56 = vsel %vm1139_vm3, %v3502_v25, 0.0  ;;  %6223 = vst [vmem:[#allocation97_spill] sm:$0xff] %v3814_v20  ;;  %vm1442_vm4 = vcmp.lt.s32.totalorder %v3661_v49, %v3814_v20  ;;  %vm1443_vm5 = vcmp.lt.s32.totalorder %v3668_v44, %v3814_v20 }
 0x16d   : > { %6178 = vst [vmem:[#allocation52_spill] sm:$0xff] %v3504_v26  ;;  %v1187_v32 = vsel %vm1139_vm3, %v3504_v26, 0.0  ;;  %v3508_v34 = vpop.f32.mrb[26].mxu0  ;;  %vm1445_vm7 = vcmp.lt.s32.totalorder %v3674_v47, %v3814_v20  ;;  %vm1486_vm2 = vcmp.lt.s32.totalorder %v3823_v41, %v3814_v20  ;;  %vm1487_vm12 = vcmp.lt.s32.totalorder %v3826_v36, %v3814_v20 }
 0x16e   : > { %6179 = vst [vmem:[#allocation53_spill] sm:$0xff] %v3508_v34  ;;  %v1188_v37 = vadd.f32 %v1187_v32, %v1186_v29  ;;  %v3512_v38 = vpop.f32.mrb[27].mxu0  ;;  %v1193_v58 = vsel %vm1139_vm3, %v3508_v34, 0.0  ;;  %v3538_v29 = vpop.f32.mrb[21].mxu1  ;;  %vm1489_vm14 = vcmp.lt.s32.totalorder %v3833_v13, %v3814_v20  ;;  %vm1490_vm15 = vcmp.lt.s32.totalorder %v3836_v4, %v3814_v20  ;;  %v6235_v13 = vld [vmem:[#allocation54_spill] sm:$0xff] }
 0x16f   : > { %6181 = vst [vmem:[#allocation55_spill] sm:$0xff] %v3512_v38  ;;  %v1189_v42 = vsel %vm1139_vm3, %v3512_v38, 0.0  ;;  %6190 = vst [vmem:[#allocation64_spill] sm:$0xff] %v3538_v29  ;;  %v3811_v29 = vadd.s32 592, %v3630_v7  ;;  %vm1491_vm0 = vcmp.lt.s32.totalorder %v3839_v18, %v3814_v20  ;;  %v1263_v18 = vsel %vm1139_vm3, %v6235_v13, 0.0 }
 0x170   : > { %v1190_v48 = vadd.f32 %v1189_v42, %v1188_v37  ;;  %v3542_v37 = vpop.f32.mrb[22].mxu1 }
 0x171   : > { %6191 = vst [vmem:[#allocation65_spill] sm:$0xff] %v3542_v37  ;;  %v3801_v37 = vadd.s32 568, %v3630_v7 }
 0x172   : > { %v1192_v57 = vadd.f32 %v1191_v56, %v1190_v48  ;;  %v3544_v48 = vpop.f32.mrb[23].mxu1 }
 0x173   : > { %v3526_v0 = vpop.f32.mrb[28].mxu0  ;;  %6192 = vst [vmem:[#allocation66_spill] sm:$0xff] %v3544_v48  ;;  %v3798_v48 = vadd.s32 560, %v3630_v7 }
 0x174   : > { %6185 = vst [vmem:[#allocation59_spill] sm:$0xff] %v3526_v0  ;;  %v3528_v2 = vpop.f32.mrb[29].mxu0  ;;  %v1194_v5 = vadd.f32 %v1193_v58, %v1192_v57  ;;  %v1199_v56 = vsel %vm1139_vm3, %v3526_v0, 0.0 }
 0x175   : > { %6186 = vst [vmem:[#allocation60_spill] sm:$0xff] %v3528_v2  ;;  %v1195_v10 = vsel %vm1139_vm3, %v3528_v2, 0.0  ;;  %v3532_v16 = vpop.f32.mrb[30].mxu0 }
 0x176   : > { %6187 = vst [vmem:[#allocation61_spill] sm:$0xff] %v3532_v16  ;;  %v1196_v21 = vadd.f32 %v1195_v10, %v1194_v5  ;;  %v3536_v22 = vpop.f32.mrb[31].mxu0  ;;  %v1201_v58 = vsel %vm1139_vm3, %v3532_v16, 0.0  ;;  %v3746_v16 = vadd.s32 440, %v3630_v7 }
 0x177   : > { %6189 = vst [vmem:[#allocation63_spill] sm:$0xff] %v3536_v22  ;;  %v1197_v32 = vsel %vm1139_vm3, %v3536_v22, 0.0 }
 0x178   : > { %v1198_v42 = vadd.f32 %v1197_v32, %v1196_v21  ;;  %v3558_v21 = vpop.f32.mrb[24].mxu1 }
 0x179   : > { %6196 = vst [vmem:[#allocation70_spill] sm:$0xff] %v3558_v21  ;;  %v3562_v0 = vpop.f32.mrb[25].mxu1  ;;  %v3786_v21 = vadd.s32 528, %v3630_v7 }
 0x17a   : > { %v1200_v57 = vadd.f32 %v1199_v56, %v1198_v42  ;;  %6198 = vst [vmem:[#allocation72_spill] sm:$0xff] %v3562_v0  ;;  %v3566_v56 = vpop.f32.mrb[26].mxu1  ;;  %v3795_v0 = vadd.s32 552, %v3630_v7  ;;  %v6242_v13 = vld [vmem:[#allocation66_spill] sm:$0xff] }
 0x17b   : > { %v3550_v5 = vpop.f32.mrb[32].mxu0  ;;  %6199 = vst [vmem:[#allocation73_spill] sm:$0xff] %v3566_v56  ;;  %v3568_v26 = vpop.f32.mrb[27].mxu1  ;;  %v1269_v36 = vsel %vm1139_vm3, %v6242_v13, 0.0 }
 0x17c   : > { %6193 = vst [vmem:[#allocation67_spill] sm:$0xff] %v3550_v5  ;;  %v3552_v10 = vpop.f32.mrb[33].mxu0  ;;  %v1202_v2 = vadd.f32 %v1201_v58, %v1200_v57  ;;  %6200 = vst [vmem:[#allocation74_spill] sm:$0xff] %v3568_v26  ;;  %v1207_v57 = vsel %vm1139_vm3, %v3550_v5, 0.0  ;;  %v3735_v5 = vadd.s32 416, %v3630_v7  ;;  %v3792_v26 = vadd.s32 544, %v3630_v7 }
 0x17d   : > { %6194 = vst [vmem:[#allocation68_spill] sm:$0xff] %v3552_v10  ;;  %v1203_v22 = vsel %vm1139_vm3, %v3552_v10, 0.0  ;;  %v3556_v34 = vpop.f32.mrb[34].mxu0  ;;  %v3741_v10 = vadd.s32 432, %v3630_v7 }
 0x17e   : > { %6195 = vst [vmem:[#allocation69_spill] sm:$0xff] %v3556_v34  ;;  %v1204_v32 = vadd.f32 %v1203_v22, %v1202_v2  ;;  %v3560_v25 = vpop.f32.mrb[35].mxu0  ;;  %v1209_v3 = vsel %vm1139_vm3, %v3556_v34, 0.0  ;;  %v3729_v34 = vadd.s32 400, %v3630_v7 }
 0x17f   : > { %6197 = vst [vmem:[#allocation71_spill] sm:$0xff] %v3560_v25  ;;  %v1205_v42 = vsel %vm1139_vm3, %v3560_v25, 0.0  ;;  %v3738_v25 = vadd.s32 424, %v3630_v7 }
 0x180   : > { %v1206_v38 = vadd.f32 %v1205_v42, %v1204_v32  ;;  %v3582_v32 = vpop.f32.mrb[28].mxu1 }
 0x181   : > { %6204 = vst [vmem:[#allocation78_spill] sm:$0xff] %v3582_v32  ;;  %v3586_v39 = vpop.f32.mrb[29].mxu1 }
 0x182   : > { %v1208_v58 = vadd.f32 %v1207_v57, %v1206_v38  ;;  %6206 = vst [vmem:[#allocation80_spill] sm:$0xff] %v3586_v39  ;;  %v3590_v57 = vpop.f32.mrb[30].mxu1  ;;  %v3774_v39 = vadd.s32 504, %v3630_v7 }
 0x183   : > { %v3574_v2 = vpop.f32.mrb[36].mxu0  ;;  %6207 = vst [vmem:[#allocation81_spill] sm:$0xff] %v3590_v57  ;;  %v3766_v57 = vadd.s32 488, %v3630_v7 }
 0x184   : > { %6201 = vst [vmem:[#allocation75_spill] sm:$0xff] %v3574_v2  ;;  %v3576_v22 = vpop.f32.mrb[37].mxu0  ;;  %v1210_v61 = vadd.f32 %v1209_v3, %v1208_v58  ;;  %v3592_v3 = vpop.f32.mrb[31].mxu1  ;;  %v1215_v58 = vsel %vm1139_vm3, %v3574_v2, 0.0  ;;  %v3715_v2 = vadd.s32 376, %v3630_v7 }
 0x185   : > { %6202 = vst [vmem:[#allocation76_spill] sm:$0xff] %v3576_v22  ;;  %v1211_v6 = vsel %vm1139_vm3, %v3576_v22, 0.0  ;;  %v3580_v62 = vpop.f32.mrb[38].mxu0  ;;  %6208 = vst [vmem:[#allocation82_spill] sm:$0xff] %v3592_v3  ;;  %v3658_v51 = vpop.f32.mrb[32].mxu1  ;;  %v3726_v22 = vadd.s32 392, %v3630_v7 }
 0x186   : > { %6203 = vst [vmem:[#allocation77_spill] sm:$0xff] %v3580_v62  ;;  %v1212_v42 = vadd.f32 %v1211_v6, %v1210_v61  ;;  %v3584_v43 = vpop.f32.mrb[39].mxu0  ;;  %v1227_v61 = vsel %vm1139_vm3, %v3418_v15, 0.0  ;;  %v3604_v6 = vsel %vm1139_vm3, %v3422_v17, 0.0  ;;  %v1217_v24 = vsel %vm1139_vm3, %v3580_v62, 0.0  ;;  %6214 = vst [vmem:[#allocation88_spill] sm:$0xff] %v3658_v51 }
 0x187   : > { %6205 = vst [vmem:[#allocation79_spill] sm:$0xff] %v3584_v43  ;;  %v1213_v38 = vsel %vm1139_vm3, %v3584_v43, 0.0  ;;  %v3665_v53 = vpop.f32.mrb[33].mxu1  ;;  %v3692_v17 = vadd.s32 320, %v3630_v7  ;;  %v3712_v62 = vadd.s32 368, %v3630_v7  ;;  %v3718_v43 = vadd.s32 384, %v3630_v7 }
 0x188   : > { %v1214_v40 = vadd.f32 %v1213_v38, %v1212_v42  ;;  %v3608_v42 = vsel %vm1139_vm3, %v3424_v19, 0.0  ;;  %v3612_v38 = vsel %vm1139_vm3, %v3438_v28, 0.0  ;;  %6216 = vst [vmem:[#allocation90_spill] sm:$0xff] %v3665_v53  ;;  %v3687_v28 = vadd.s32 312, %v3630_v7 }
 0x189   : > { %v3698_v19 = vadd.s32 336, %v3630_v7  ;;  %v3752_v51 = vadd.s32 456, %v3630_v7  ;;  %v3760_v53 = vadd.s32 472, %v3630_v7  ;;  %v3771_v3 = vadd.s32 496, %v3630_v7 }
 0x18a   : > { %v1216_v23 = vadd.f32 %v1215_v58, %v1214_v40  ;;  %v3624_v40 = vsel %vm1139_vm3, %v3446_v33, 0.0  ;;  %v3628_v58 = vsel %vm1139_vm3, %v3448_v35, 0.0  ;;  %v3678_v33 = vpop.f32.mrb[34].mxu1  ;;  %vm1448_vm10 = vcmp.lt.s32.totalorder %v3687_v28, %v3814_v20 }
 0x18b   : > { %v3620_v11 = vpop.f32.mrb[40].mxu0  ;;  %6217 = vst [vmem:[#allocation91_spill] sm:$0xff] %v3678_v33  ;;  %v3689_v31 = vpop.f32.mrb[35].mxu1  ;;  %v3749_v33 = vadd.s32 448, %v3630_v7  ;;  %vm1449_vm11 = vcmp.lt.s32.totalorder %v3692_v17, %v3814_v20 }
 0x18c   : > { %6209 = vst [vmem:[#allocation83_spill] sm:$0xff] %v3620_v11  ;;  %v3632_v14 = vpop.f32.mrb[41].mxu0  ;;  %v1218_v8 = vadd.f32 %v1217_v24, %v1216_v23  ;;  %v3652_v23 = vsel %vm1139_vm3, %v3472_v55, 0.0  ;;  %v3656_v24 = vsel %vm1139_vm3, %v3490_v9, 0.0  ;;  %v3671_v55 = vadd.s32 280, %v3630_v7  ;;  %6218 = vst [vmem:[#allocation92_spill] sm:$0xff] %v3689_v31 }
 0x18d   : > { %6211 = vst [vmem:[#allocation85_spill] sm:$0xff] %v3632_v14  ;;  %v1219_v60 = vsel %vm1139_vm3, %v3632_v14, 0.0  ;;  %v3648_v46 = vpop.f32.mrb[42].mxu0  ;;  %6213 = vst [vmem:[#allocation87_spill] sm:$0xff] %v3656_v24  ;;  %v1223_v15 = vsel %vm1139_vm3, %v3620_v11, 0.0  ;;  %v3706_v14 = vadd.s32 352, %v3630_v7 }
 0x18e   : > { %6212 = vst [vmem:[#allocation86_spill] sm:$0xff] %v3648_v46  ;;  %v1220_v52 = vadd.f32 %v1219_v60, %v1218_v8  ;;  %v3663_v50 = vpop.f32.mrb[43].mxu0  ;;  %v3681_v60 = vadd.s32 296, %v3630_v7  ;;  %v3684_v8 = vadd.s32 304, %v3630_v7  ;;  %v1225_v11 = vsel %vm1139_vm3, %v3648_v46, 0.0  ;;  %v3743_v46 = vpop.f32.mrb[36].mxu1 }
 0x18f   : > { %6215 = vst [vmem:[#allocation89_spill] sm:$0xff] %v3663_v50  ;;  %v1221_v9 = vsel %vm1139_vm3, %v3663_v50, 0.0  ;;  %v3703_v50 = vadd.s32 344, %v3630_v7  ;;  %6219 = vst [vmem:[#allocation93_spill] sm:$0xff] %v3743_v46  ;;  %v3757_v31 = vpop.f32.mrb[37].mxu1  ;;  %v3763_v46 = vadd.s32 480, %v3630_v7  ;;  %vm1444_vm6 = vcmp.lt.s32.totalorder %v3671_v55, %v3814_v20 }
 0x190   : > { %v1222_v35 = vadd.f32 %v1221_v9, %v1220_v52  ;;  %v3709_v52 = vadd.s32 360, %v3630_v7  ;;  %6220 = vst [vmem:[#allocation94_spill] sm:$0xff] %v3757_v31  ;;  %v3768_v32 = vpop.f32.mrb[38].mxu1  ;;  %v3842_v24 = vadd.s32 664, %v3630_v7  ;;  %vm1446_vm8 = vcmp.lt.s32.totalorder %v3681_v60, %v3814_v20 }
 0x191   : > { %6221 = vst [vmem:[#allocation95_spill] sm:$0xff] %v3768_v32  ;;  %v3783_v56 = vpop.f32.mrb[39].mxu1  ;;  %v3789_v32 = vadd.s32 536, %v3630_v7  ;;  %vm1447_vm9 = vcmp.lt.s32.totalorder %v3684_v8, %v3814_v20 }
 0x192   : > { %v1224_v9 = vadd.f32 %v1223_v15, %v1222_v35  ;;  %v3732_v15 = vadd.s32 408, %v3630_v7  ;;  %6222 = vst [vmem:[#allocation96_spill] sm:$0xff] %v3783_v56  ;;  %v3808_v56 = vadd.s32 584, %v3630_v7  ;;  %6230 = vst [vmem:[#allocation104_spill] sm:$0xff] %v3842_v24  ;;  %vm1492_vm1 = vcmp.lt.s32.totalorder %v3842_v24, %v3814_v20 }
 0x194   : > { %v1226_v35 = vadd.f32 %v1225_v11, %v1224_v9  ;;  %v3755_v11 = vadd.s32 464, %v3630_v7 }
 0x196   : > { %v1228_v9 = vadd.f32 %v1227_v61, %v1226_v35  ;;  %v3777_v61 = vadd.s32 512, %v3630_v7  ;;  %v3780_v35 = vadd.s32 520, %v3630_v7 }
 0x198   : > { %v1230_v31 = vadd.f32 %v3608_v42, %v1228_v9  ;;  %v3804_v42 = vadd.s32 576, %v3630_v7 }
 0x19a   : > { %v1232_v9 = vadd.f32 %v3598_v27, %v1230_v31  ;;  %v3830_v31 = vadd.s32 632, %v3630_v7 }
 0x19c   : > { %v1234_v27 = vadd.f32 %v3604_v6, %v1232_v9  ;;  %6226 = vst [vmem:[#allocation100_spill] sm:$0xff] %v3830_v31  ;;  %vm1488_vm13 = vcmp.lt.s32.totalorder %v3830_v31, %v3814_v20  ;;  %v6231_v9 = vld [vmem:[#allocation87_spill] sm:$0xff]  ;;  %v6236_v31 = vld [vmem:[#allocation56_spill] sm:$0xff] }
 0x19d   : > { %v1259_v24 = vsel %vm1139_vm3, %v6236_v31, 0.0  ;;  %v6243_v31 = vld [vmem:[#allocation72_spill] sm:$0xff] }
 0x19e   : > { %v1236_v6 = vadd.f32 %v3616_v30, %v1234_v27  ;;  %v1275_v41 = vsel %vm1139_vm3, %v6243_v31, 0.0 }
 0x1a0   : > { %v1238_v30 = vadd.f32 %v3628_v58, %v1236_v6  ;;  %v6232_v6 = vld [vmem:[#allocation50_spill] sm:$0xff] }
 0x1a2   : > { %v1240_v58 = vadd.f32 %v3612_v38, %v1238_v30  ;;  %v1253_v30 = vsel %vm1139_vm3, %v6232_v6, 0.0  ;;  %v6240_v6 = vld [vmem:[#allocation64_spill] sm:$0xff] }
 0x1a4   : > { %v1242_v38 = vadd.f32 %v3624_v40, %v1240_v58 }
 0x1a6   : > { %v1244_v40 = vadd.f32 %v3640_v59, %v1242_v38  ;;  %v6233_v38 = vld [vmem:[#allocation46_spill] sm:$0xff] }
 0x1a8   : > { %v1246_v59 = vadd.f32 %v3652_v23, %v1244_v40  ;;  %v1255_v40 = vsel %vm1139_vm3, %v6233_v38, 0.0 }
 0x1aa   : > { %v1248_v23 = vadd.f32 %v3636_v63, %v1246_v59  ;;  %v6234_v59 = vld [vmem:[#allocation49_spill] sm:$0xff] }
 0x1ab   : > { %v1257_v7 = vsel %vm1139_vm3, %v6234_v59, 0.0  ;;  %v1267_v59 = vsel %vm1139_vm3, %v6240_v6, 0.0 }
 0x1ac   : > { %v1250_v63 = vadd.f32 %v3644_v1, %v1248_v23  ;;  %v6237_v1 = vld [vmem:[#allocation57_spill] sm:$0xff] }
 0x1ad   : > { %v1265_v23 = vsel %vm1139_vm3, %v6237_v1, 0.0  ;;  %v6100_v1 = vmov 0.0  }
 0x1ae   : > { %v1252_v27 = vadd.f32 %v6231_v9, %v1250_v63  ;;  %v6238_v63 = vld [vmem:[#allocation58_spill] sm:$0xff]  ;;  %v4001_v49 = vsel %vm1445_vm7, 1.0, %v6100_v1  ;;  %v4007_v44 = vsel %vm1446_vm8, 1.0, %v6100_v1  ;;  %v4019_v55 = vsel %vm1448_vm10, 1.0, %v6100_v1 }
 0x1af   : > { %v1261_v9 = vsel %vm1139_vm3, %v6238_v63, 0.0  ;;  %6247 = vst [vmem:[#allocation107_spill] sm:$0xff] %v4001_v49  ;;  %6248 = vst [vmem:[#allocation108_spill] sm:$0xff] %v4007_v44  ;;  %v4025_v47 = vsel %vm1449_vm11, 1.0, %v6100_v1  ;;  %vm6258_vm7 = vcmp.lt.s32.totalorder %v3706_v14, %v3814_v20  ;;  %vm6260_vm8 = vcmp.lt.s32.totalorder %v3709_v52, %v3814_v20 }
 0x1b0   : > { %v1254_v58 = vadd.f32 %v1253_v30, %v1252_v27  ;;  %v6239_v30 = vld [vmem:[#allocation62_spill] sm:$0xff]  ;;  %6250 = vst [vmem:[#allocation110_spill] sm:$0xff] %v4019_v55  ;;  %6251 = vst [vmem:[#allocation111_spill] sm:$0xff] %v4025_v47  ;;  %vm6264_vm10 = vcmp.lt.s32.totalorder %v3715_v2, %v3814_v20  ;;  %vm6266_vm11 = vcmp.lt.s32.totalorder %v3718_v43, %v3814_v20 }
 0x1b1   : > { %v1271_v38 = vsel %vm1139_vm3, %v6239_v30, 0.0  ;;  %v3995_v30 = vsel %vm1444_vm6, 1.0, %v6100_v1  ;;  %vm6256_vm6 = vcmp.lt.s32.totalorder %v3703_v50, %v3814_v20  ;;  %v4067_v50 = vsel %vm6264_vm10, 1.0, %v6100_v1 }
 0x1b2   : > { %v1256_v4 = vadd.f32 %v1255_v40, %v1254_v58  ;;  %v6241_v58 = vld [vmem:[#allocation65_spill] sm:$0xff]  ;;  %6246 = vst [vmem:[#allocation106_spill] sm:$0xff] %v3995_v30  ;;  %v4043_v17 = vsel %vm6256_vm6, 1.0, %v6100_v1  ;;  %6265 = vst [vmem:[#allocation118_spill] sm:$0xff] %v4067_v50  ;;  %v4073_v14 = vsel %vm6266_vm11, 1.0, %v6100_v1  ;;  %vm6272_vm6 = vcmp.lt.s32.totalorder %v3732_v15, %v3814_v20 }
 0x1b3   : > { %v1273_v40 = vsel %vm1139_vm3, %v6241_v58, 0.0  ;;  %6257 = vst [vmem:[#allocation114_spill] sm:$0xff] %v4043_v17  ;;  %6267 = vst [vmem:[#allocation119_spill] sm:$0xff] %v4073_v14  ;;  %v4091_v43 = vsel %vm6272_vm6, 1.0, %v6100_v1  ;;  %vm6280_vm10 = vcmp.lt.s32.totalorder %v3746_v16, %v3814_v20  ;;  %vm6282_vm11 = vcmp.lt.s32.totalorder %v3749_v33, %v3814_v20 }
 0x1b4   : > { %v1258_v27 = vadd.f32 %v1257_v7, %v1256_v4  ;;  %v3983_v7 = vsel %vm1442_vm4, 1.0, %v6100_v1  ;;  %v3989_v4 = vsel %vm1443_vm5, 1.0, %v6100_v1  ;;  %vm6252_vm4 = vcmp.lt.s32.totalorder %v3695_v12, %v3814_v20  ;;  %6273 = vst [vmem:[#allocation122_spill] sm:$0xff] %v4091_v43 }
 0x1b5   : > { %6244 = vst [vmem:[#allocation87_spill] sm:$0xff] %v3983_v7  ;;  %6245 = vst [vmem:[#allocation105_spill] sm:$0xff] %v3989_v4  ;;  %v4031_v60 = vsel %vm6252_vm4, 1.0, %v6100_v1  ;;  %vm6254_vm5 = vcmp.lt.s32.totalorder %v3698_v19, %v3814_v20  ;;  %v4049_v12 = vsel %vm6258_vm7, 1.0, %v6100_v1  ;;  %vm6268_vm4 = vcmp.lt.s32.totalorder %v3726_v22, %v3814_v20 }
 0x1b6   : > { %v1260_v58 = vadd.f32 %v1259_v24, %v1258_v27  ;;  %v4013_v24 = vsel %vm1447_vm9, 1.0, %v6100_v1  ;;  %6253 = vst [vmem:[#allocation112_spill] sm:$0xff] %v4031_v60  ;;  %v4037_v28 = vsel %vm6254_vm5, 1.0, %v6100_v1  ;;  %6259 = vst [vmem:[#allocation115_spill] sm:$0xff] %v4049_v12  ;;  %vm6262_vm9 = vcmp.lt.s32.totalorder %v3712_v62, %v3814_v20 }
 0x1b7   : > { %6249 = vst [vmem:[#allocation109_spill] sm:$0xff] %v4013_v24  ;;  %6255 = vst [vmem:[#allocation113_spill] sm:$0xff] %v4037_v28  ;;  %v4061_v19 = vsel %vm6262_vm9, 1.0, %v6100_v1  ;;  %v4079_v62 = vsel %vm6268_vm4, 1.0, %v6100_v1  ;;  %vm6270_vm5 = vcmp.lt.s32.totalorder %v3729_v34, %v3814_v20  ;;  %vm6274_vm7 = vcmp.lt.s32.totalorder %v3735_v5, %v3814_v20 }
 0x1b8   : > { %v1262_v8 = vadd.f32 %v1261_v9, %v1260_v58  ;;  %v4055_v9 = vsel %vm6260_vm8, 1.0, %v6100_v1  ;;  %6263 = vst [vmem:[#allocation117_spill] sm:$0xff] %v4061_v19  ;;  %6269 = vst [vmem:[#allocation120_spill] sm:$0xff] %v4079_v62  ;;  %v4085_v2 = vsel %vm6270_vm5, 1.0, %v6100_v1  ;;  %vm6276_vm8 = vcmp.lt.s32.totalorder %v3738_v25, %v3814_v20 }
 0x1b9   : > { %6261 = vst [vmem:[#allocation116_spill] sm:$0xff] %v4055_v9  ;;  %6271 = vst [vmem:[#allocation121_spill] sm:$0xff] %v4085_v2  ;;  %v4103_v22 = vsel %vm6276_vm8, 1.0, %v6100_v1  ;;  %vm6278_vm9 = vcmp.lt.s32.totalorder %v3741_v10, %v3814_v20  ;;  %v4115_v15 = vsel %vm6280_vm10, 1.0, %v6100_v1  ;;  %v4121_v25 = vsel %vm6282_vm11, 1.0, %v6100_v1 }
 0x1ba   : > { %v1264_v52 = vadd.f32 %v1263_v18, %v1262_v8  ;;  %v4097_v18 = vsel %vm6274_vm7, 1.0, %v6100_v1  ;;  %6277 = vst [vmem:[#allocation124_spill] sm:$0xff] %v4103_v22  ;;  %v4109_v34 = vsel %vm6278_vm9, 1.0, %v6100_v1  ;;  %6281 = vst [vmem:[#allocation126_spill] sm:$0xff] %v4115_v15  ;;  %vm6284_vm4 = vcmp.lt.s32.totalorder %v3752_v51, %v3814_v20 }
 0x1bb   : > { %6275 = vst [vmem:[#allocation123_spill] sm:$0xff] %v4097_v18  ;;  %6279 = vst [vmem:[#allocation125_spill] sm:$0xff] %v4109_v34  ;;  %v4127_v10 = vsel %vm6284_vm4, 1.0, %v6100_v1  ;;  %vm6286_vm5 = vcmp.lt.s32.totalorder %v3755_v11, %v3814_v20  ;;  %vm6288_vm6 = vcmp.lt.s32.totalorder %v3760_v53, %v3814_v20  ;;  %vm6290_vm7 = vcmp.lt.s32.totalorder %v3763_v46, %v3814_v20 }
 0x1bc   : > { %v1266_v5 = vadd.f32 %v1265_v23, %v1264_v52  ;;  %6283 = vst [vmem:[#allocation127_spill] sm:$0xff] %v4121_v25  ;;  %6285 = vst [vmem:[#allocation128_spill] sm:$0xff] %v4127_v10  ;;  %v4133_v16 = vsel %vm6286_vm5, 1.0, %v6100_v1  ;;  %v4139_v23 = vsel %vm6288_vm6, 1.0, %v6100_v1  ;;  %v4145_v33 = vsel %vm6290_vm7, 1.0, %v6100_v1 }
 0x1bd   : > { %6287 = vst [vmem:[#allocation129_spill] sm:$0xff] %v4133_v16  ;;  %6289 = vst [vmem:[#allocation130_spill] sm:$0xff] %v4139_v23  ;;  %vm6292_vm8 = vcmp.lt.s32.totalorder %v3766_v57, %v3814_v20  ;;  %vm6294_vm9 = vcmp.lt.s32.totalorder %v3771_v3, %v3814_v20  ;;  %vm6296_vm10 = vcmp.lt.s32.totalorder %v3774_v39, %v3814_v20  ;;  %v4265_v52 = vsel %vm1489_vm14, 1.0, %v6100_v1 }
 0x1be   : > { %6291 = vst [vmem:[#allocation131_spill] sm:$0xff] %v4145_v33  ;;  %v4151_v51 = vsel %vm6292_vm8, 1.0, %v6100_v1  ;;  %v4157_v11 = vsel %vm6294_vm9, 1.0, %v6100_v1  ;;  %v1268_v53 = vadd.f32 %v1267_v59, %v1266_v5  ;;  %v4163_v46 = vsel %vm6296_vm10, 1.0, %v6100_v1  ;;  %6331 = vst [vmem:[#allocation101_spill] sm:$0xff] %v4265_v52  ;;  %v6353_v33 = vld [vmem:[#allocation84_spill] sm:$0xff] }
 0x1bf   : > { %6293 = vst [vmem:[#allocation132_spill] sm:$0xff] %v4151_v51  ;;  %6295 = vst [vmem:[#allocation133_spill] sm:$0xff] %v4157_v11  ;;  %vm6298_vm11 = vcmp.lt.s32.totalorder %v3777_v61, %v3814_v20  ;;  %vm6300_vm4 = vcmp.lt.s32.totalorder %v3780_v35, %v3814_v20  ;;  %vm6302_vm5 = vcmp.lt.s32.totalorder %v3786_v21, %v3814_v20  ;;  %v4277_v27 = vsel %vm1491_vm0, 1.0, %v6100_v1 }
 0x1c0   : > { %6297 = vst [vmem:[#allocation134_spill] sm:$0xff] %v4163_v46  ;;  %v4169_v57 = vsel %vm6298_vm11, 1.0, %v6100_v1  ;;  %v4175_v3 = vsel %vm6300_vm4, 1.0, %v6100_v1  ;;  %v4181_v59 = vsel %vm6302_vm5, 1.0, %v6100_v1  ;;  %vm6304_vm6 = vcmp.lt.s32.totalorder %v3789_v32, %v3814_v20  ;;  %6335 = vst [vmem:[#allocation103_spill] sm:$0xff] %v4277_v27  ;;  %v6341_v27 = vld [vmem:[#allocation80_spill] sm:$0xff] }
 0x1c1   : > { %6299 = vst [vmem:[#allocation135_spill] sm:$0xff] %v4169_v57  ;;  %6301 = vst [vmem:[#allocation136_spill] sm:$0xff] %v4175_v3  ;;  %v4187_v39 = vsel %vm6304_vm6, 1.0, %v6100_v1  ;;  %vm6306_vm7 = vcmp.lt.s32.totalorder %v3792_v26, %v3814_v20  ;;  %vm6308_vm8 = vcmp.lt.s32.totalorder %v3795_v0, %v3814_v20  ;;  %v1270_v21 = vadd.f32 %v1269_v36, %v1268_v53 }
 0x1c2   : > { %6303 = vst [vmem:[#allocation137_spill] sm:$0xff] %v4181_v59  ;;  %6305 = vst [vmem:[#allocation138_spill] sm:$0xff] %v4187_v39  ;;  %v4193_v61 = vsel %vm6306_vm7, 1.0, %v6100_v1  ;;  %v4199_v35 = vsel %vm6308_vm8, 1.0, %v6100_v1  ;;  %vm6310_vm9 = vcmp.lt.s32.totalorder %v3798_v48, %v3814_v20  ;;  %vm6312_vm10 = vcmp.lt.s32.totalorder %v3801_v37, %v3814_v20  ;;  %v6350_v59 = vld [vmem:[#allocation96_spill] sm:$0xff] }
 0x1c3   : > { %6307 = vst [vmem:[#allocation139_spill] sm:$0xff] %v4193_v61  ;;  %6309 = vst [vmem:[#allocation140_spill] sm:$0xff] %v4199_v35  ;;  %v4205_v32 = vsel %vm6310_vm9, 1.0, %v6100_v1  ;;  %v4211_v26 = vsel %vm6312_vm10, 1.0, %v6100_v1  ;;  %vm6314_vm11 = vcmp.lt.s32.totalorder %v3804_v42, %v3814_v20  ;;  %vm6316_vm4 = vcmp.lt.s32.totalorder %v3808_v56, %v3814_v20 }
 0x1c4   : > { %6311 = vst [vmem:[#allocation141_spill] sm:$0xff] %v4205_v32  ;;  %6313 = vst [vmem:[#allocation142_spill] sm:$0xff] %v4211_v26  ;;  %v4217_v0 = vsel %vm6314_vm11, 1.0, %v6100_v1  ;;  %v4223_v36 = vsel %vm6316_vm4, 1.0, %v6100_v1  ;;  %vm6318_vm5 = vcmp.lt.s32.totalorder %v3811_v29, %v3814_v20  ;;  %vm6320_vm6 = vcmp.lt.s32.totalorder %v3817_v54, %v3814_v20  ;;  %v6346_v32 = vld [vmem:[#allocation92_spill] sm:$0xff] }
 0x1c5   : > { %6315 = vst [vmem:[#allocation143_spill] sm:$0xff] %v4217_v0  ;;  %6317 = vst [vmem:[#allocation144_spill] sm:$0xff] %v4223_v36  ;;  %v4229_v48 = vsel %vm6318_vm5, 1.0, %v6100_v1  ;;  %v4235_v37 = vsel %vm6320_vm6, 1.0, %v6100_v1  ;;  %vm6322_vm7 = vcmp.lt.s32.totalorder %v3820_v45, %v3814_v20  ;;  %v1272_v56 = vadd.f32 %v1271_v38, %v1270_v21 }
 0x1c6   : > { %6319 = vst [vmem:[#allocation145_spill] sm:$0xff] %v4229_v48  ;;  %6321 = vst [vmem:[#allocation146_spill] sm:$0xff] %v4235_v37  ;;  %v4241_v42 = vsel %vm6322_vm7, 1.0, %v6100_v1  ;;  %v4247_v29 = vsel %vm1486_vm2, 1.0, %v6100_v1  ;;  %v4253_v54 = vsel %vm1487_vm12, 1.0, %v6100_v1  ;;  %v4259_v45 = vsel %vm1488_vm13, 1.0, %v6100_v1 }
 0x1c7   : > { %6323 = vst [vmem:[#allocation147_spill] sm:$0xff] %v4241_v42  ;;  %6325 = vst [vmem:[#allocation98_spill] sm:$0xff] %v4247_v29  ;;  %v4271_v53 = vsel %vm1490_vm15, 1.0, %v6100_v1  ;;  %v4283_v8 = vsel %vm1492_vm1, 1.0, %v6100_v1  ;;  %v1274_v38 = vadd.f32 %v1273_v40, %v1272_v56  ;;  %v6339_v29 = vld [vmem:[#allocation70_spill] sm:$0xff]  ;;  %v6340_v37 = vld [vmem:[#allocation73_spill] sm:$0xff] }
 0x1c8   : > { %6327 = vst [vmem:[#allocation99_spill] sm:$0xff] %v4253_v54  ;;  %6329 = vst [vmem:[#allocation100_spill] sm:$0xff] %v4259_v45  ;;  %v6338_v45 = vld [vmem:[#allocation74_spill] sm:$0xff]  ;;  %v1281_v21 = vsel %vm1139_vm3, %v6340_v37, 0.0  ;;  %v1283_v48 = vsel %vm1139_vm3, %v6341_v27, 0.0 }
 0x1c9   : > { %6333 = vst [vmem:[#allocation102_spill] sm:$0xff] %v4271_v53  ;;  %6337 = vst [vmem:[#allocation104_spill] sm:$0xff] %v4283_v8  ;;  %v1276_v52 = vadd.f32 %v1275_v41, %v1274_v38  ;;  %v1277_v54 = vsel %vm1139_vm3, %v6338_v45, 0.0  ;;  %v1279_v53 = vsel %vm1139_vm3, %v6339_v29, 0.0  ;;  %v6342_v1 = vld [vmem:[#allocation82_spill] sm:$0xff] }
 0x1ca   : > { %v1285_v40 = vsel %vm1139_vm3, %v6342_v1, 0.0  ;;  %v6343_v56 = vld [vmem:[#allocation78_spill] sm:$0xff] }
 0x1cb   : > { %v1278_v5 = vadd.f32 %v1277_v54, %v1276_v52  ;;  %v1287_v38 = vsel %vm1139_vm3, %v6343_v56, 0.0  ;;  %v6344_v52 = vld [vmem:[#allocation81_spill] sm:$0xff] }
 0x1cc   : > { %v1289_v8 = vsel %vm1139_vm3, %v6344_v52, 0.0 }
 0x1cd   : > { %v1280_v42 = vadd.f32 %v1279_v53, %v1278_v5  ;;  %v6345_v53 = vld [vmem:[#allocation90_spill] sm:$0xff] }
 0x1ce   : > { %v1291_v5 = vsel %vm1139_vm3, %v6345_v53, 0.0 }
 0x1cf   : > { %v1282_v36 = vadd.f32 %v1281_v21, %v1280_v42  ;;  %v1293_v42 = vsel %vm1139_vm3, %v6346_v32, 0.0 }
 0x1d1   : > { %v1284_v58 = vadd.f32 %v1283_v48, %v1282_v36  ;;  %v6347_v48 = vld [vmem:[#allocation88_spill] sm:$0xff] }
 0x1d2   : > { %v1295_v21 = vsel %vm1139_vm3, %v6347_v48, 0.0 }
 0x1d3   : > { %v1286_v41 = vadd.f32 %v1285_v40, %v1284_v58  ;;  %v6348_v40 = vld [vmem:[#allocation91_spill] sm:$0xff] }
 0x1d4   : > { %v1297_v35 = vsel %vm1139_vm3, %v6348_v40, 0.0 }
 0x1d5   : > { %v1288_v54 = vadd.f32 %v1287_v38, %v1286_v41  ;;  %v6349_v41 = vld [vmem:[#allocation94_spill] sm:$0xff] }
 0x1d6   : > { %v1299_v38 = vsel %vm1139_vm3, %v6349_v41, 0.0 }
 0x1d7   : > { %v1290_v0 = vadd.f32 %v1289_v8, %v1288_v54  ;;  %v1301_v8 = vsel %vm1139_vm3, %v6350_v59, 0.0  ;;  %v6351_v54 = vld [vmem:[#allocation93_spill] sm:$0xff] }
 0x1d9   : > { %v1292_v26 = vadd.f32 %v1291_v5, %v1290_v0  ;;  %v1303_v5 = vsel %vm1139_vm3, %v6351_v54, 0.0 }
 0x1db   : > { %v1294_v36 = vadd.f32 %v1293_v42, %v1292_v26  ;;  %v6352_v42 = vld [vmem:[#allocation95_spill] sm:$0xff] }
 0x1dc   : > { %v1305_v3 = vsel %vm1139_vm3, %v6352_v42, 0.0 }
 0x1dd   : > { %v1296_v58 = vadd.f32 %v1295_v21, %v1294_v36 }
 0x1df   : > { %v1298_v61 = vadd.f32 %v1297_v35, %v1296_v58  ;;  %v4316_v35 = vsub.s32 0, %v6353_v33 }
 0x1e1   : > { %v1300_v39 = vadd.f32 %v1299_v38, %v1298_v61  ;;  %6354 = vst [vmem:[#allocation148_spill] sm:$0xff] %v4316_v35  ;;  %v1316_v61 = vpop.permute.xlu0 %1315  ;;  %v1355_v38 = vadd.s32 248, %v6353_v33 }
 0x1e3   : > { %v1302_v0 = vadd.f32 %v1301_v8, %v1300_v39  ;;  %v4319_v39 = vrot.slane %v1316_v61, %v4316_v35  ;;  %v1356_v8 = vadd.s32 256, %v6353_v33  ;;  %vm1440_vm12 = vcmp.lt.s32.totalorder %v1355_v38, %v3814_v20  ;;  %v6361_v61 = vld [vmem:[#allocation67_spill] sm:$0xff]  ;;  %v6362_v38 = vld [vmem:[#allocation69_spill] sm:$0xff] }
 0x1e5   : > { %v1304_v26 = vadd.f32 %v1303_v5, %v1302_v0  ;;  %6355 = vst [vmem:[#allocation149_spill] sm:$0xff] %v4319_v39  ;;  %vm1441_vm13 = vcmp.lt.s32.totalorder %v1356_v8, %v3814_v20  ;;  %v6359_v5 = vld [vmem:[#allocation68_spill] sm:$0xff] }
 0x1e6   : > { %v6363_v8 = vld [vmem:[#allocation76_spill] sm:$0xff] }
 0x1e7   : > { %v1306_v36 = vadd.f32 %v1305_v3, %v1304_v26 }
 0x1e9   : > { %v1307_v21 = vrot.slane %v1306_v36, 4 }
 0x1eb   : > { %v1308_v57 = vadd.f32 %v1307_v21, %v1306_v36  ;;  %v6360_v36 = vld [vmem:[#allocation71_spill] sm:$0xff] }
 0x1ed   : > { %v1309_v46 = vrot.slane %v1308_v57, 2 }
 0x1ef   : > { %v1310_v11 = vadd.f32 %v1309_v46, %v1308_v57  ;;  %v6357_v46 = vmov 0.0  }
 0x1f0   : > { %v2685_v57 = vsel %vm1440_vm12, 1.0, %v6357_v46  ;;  %v2686_v3 = vsel %vm1441_vm13, 1.0, %v6357_v46  ;;  %v6364_v46 = vld [vmem:[#allocation79_spill] sm:$0xff] }
 0x1f1   : > { %v1311_v51 = vrot.slane %v1310_v11, 1 }
 0x1f3   : > { %v1312_v58 = vadd.f32 %v1311_v51, %v1310_v11  ;;  %v6358_v51 = vld [vmem:[#allocation61_spill] sm:$0xff] }
 0x1f5   : > { %v4324_v0 = vmul.f32 %v4319_v39, %v1312_v58 }
 0x1f7   : > { %6356 = vst [vmem:[#allocation150_spill] sm:$0xff] %v4324_v0  ;;  %v1692_v11 = vsub.f32 %v6358_v51, %v4324_v0  ;;  %v1693_v26 = vsub.f32 %v6359_v5, %v4324_v0  ;;  %v1694_v21 = vsub.f32 %v6360_v36, %v4324_v0  ;;  %v1695_v58 = vsub.f32 %v6361_v61, %v4324_v0  ;;  %v6365_v51 = vld [vmem:[#allocation75_spill] sm:$0xff]  ;;  %v6366_v5 = vld [vmem:[#allocation77_spill] sm:$0xff] }
 0x1f8   : > { %v1696_v35 = vsub.f32 %v6362_v38, %v4324_v0  ;;  %v1697_v39 = vsub.f32 %v6363_v8, %v4324_v0  ;;  %v1698_v20 = vsub.f32 %v6364_v46, %v4324_v0  ;;  %v1699_v33 = vsub.f32 %v6365_v51, %v4324_v0  ;;  %v6367_v36 = vld [vmem:[#allocation85_spill] sm:$0xff]  ;;  %v6369_v38 = vld [vmem:[#allocation83_spill] sm:$0xff]  ;;  %v6370_v8 = vld [vmem:[#allocation86_spill] sm:$0xff] }
 0x1f9   : > { %v1700_v23 = vsub.f32 %v6366_v5, %v4324_v0  ;;  %v1701_v16 = vsub.f32 %v6367_v36, %v4324_v0  ;;  %v6368_v61 = vld [vmem:[#allocation89_spill] sm:$0xff]  ;;  %v1703_v25 = vsub.f32 %v6369_v38, %v4324_v0  ;;  %v1704_v15 = vsub.f32 %v6370_v8, %v4324_v0  ;;  %v6371_v46 = vld [vmem:[#allocation24_spill] sm:$0xff]  ;;  %v6372_v51 = vld [vmem:[#allocation26_spill] sm:$0xff] }
 0x1fa   : > { %v1702_v10 = vsub.f32 %v6368_v61, %v4324_v0  ;;  %v1705_v34 = vsub.f32 %v6371_v46, %v4324_v0  ;;  %v1706_v22 = vsub.f32 %v6372_v51, %v4324_v0  ;;  %v6373_v5 = vld [vmem:[#allocation22_spill] sm:$0xff]  ;;  %v6374_v36 = vld [vmem:[#allocation25_spill] sm:$0xff]  ;;  %v6375_v61 = vld [vmem:[#allocation32_spill] sm:$0xff]  ;;  %v4436_v7 = vmul.f32 %v2685_v57, %v1692_v11 }
 0x1fb   : > { %v1707_v18 = vsub.f32 %v6373_v5, %v4324_v0  ;;  %v1708_v43 = vsub.f32 %v6374_v36, %v4324_v0  ;;  %v1709_v2 = vsub.f32 %v6375_v61, %v4324_v0  ;;  %v6376_v38 = vld [vmem:[#allocation34_spill] sm:$0xff]  ;;  %v6378_v46 = vld [vmem:[#allocation33_spill] sm:$0xff]  ;;  %v6379_v51 = vld [vmem:[#allocation40_spill] sm:$0xff] }
 0x1fc   : > { %v1710_v62 = vsub.f32 %v6376_v38, %v4324_v0  ;;  %v6377_v8 = vld [vmem:[#allocation30_spill] sm:$0xff]  ;;  %v1712_v50 = vsub.f32 %v6378_v46, %v4324_v0  ;;  %v1713_v19 = vsub.f32 %v6379_v51, %v4324_v0  ;;  %v6382_v61 = vld [vmem:[#allocation41_spill] sm:$0xff]  ;;  %v6383_v38 = vld [vmem:[#allocation48_spill] sm:$0xff]  ;;  %6392 = vst [vmem:[#allocation151_spill] sm:$0xff] %v4436_v7 }
 0x1fd   : > { %v1711_v14 = vsub.f32 %v6377_v8, %v4324_v0  ;;  %v6380_v5 = vld [vmem:[#allocation42_spill] sm:$0xff]  ;;  %v1716_v17 = vsub.f32 %v6382_v61, %v4324_v0  ;;  %v1717_v28 = vsub.f32 %v6383_v38, %v4324_v0  ;;  %v6386_v51 = vld [vmem:[#allocation49_spill] sm:$0xff]  ;;  %v6399_v57 = vld [vmem:[#allocation108_spill] sm:$0xff] }
 0x1fe   : > { %v1714_v9 = vsub.f32 %v6380_v5, %v4324_v0  ;;  %v6381_v36 = vld [vmem:[#allocation38_spill] sm:$0xff]  ;;  %v1720_v55 = vsub.f32 %v6386_v51, %v4324_v0  ;;  %v6387_v5 = vld [vmem:[#allocation56_spill] sm:$0xff]  ;;  %v6389_v38 = vld [vmem:[#allocation57_spill] sm:$0xff]  ;;  %v4453_v7 = vmul.f32 %v6399_v57, %v1698_v20 }
 0x1ff   : > { %v1715_v12 = vsub.f32 %v6381_v36, %v4324_v0  ;;  %v6384_v8 = vld [vmem:[#allocation50_spill] sm:$0xff]  ;;  %v1721_v24 = vsub.f32 %v6387_v5, %v4324_v0  ;;  %v1722_v36 = vsub.f32 %v6238_v63, %v4324_v0  ;;  %v1724_v49 = vsub.f32 %v6389_v38, %v4324_v0  ;;  %v6391_v5 = vld [vmem:[#allocation65_spill] sm:$0xff]  ;;  %v6406_v20 = vld [vmem:[#allocation115_spill] sm:$0xff] }
 0x200   : > { %v1718_v60 = vsub.f32 %v6384_v8, %v4324_v0  ;;  %v6385_v46 = vld [vmem:[#allocation46_spill] sm:$0xff]  ;;  %v1725_v8 = vsub.f32 %v6240_v6, %v4324_v0  ;;  %v1728_v4 = vsub.f32 %v6391_v5, %v4324_v0  ;;  %v1729_v63 = vsub.f32 %v6243_v31, %v4324_v0 }
 0x201   : > { %v1719_v47 = vsub.f32 %v6385_v46, %v4324_v0  ;;  %v6388_v61 = vld [vmem:[#allocation54_spill] sm:$0xff]  ;;  %v1726_v46 = vsub.f32 %v6242_v13, %v4324_v0  ;;  %v1731_v38 = vsub.f32 %v6339_v29, %v4324_v0  ;;  %v1732_v6 = vsub.f32 %v6340_v37, %v4324_v0 }
 0x202   : > { %v1723_v44 = vsub.f32 %v6388_v61, %v4324_v0  ;;  %v6390_v51 = vld [vmem:[#allocation62_spill] sm:$0xff]  ;;  %v1730_v61 = vsub.f32 %v6338_v45, %v4324_v0  ;;  %v1733_v13 = vsub.f32 %v6341_v27, %v4324_v0  ;;  %v1735_v5 = vsub.f32 %v6343_v56, %v4324_v0 }
 0x203   : > { %v1727_v30 = vsub.f32 %v6390_v51, %v4324_v0  ;;  %v1734_v51 = vsub.f32 %v6342_v1, %v4324_v0  ;;  %v1736_v31 = vsub.f32 %v6344_v52, %v4324_v0  ;;  %v1737_v45 = vsub.f32 %v6345_v53, %v4324_v0 }
 0x204   : > { %v1738_v29 = vsub.f32 %v6346_v32, %v4324_v0  ;;  %v1739_v37 = vsub.f32 %v6347_v48, %v4324_v0  ;;  %v1740_v27 = vsub.f32 %v6348_v40, %v4324_v0  ;;  %v1741_v1 = vsub.f32 %v6349_v41, %v4324_v0  ;;  %v6394_v48 = vld [vmem:[#allocation87_spill] sm:$0xff]  ;;  %v6396_v41 = vld [vmem:[#allocation105_spill] sm:$0xff] }
 0x205   : > { %v1742_v56 = vsub.f32 %v6350_v59, %v4324_v0  ;;  %v1743_v52 = vsub.f32 %v6351_v54, %v4324_v0  ;;  %v1744_v53 = vsub.f32 %v6352_v42, %v4324_v0  ;;  %v4438_v32 = vmul.f32 %v2686_v3, %v1693_v26  ;;  %v6397_v54 = vld [vmem:[#allocation106_spill] sm:$0xff]  ;;  %v6398_v42 = vld [vmem:[#allocation107_spill] sm:$0xff]  ;;  %v6400_v3 = vld [vmem:[#allocation109_spill] sm:$0xff] }
 0x206   : > { %v4441_v40 = vmul.f32 %v6394_v48, %v1694_v21  ;;  %v4444_v59 = vmul.f32 %v6396_v41, %v1695_v58  ;;  %v4447_v0 = vmul.f32 %v6397_v54, %v1696_v35  ;;  %v4450_v11 = vmul.f32 %v6398_v42, %v1697_v39  ;;  %v6402_v48 = vld [vmem:[#allocation111_spill] sm:$0xff]  ;;  %v6403_v41 = vld [vmem:[#allocation112_spill] sm:$0xff]  ;;  %v6404_v54 = vld [vmem:[#allocation113_spill] sm:$0xff] }
 0x207   : > { %6393 = vst [vmem:[#allocation152_spill] sm:$0xff] %v4438_v32  ;;  %v4456_v26 = vmul.f32 %v6400_v3, %v1699_v33  ;;  %v6401_v32 = vld [vmem:[#allocation110_spill] sm:$0xff]  ;;  %v4465_v58 = vmul.f32 %v6403_v41, %v1702_v10  ;;  %v4468_v35 = vmul.f32 %v6404_v54, %v1703_v25  ;;  %v4474_v57 = vmul.f32 %v6406_v20, %v1705_v34  ;;  %v6407_v33 = vld [vmem:[#allocation116_spill] sm:$0xff]  ;;  %v6410_v10 = vld [vmem:[#allocation119_spill] sm:$0xff] }
 0x208   : > { %6395 = vst [vmem:[#allocation87_spill] sm:$0xff] %v4441_v40  ;;  %v4459_v21 = vmul.f32 %v6401_v32, %v1700_v23  ;;  %v4462_v40 = vmul.f32 %v6402_v48, %v1701_v16  ;;  %v6405_v42 = vld [vmem:[#allocation114_spill] sm:$0xff]  ;;  %v4477_v3 = vmul.f32 %v6407_v33, %v1706_v22  ;;  %v6408_v23 = vld [vmem:[#allocation117_spill] sm:$0xff]  ;;  %v4486_v41 = vmul.f32 %v6410_v10, %v1709_v2  ;;  %v6411_v25 = vld [vmem:[#allocation120_spill] sm:$0xff] }
 0x209   : > { %v4471_v39 = vmul.f32 %v6405_v42, %v1704_v15  ;;  %v4480_v32 = vmul.f32 %v6408_v23, %v1707_v18  ;;  %v6409_v16 = vld [vmem:[#allocation118_spill] sm:$0xff]  ;;  %v4489_v54 = vmul.f32 %v6411_v25, %v1710_v62  ;;  %v6412_v15 = vld [vmem:[#allocation121_spill] sm:$0xff]  ;;  %v6414_v22 = vld [vmem:[#allocation123_spill] sm:$0xff] }
 0x20a   : > { %v4483_v48 = vmul.f32 %v6409_v16, %v1708_v43  ;;  %v4492_v42 = vmul.f32 %v6412_v15, %v1711_v14  ;;  %v6413_v34 = vld [vmem:[#allocation122_spill] sm:$0xff]  ;;  %v4498_v33 = vmul.f32 %v6414_v22, %v1713_v19  ;;  %v6415_v18 = vld [vmem:[#allocation124_spill] sm:$0xff]  ;;  %v6416_v43 = vld [vmem:[#allocation125_spill] sm:$0xff] }
 0x20b   : > { %v4495_v20 = vmul.f32 %v6413_v34, %v1712_v50  ;;  %v4501_v23 = vmul.f32 %v6415_v18, %v1714_v9  ;;  %v4504_v16 = vmul.f32 %v6416_v43, %v1715_v12  ;;  %v6417_v2 = vld [vmem:[#allocation126_spill] sm:$0xff]  ;;  %v6418_v62 = vld [vmem:[#allocation127_spill] sm:$0xff]  ;;  %v6419_v14 = vld [vmem:[#allocation128_spill] sm:$0xff] }
 0x20c   : > { %v4507_v10 = vmul.f32 %v6417_v2, %v1716_v17  ;;  %v4510_v25 = vmul.f32 %v6418_v62, %v1717_v28  ;;  %v4513_v15 = vmul.f32 %v6419_v14, %v1718_v60  ;;  %v6420_v50 = vld [vmem:[#allocation129_spill] sm:$0xff]  ;;  %v6421_v19 = vld [vmem:[#allocation130_spill] sm:$0xff]  ;;  %v6422_v9 = vld [vmem:[#allocation131_spill] sm:$0xff] }
 0x20d   : > { %v4516_v34 = vmul.f32 %v6420_v50, %v1719_v47  ;;  %v4519_v22 = vmul.f32 %v6421_v19, %v1720_v55  ;;  %v4522_v18 = vmul.f32 %v6422_v9, %v1721_v24  ;;  %v6423_v12 = vld [vmem:[#allocation132_spill] sm:$0xff]  ;;  %v6424_v17 = vld [vmem:[#allocation133_spill] sm:$0xff]  ;;  %v6425_v28 = vld [vmem:[#allocation134_spill] sm:$0xff] }
 0x20e   : > { %v4525_v43 = vmul.f32 %v6423_v12, %v1722_v36  ;;  %v4528_v2 = vmul.f32 %v6424_v17, %v1723_v44  ;;  %v4531_v62 = vmul.f32 %v6425_v28, %v1724_v49  ;;  %v6426_v60 = vld [vmem:[#allocation135_spill] sm:$0xff]  ;;  %v6427_v47 = vld [vmem:[#allocation136_spill] sm:$0xff]  ;;  %v6428_v55 = vld [vmem:[#allocation137_spill] sm:$0xff] }
 0x20f   : > { %v4534_v14 = vmul.f32 %v6426_v60, %v1725_v8  ;;  %v4537_v50 = vmul.f32 %v6427_v47, %v1726_v46  ;;  %v4540_v19 = vmul.f32 %v6428_v55, %v1727_v30  ;;  %v6429_v24 = vld [vmem:[#allocation138_spill] sm:$0xff]  ;;  %v6430_v36 = vld [vmem:[#allocation139_spill] sm:$0xff]  ;;  %v6431_v44 = vld [vmem:[#allocation140_spill] sm:$0xff] }
 0x210   : > { %v4543_v9 = vmul.f32 %v6429_v24, %v1728_v4  ;;  %v4546_v12 = vmul.f32 %v6430_v36, %v1729_v63  ;;  %v4549_v17 = vmul.f32 %v6431_v44, %v1730_v61  ;;  %v6433_v49 = vld [vmem:[#allocation141_spill] sm:$0xff]  ;;  %v6435_v8 = vld [vmem:[#allocation142_spill] sm:$0xff]  ;;  %v6437_v46 = vld [vmem:[#allocation143_spill] sm:$0xff] }
 0x211   : > { %v4552_v28 = vmul.f32 %v6433_v49, %v1731_v38  ;;  %v4555_v60 = vmul.f32 %v6435_v8, %v1732_v6  ;;  %v4558_v47 = vmul.f32 %v6437_v46, %v1733_v13  ;;  %v6439_v30 = vld [vmem:[#allocation144_spill] sm:$0xff]  ;;  %v6441_v4 = vld [vmem:[#allocation145_spill] sm:$0xff]  ;;  %v6443_v63 = vld [vmem:[#allocation146_spill] sm:$0xff] }
 0x212   : > { %6432 = vst [vmem:[#allocation105_spill] sm:$0xff] %v4549_v17  ;;  %v4561_v55 = vmul.f32 %v6439_v30, %v1734_v51  ;;  %v4564_v24 = vmul.f32 %v6441_v4, %v1735_v5  ;;  %v4567_v36 = vmul.f32 %v6443_v63, %v1736_v31  ;;  %v6445_v61 = vld [vmem:[#allocation147_spill] sm:$0xff]  ;;  %v6447_v38 = vld [vmem:[#allocation98_spill] sm:$0xff]  ;;  %v6451_v13 = vld [vmem:[#allocation100_spill] sm:$0xff] }
 0x213   : > { %6434 = vst [vmem:[#allocation106_spill] sm:$0xff] %v4552_v28  ;;  %6436 = vst [vmem:[#allocation107_spill] sm:$0xff] %v4555_v60  ;;  %v4570_v44 = vmul.f32 %v6445_v61, %v1737_v45  ;;  %v4573_v49 = vmul.f32 %v6447_v38, %v1738_v29  ;;  %v6449_v6 = vld [vmem:[#allocation99_spill] sm:$0xff]  ;;  %v4579_v46 = vmul.f32 %v6451_v13, %v1740_v27  ;;  %v6453_v51 = vld [vmem:[#allocation101_spill] sm:$0xff] }
 0x214   : > { %6438 = vst [vmem:[#allocation108_spill] sm:$0xff] %v4558_v47  ;;  %6440 = vst [vmem:[#allocation109_spill] sm:$0xff] %v4561_v55  ;;  %v4576_v8 = vmul.f32 %v6449_v6, %v1739_v37  ;;  %v4582_v30 = vmul.f32 %v6453_v51, %v1741_v1  ;;  %v6455_v5 = vld [vmem:[#allocation102_spill] sm:$0xff]  ;;  %v6457_v31 = vld [vmem:[#allocation103_spill] sm:$0xff] }
 0x215   : > { %6442 = vst [vmem:[#allocation110_spill] sm:$0xff] %v4564_v24  ;;  %6444 = vst [vmem:[#allocation111_spill] sm:$0xff] %v4567_v36  ;;  %v4585_v4 = vmul.f32 %v6455_v5, %v1742_v56  ;;  %v4588_v63 = vmul.f32 %v6457_v31, %v1743_v52  ;;  %v6459_v45 = vld [vmem:[#allocation104_spill] sm:$0xff]  ;;  %v6462_v27 = vld [vmem:[#allocation97_spill] sm:$0xff]  ;;  %v6466_v5 = vmov 0.0  }
 0x216   : > { %6446 = vst [vmem:[#allocation112_spill] sm:$0xff] %v4570_v44  ;;  %6448 = vst [vmem:[#allocation113_spill] sm:$0xff] %v4573_v49  ;;  %v4591_v61 = vmul.f32 %v6459_v45, %v1744_v53  ;;  %v6461_v29 = vld [vmem:[#allocation84_spill] sm:$0xff]  ;;  %v6463_v56 = vld [vmem:[#allocation150_spill] sm:$0xff] }
 0x217   : > { %6450 = vst [vmem:[#allocation114_spill] sm:$0xff] %v4576_v8  ;;  %6452 = vst [vmem:[#allocation115_spill] sm:$0xff] %v4579_v46  ;;  %v1325_v38 = vadd.s32 8, %v6461_v29  ;;  %v1326_v37 = vadd.s32 16, %v6461_v29  ;;  %v1327_v6 = vadd.s32 24, %v6461_v29  ;;  %vm1409_vm14 = vcmp.lt.s32.totalorder %v6461_v29, %v6462_v27  ;;  %v6464_v52 = vld [vmem:[#allocation12_spill] sm:$0xff] }
 0x218   : > { %6454 = vst [vmem:[#allocation116_spill] sm:$0xff] %v4582_v30  ;;  %6456 = vst [vmem:[#allocation117_spill] sm:$0xff] %v4585_v4  ;;  %v1328_v1 = vadd.s32 32, %v6461_v29  ;;  %v1661_v13 = vsub.f32 %v6464_v52, %v6463_v56  ;;  %v6465_v53 = vld [vmem:[#allocation14_spill] sm:$0xff]  ;;  %v2654_v31 = vsel %vm1409_vm14, 1.0, %v6466_v5  ;;  %v1330_v4 = vadd.s32 48, %v6461_v29 }
 0x219   : > { %6458 = vst [vmem:[#allocation118_spill] sm:$0xff] %v4588_v63  ;;  %6460 = vst [vmem:[#allocation119_spill] sm:$0xff] %v4591_v61  ;;  %vm1410_vm15 = vcmp.lt.s32.totalorder %v1325_v38, %v6462_v27  ;;  %vm1411_vm0 = vcmp.lt.s32.totalorder %v1326_v37, %v6462_v27  ;;  %v1662_v51 = vsub.f32 %v6465_v53, %v6463_v56  ;;  %v1329_v61 = vadd.s32 40, %v6461_v29  ;;  %v6467_v38 = vld [vmem:[#allocation11_spill] sm:$0xff]  ;;  %v6468_v52 = vld [vmem:[#allocation13_spill] sm:$0xff] }
 0x21a   : > { %v2655_v45 = vsel %vm1410_vm15, 1.0, %v6466_v5  ;;  %vm1412_vm1 = vcmp.lt.s32.totalorder %v1327_v6, %v6462_v27  ;;  %v1663_v63 = vsub.f32 %v6467_v38, %v6463_v56  ;;  %v2656_v37 = vsel %vm1411_vm0, 1.0, %v6466_v5  ;;  %v6469_v6 = vld [vmem:[#allocation16_spill] sm:$0xff] }
 0x21b   : > { %vm1413_vm2 = vcmp.lt.s32.totalorder %v1328_v1, %v6462_v27  ;;  %v1664_v53 = vsub.f32 %v6468_v52, %v6463_v56  ;;  %v1745_v30 = vmul.f32 %v2654_v31, %v1661_v13  ;;  %v1746_v46 = vmul.f32 %v2655_v45, %v1662_v51  ;;  %v6470_v52 = vld [vmem:[#allocation18_spill] sm:$0xff] }
 0x21c   : > { %v2657_v8 = vsel %vm1412_vm1, 1.0, %v6466_v5  ;;  %v1331_v49 = vadd.s32 56, %v6461_v29  ;;  %vm1414_vm8 = vcmp.lt.s32.totalorder %v1329_v61, %v6462_v27  ;;  %v1665_v38 = vsub.f32 %v6469_v6, %v6463_v56 }
 0x21d   : > { %v1747_v44 = vmul.f32 %v2656_v37, %v1663_v63  ;;  %v1332_v36 = vadd.s32 64, %v6461_v29  ;;  %vm1415_vm9 = vcmp.lt.s32.totalorder %v1330_v4, %v6462_v27  ;;  %v2658_v1 = vsel %vm1413_vm2, 1.0, %v6466_v5  ;;  %v6471_v63 = vld [vmem:[#allocation15_spill] sm:$0xff] }
 0x21e   : > { %v1666_v13 = vsub.f32 %v6470_v52, %v6463_v56  ;;  %v1748_v51 = vmul.f32 %v2657_v8, %v1664_v53  ;;  %v1829_v31 = vmul.f32 %v1745_v30, %v1745_v30  ;;  %v1830_v45 = vmul.f32 %v1746_v46, %v1746_v46  ;;  %v6472_v8 = vld [vmem:[#allocation17_spill] sm:$0xff] }
 0x21f   : > { %v1333_v24 = vadd.s32 72, %v6461_v29  ;;  %v2659_v61 = vsel %vm1414_vm8, 1.0, %v6466_v5  ;;  %vm1416_vm10 = vcmp.lt.s32.totalorder %v1331_v49, %v6462_v27  ;;  %v1667_v37 = vsub.f32 %v6471_v63, %v6463_v56 }
 0x220   : > { %v1749_v6 = vmul.f32 %v2658_v1, %v1665_v38  ;;  %v1831_v55 = vmul.f32 %v1747_v44, %v1747_v44  ;;  %v1334_v4 = vadd.s32 80, %v6461_v29  ;;  %vm1417_vm11 = vcmp.lt.s32.totalorder %v1332_v36, %v6462_v27  ;;  %v6473_v1 = vld [vmem:[#allocation20_spill] sm:$0xff]  ;;  %v6475_v36 = vld [vmem:[#allocation19_spill] sm:$0xff] }
 0x221   : > { %v2660_v52 = vsel %vm1415_vm9, 1.0, %v6466_v5  ;;  %v1668_v46 = vsub.f32 %v6472_v8, %v6463_v56  ;;  %v1750_v30 = vmul.f32 %v2659_v61, %v1666_v13  ;;  %v1832_v53 = vmul.f32 %v1748_v51, %v1748_v51 }
 0x222   : > { %v1913_v47 = vsel %vm1139_vm3, %v1829_v31, 0.0  ;;  %v1914_v49 = vsel %vm1139_vm3, %v1830_v45, 0.0  ;;  %v1335_v60 = vadd.s32 88, %v6461_v29  ;;  %vm1418_vm4 = vcmp.lt.s32.totalorder %v1333_v24, %v6462_v27  ;;  %v6474_v45 = vld [vmem:[#allocation23_spill] sm:$0xff]  ;;  %v6476_v24 = vld [vmem:[#allocation21_spill] sm:$0xff] }
 0x223   : > { %v2661_v44 = vsel %vm1416_vm10, 1.0, %v6466_v5  ;;  %v1915_v38 = vadd.f32 %v1914_v49, %v1913_v47  ;;  %v1669_v63 = vsub.f32 %v6473_v1, %v6463_v56  ;;  %v1751_v28 = vmul.f32 %v2660_v52, %v1667_v37 }
 0x224   : > { %v1833_v17 = vmul.f32 %v1749_v6, %v1749_v6  ;;  %v1916_v8 = vsel %vm1139_vm3, %v1831_v55, 0.0  ;;  %v1336_v13 = vadd.s32 96, %v6461_v29  ;;  %vm1419_vm5 = vcmp.lt.s32.totalorder %v1334_v4, %v6462_v27  ;;  %v6477_v4 = vld [vmem:[#allocation28_spill] sm:$0xff] }
 0x225   : > { %v2662_v51 = vsel %vm1417_vm11, 1.0, %v6466_v5  ;;  %v1917_v31 = vadd.f32 %v1916_v8, %v1915_v38  ;;  %v1670_v61 = vsub.f32 %v6474_v45, %v6463_v56  ;;  %v1752_v47 = vmul.f32 %v2661_v44, %v1668_v46 }
 0x226   : > { %v1834_v49 = vmul.f32 %v1750_v30, %v1750_v30  ;;  %v1918_v1 = vsel %vm1139_vm3, %v1832_v53, 0.0  ;;  %v1337_v52 = vadd.s32 104, %v6461_v29  ;;  %vm1420_vm6 = vcmp.lt.s32.totalorder %v1335_v60, %v6462_v27  ;;  %v6478_v60 = vld [vmem:[#allocation31_spill] sm:$0xff] }
 0x227   : > { %v2663_v55 = vsel %vm1418_vm4, 1.0, %v6466_v5  ;;  %v1919_v6 = vadd.f32 %v1918_v1, %v1917_v31  ;;  %v1671_v37 = vsub.f32 %v6475_v36, %v6463_v56  ;;  %v1753_v8 = vmul.f32 %v2662_v51, %v1669_v63 }
 0x228   : > { %v1835_v38 = vmul.f32 %v1751_v28, %v1751_v28  ;;  %v1920_v45 = vsel %vm1139_vm3, %v1833_v17, 0.0  ;;  %v1338_v46 = vadd.s32 112, %v6461_v29  ;;  %vm1421_vm7 = vcmp.lt.s32.totalorder %v1336_v13, %v6462_v27  ;;  %v6479_v13 = vld [vmem:[#allocation27_spill] sm:$0xff] }
 0x229   : > { %v2664_v30 = vsel %vm1419_vm5, 1.0, %v6466_v5  ;;  %v1921_v53 = vadd.f32 %v1920_v45, %v1919_v6  ;;  %v1672_v44 = vsub.f32 %v6476_v24, %v6463_v56  ;;  %v1754_v1 = vmul.f32 %v2663_v55, %v1670_v61 }
 0x22a   : > { %v1836_v31 = vmul.f32 %v1752_v47, %v1752_v47  ;;  %v1922_v36 = vsel %vm1139_vm3, %v1834_v49, 0.0  ;;  %v1339_v28 = vadd.s32 120, %v6461_v29  ;;  %vm1422_vm12 = vcmp.lt.s32.totalorder %v1337_v52, %v6462_v27  ;;  %v6480_v52 = vld [vmem:[#allocation29_spill] sm:$0xff] }
 0x22b   : > { %v2665_v17 = vsel %vm1420_vm6, 1.0, %v6466_v5  ;;  %v1923_v63 = vadd.f32 %v1922_v36, %v1921_v53  ;;  %v1673_v51 = vsub.f32 %v6477_v4, %v6463_v56  ;;  %v1755_v45 = vmul.f32 %v2664_v30, %v1671_v37 }
 0x22c   : > { %v1837_v6 = vmul.f32 %v1753_v8, %v1753_v8  ;;  %v1924_v24 = vsel %vm1139_vm3, %v1835_v38, 0.0  ;;  %v1340_v61 = vadd.s32 128, %v6461_v29  ;;  %vm1423_vm13 = vcmp.lt.s32.totalorder %v1338_v46, %v6462_v27  ;;  %v6481_v46 = vld [vmem:[#allocation36_spill] sm:$0xff] }
 0x22d   : > { %v2666_v47 = vsel %vm1421_vm7, 1.0, %v6466_v5  ;;  %v1925_v49 = vadd.f32 %v1924_v24, %v1923_v63  ;;  %v1674_v55 = vsub.f32 %v6478_v60, %v6463_v56  ;;  %v1756_v36 = vmul.f32 %v2665_v17, %v1672_v44 }
 0x22e   : > { %v1838_v53 = vmul.f32 %v1754_v1, %v1754_v1  ;;  %v1926_v4 = vsel %vm1139_vm3, %v1836_v31, 0.0  ;;  %v1341_v37 = vadd.s32 136, %v6461_v29  ;;  %vm1424_vm14 = vcmp.lt.s32.totalorder %v1339_v28, %v6462_v27  ;;  %v6482_v28 = vld [vmem:[#allocation39_spill] sm:$0xff] }
 0x22f   : > { %v2667_v8 = vsel %vm1422_vm12, 1.0, %v6466_v5  ;;  %v1927_v38 = vadd.f32 %v1926_v4, %v1925_v49  ;;  %v1675_v30 = vsub.f32 %v6479_v13, %v6463_v56  ;;  %v1757_v24 = vmul.f32 %v2666_v47, %v1673_v51 }
 0x230   : > { %v1839_v63 = vmul.f32 %v1755_v45, %v1755_v45  ;;  %v1928_v60 = vsel %vm1139_vm3, %v1837_v6, 0.0  ;;  %v1342_v44 = vadd.s32 144, %v6461_v29  ;;  %vm1425_vm15 = vcmp.lt.s32.totalorder %v1340_v61, %v6462_v27  ;;  %v6483_v61 = vld [vmem:[#allocation35_spill] sm:$0xff] }
 0x231   : > { %v2668_v1 = vsel %vm1423_vm13, 1.0, %v6466_v5  ;;  %v1929_v31 = vadd.f32 %v1928_v60, %v1927_v38  ;;  %v1676_v17 = vsub.f32 %v6480_v52, %v6463_v56  ;;  %v1758_v4 = vmul.f32 %v2667_v8, %v1674_v55 }
 0x232   : > { %v1840_v49 = vmul.f32 %v1756_v36, %v1756_v36  ;;  %v1930_v13 = vsel %vm1139_vm3, %v1838_v53, 0.0  ;;  %v1343_v51 = vadd.s32 152, %v6461_v29  ;;  %vm1426_vm0 = vcmp.lt.s32.totalorder %v1341_v37, %v6462_v27  ;;  %v6484_v37 = vld [vmem:[#allocation37_spill] sm:$0xff] }
 0x233   : > { %v2669_v45 = vsel %vm1424_vm14, 1.0, %v6466_v5  ;;  %v1931_v6 = vadd.f32 %v1930_v13, %v1929_v31  ;;  %v1677_v47 = vsub.f32 %v6481_v46, %v6463_v56  ;;  %v1759_v60 = vmul.f32 %v2668_v1, %v1675_v30 }
 0x234   : > { %v1841_v38 = vmul.f32 %v1757_v24, %v1757_v24  ;;  %v1932_v52 = vsel %vm1139_vm3, %v1839_v63, 0.0  ;;  %v1344_v55 = vadd.s32 160, %v6461_v29  ;;  %vm1427_vm1 = vcmp.lt.s32.totalorder %v1342_v44, %v6462_v27  ;;  %v6485_v44 = vld [vmem:[#allocation44_spill] sm:$0xff] }
 0x235   : > { %v2670_v36 = vsel %vm1425_vm15, 1.0, %v6466_v5  ;;  %v1933_v53 = vadd.f32 %v1932_v52, %v1931_v6  ;;  %v1678_v8 = vsub.f32 %v6482_v28, %v6463_v56  ;;  %v1760_v13 = vmul.f32 %v2669_v45, %v1676_v17 }
 0x236   : > { %v1842_v31 = vmul.f32 %v1758_v4, %v1758_v4  ;;  %v1934_v46 = vsel %vm1139_vm3, %v1840_v49, 0.0  ;;  %v1345_v30 = vadd.s32 168, %v6461_v29  ;;  %vm1428_vm2 = vcmp.lt.s32.totalorder %v1343_v51, %v6462_v27  ;;  %v6486_v51 = vld [vmem:[#allocation47_spill] sm:$0xff] }
 0x237   : > { %v2671_v24 = vsel %vm1426_vm0, 1.0, %v6466_v5  ;;  %v1935_v63 = vadd.f32 %v1934_v46, %v1933_v53  ;;  %v1679_v1 = vsub.f32 %v6483_v61, %v6463_v56  ;;  %v1761_v52 = vmul.f32 %v2670_v36, %v1677_v47 }
 0x238   : > { %v1843_v6 = vmul.f32 %v1759_v60, %v1759_v60  ;;  %v1936_v28 = vsel %vm1139_vm3, %v1841_v38, 0.0  ;;  %v1346_v17 = vadd.s32 176, %v6461_v29  ;;  %vm1429_vm8 = vcmp.lt.s32.totalorder %v1344_v55, %v6462_v27  ;;  %v6487_v55 = vld [vmem:[#allocation43_spill] sm:$0xff] }
 0x239   : > { %v2672_v4 = vsel %vm1427_vm1, 1.0, %v6466_v5  ;;  %v1937_v49 = vadd.f32 %v1936_v28, %v1935_v63  ;;  %v1680_v45 = vsub.f32 %v6484_v37, %v6463_v56  ;;  %v1762_v46 = vmul.f32 %v2671_v24, %v1678_v8 }
 0x23a   : > { %v1844_v53 = vmul.f32 %v1760_v13, %v1760_v13  ;;  %v1938_v61 = vsel %vm1139_vm3, %v1842_v31, 0.0  ;;  %v1347_v47 = vadd.s32 184, %v6461_v29  ;;  %vm1430_vm9 = vcmp.lt.s32.totalorder %v1345_v30, %v6462_v27  ;;  %v6488_v30 = vld [vmem:[#allocation45_spill] sm:$0xff] }
 0x23b   : > { %v2673_v60 = vsel %vm1428_vm2, 1.0, %v6466_v5  ;;  %v1939_v38 = vadd.f32 %v1938_v61, %v1937_v49  ;;  %v1681_v36 = vsub.f32 %v6485_v44, %v6463_v56  ;;  %v1763_v28 = vmul.f32 %v2672_v4, %v1679_v1 }
 0x23c   : > { %v1845_v63 = vmul.f32 %v1761_v52, %v1761_v52  ;;  %v1940_v37 = vsel %vm1139_vm3, %v1843_v6, 0.0  ;;  %v1348_v8 = vadd.s32 192, %v6461_v29  ;;  %vm1431_vm10 = vcmp.lt.s32.totalorder %v1346_v17, %v6462_v27  ;;  %v6489_v17 = vld [vmem:[#allocation52_spill] sm:$0xff] }
 0x23d   : > { %v2674_v13 = vsel %vm1429_vm8, 1.0, %v6466_v5  ;;  %v1941_v31 = vadd.f32 %v1940_v37, %v1939_v38  ;;  %v1682_v24 = vsub.f32 %v6486_v51, %v6463_v56  ;;  %v1764_v61 = vmul.f32 %v2673_v60, %v1680_v45 }
 0x23e   : > { %v1846_v49 = vmul.f32 %v1762_v46, %v1762_v46  ;;  %v1942_v44 = vsel %vm1139_vm3, %v1844_v53, 0.0  ;;  %v1349_v1 = vadd.s32 200, %v6461_v29  ;;  %vm1432_vm11 = vcmp.lt.s32.totalorder %v1347_v47, %v6462_v27  ;;  %v6490_v47 = vld [vmem:[#allocation55_spill] sm:$0xff] }
 0x23f   : > { %v2675_v52 = vsel %vm1430_vm9, 1.0, %v6466_v5  ;;  %v1943_v6 = vadd.f32 %v1942_v44, %v1941_v31  ;;  %v1683_v4 = vsub.f32 %v6487_v55, %v6463_v56  ;;  %v1765_v37 = vmul.f32 %v2674_v13, %v1681_v36 }
 0x240   : > { %v1847_v38 = vmul.f32 %v1763_v28, %v1763_v28  ;;  %v1944_v51 = vsel %vm1139_vm3, %v1845_v63, 0.0  ;;  %v1350_v45 = vadd.s32 208, %v6461_v29  ;;  %vm1433_vm4 = vcmp.lt.s32.totalorder %v1348_v8, %v6462_v27  ;;  %v6491_v8 = vld [vmem:[#allocation51_spill] sm:$0xff] }
 0x241   : > { %v2676_v46 = vsel %vm1431_vm10, 1.0, %v6466_v5  ;;  %v1945_v53 = vadd.f32 %v1944_v51, %v1943_v6  ;;  %v1684_v60 = vsub.f32 %v6488_v30, %v6463_v56  ;;  %v1766_v44 = vmul.f32 %v2675_v52, %v1682_v24 }
 0x242   : > { %v1848_v31 = vmul.f32 %v1764_v61, %v1764_v61  ;;  %v1946_v55 = vsel %vm1139_vm3, %v1846_v49, 0.0  ;;  %v1351_v36 = vadd.s32 216, %v6461_v29  ;;  %vm1434_vm5 = vcmp.lt.s32.totalorder %v1349_v1, %v6462_v27  ;;  %v6492_v1 = vld [vmem:[#allocation53_spill] sm:$0xff] }
 0x243   : > { %v2677_v28 = vsel %vm1432_vm11, 1.0, %v6466_v5  ;;  %v1947_v63 = vadd.f32 %v1946_v55, %v1945_v53  ;;  %v1685_v13 = vsub.f32 %v6489_v17, %v6463_v56  ;;  %v1767_v51 = vmul.f32 %v2676_v46, %v1683_v4 }
 0x244   : > { %v1849_v6 = vmul.f32 %v1765_v37, %v1765_v37  ;;  %v1948_v30 = vsel %vm1139_vm3, %v1847_v38, 0.0  ;;  %v1352_v24 = vadd.s32 224, %v6461_v29  ;;  %vm1435_vm6 = vcmp.lt.s32.totalorder %v1350_v45, %v6462_v27 }
 0x245   : > { %v2678_v61 = vsel %vm1433_vm4, 1.0, %v6466_v5  ;;  %v1949_v49 = vadd.f32 %v1948_v30, %v1947_v63  ;;  %v1686_v52 = vsub.f32 %v6490_v47, %v6463_v56  ;;  %v1768_v55 = vmul.f32 %v2677_v28, %v1684_v60 }
 0x246   : > { %v1850_v53 = vmul.f32 %v1766_v44, %v1766_v44  ;;  %v1950_v17 = vsel %vm1139_vm3, %v1848_v31, 0.0  ;;  %v1353_v4 = vadd.s32 232, %v6461_v29  ;;  %vm1436_vm7 = vcmp.lt.s32.totalorder %v1351_v36, %v6462_v27 }
 0x247   : > { %v2679_v37 = vsel %vm1434_vm5, 1.0, %v6466_v5  ;;  %v1951_v38 = vadd.f32 %v1950_v17, %v1949_v49  ;;  %v1687_v46 = vsub.f32 %v6491_v8, %v6463_v56  ;;  %v1769_v30 = vmul.f32 %v2678_v61, %v1685_v13 }
 0x248   : > { %v1851_v63 = vmul.f32 %v1767_v51, %v1767_v51  ;;  %v1952_v47 = vsel %vm1139_vm3, %v1849_v6, 0.0  ;;  %v1354_v60 = vadd.s32 240, %v6461_v29  ;;  %vm1437_vm12 = vcmp.lt.s32.totalorder %v1352_v24, %v6462_v27  ;;  %v6493_v51 = vld [vmem:[#allocation60_spill] sm:$0xff] }
 0x249   : > { %v2680_v44 = vsel %vm1435_vm6, 1.0, %v6466_v5  ;;  %v1953_v31 = vadd.f32 %v1952_v47, %v1951_v38  ;;  %v1688_v28 = vsub.f32 %v6492_v1, %v6463_v56  ;;  %v1770_v17 = vmul.f32 %v2679_v37, %v1686_v52 }
 0x24a   : > { %v1852_v49 = vmul.f32 %v1768_v55, %v1768_v55  ;;  %v1954_v8 = vsel %vm1139_vm3, %v1850_v53, 0.0  ;;  %vm1438_vm13 = vcmp.lt.s32.totalorder %v1353_v4, %v6462_v27  ;;  %v2681_v29 = vsel %vm1436_vm7, 1.0, %v6466_v5  ;;  %v6494_v55 = vld [vmem:[#allocation63_spill] sm:$0xff] }
 0x24b   : > { %v1955_v13 = vadd.f32 %v1954_v8, %v1953_v31  ;;  %v1689_v6 = vsub.f32 %v6493_v51, %v6463_v56  ;;  %v1771_v45 = vmul.f32 %v2680_v44, %v1687_v46  ;;  %v1853_v24 = vmul.f32 %v1769_v30, %v1769_v30  ;;  %v6495_v46 = vld [vmem:[#allocation59_spill] sm:$0xff] }
 0x24c   : > { %v1956_v61 = vsel %vm1139_vm3, %v1851_v63, 0.0  ;;  %vm1439_vm14 = vcmp.lt.s32.totalorder %v1354_v60, %v6462_v27  ;;  %v2682_v47 = vsel %vm1437_vm12, 1.0, %v6466_v5  ;;  %v1690_v53 = vsub.f32 %v6494_v55, %v6463_v56 }
 0x24d   : > { %v1957_v52 = vadd.f32 %v1956_v61, %v1955_v13  ;;  %v1772_v4 = vmul.f32 %v2681_v29, %v1688_v28  ;;  %v1854_v37 = vmul.f32 %v1770_v17, %v1770_v17  ;;  %v1958_v36 = vsel %vm1139_vm3, %v1852_v49, 0.0 }
 0x24e   : > { %v2683_v38 = vsel %vm1438_vm13, 1.0, %v6466_v5  ;;  %v1691_v30 = vsub.f32 %v6495_v46, %v6463_v56  ;;  %v1773_v44 = vmul.f32 %v2682_v47, %v1689_v6  ;;  %v1855_v63 = vmul.f32 %v1771_v45, %v1771_v45 }
 0x24f   : > { %v1959_v8 = vadd.f32 %v1958_v36, %v1957_v52  ;;  %v1960_v27 = vsel %vm1139_vm3, %v1853_v24, 0.0  ;;  %v2684_v60 = vsel %vm1439_vm14, 1.0, %v6466_v5  ;;  %v1774_v13 = vmul.f32 %v2683_v38, %v1690_v53  ;;  %v6496_v5 = vld [vmem:[#allocation151_spill] sm:$0xff]  ;;  %v6497_v38 = vld [vmem:[#allocation152_spill] sm:$0xff] }
 0x250   : > { %v1856_v61 = vmul.f32 %v1772_v4, %v1772_v4  ;;  %v1962_v28 = vsel %vm1139_vm3, %v1854_v37, 0.0  ;;  %v1775_v29 = vmul.f32 %v2684_v60, %v1691_v30  ;;  %v1857_v49 = vmul.f32 %v1773_v44, %v1773_v44  ;;  %v6498_v44 = vld [vmem:[#allocation87_spill] sm:$0xff] }
 0x251   : > { %v1961_v31 = vadd.f32 %v1960_v27, %v1959_v8  ;;  %v1964_v55 = vsel %vm1139_vm3, %v1855_v63, 0.0  ;;  %v1858_v36 = vmul.f32 %v1774_v13, %v1774_v13  ;;  %v1860_v53 = vmul.f32 %v6496_v5, %v6496_v5 }
 0x252   : > { %v1966_v46 = vsel %vm1139_vm3, %v1856_v61, 0.0  ;;  %v1859_v45 = vmul.f32 %v1775_v29, %v1775_v29  ;;  %v1968_v24 = vsel %vm1139_vm3, %v1857_v49, 0.0  ;;  %v1861_v8 = vmul.f32 %v6497_v38, %v6497_v38 }
 0x253   : > { %v1963_v17 = vadd.f32 %v1962_v28, %v1961_v31  ;;  %v1970_v4 = vsel %vm1139_vm3, %v1858_v36, 0.0  ;;  %v1862_v63 = vmul.f32 %v6498_v44, %v6498_v44  ;;  %v1863_v60 = vmul.f32 %v4444_v59, %v4444_v59 }
 0x254   : > { %v1972_v30 = vsel %vm1139_vm3, %v1859_v45, 0.0  ;;  %v1976_v31 = vsel %vm1139_vm3, %v1861_v8, 0.0  ;;  %v1864_v61 = vmul.f32 %v4447_v0, %v4447_v0  ;;  %v1865_v29 = vmul.f32 %v4450_v11, %v4450_v11 }
 0x255   : > { %v1965_v52 = vadd.f32 %v1964_v55, %v1963_v17  ;;  %v1978_v28 = vsel %vm1139_vm3, %v1862_v63, 0.0  ;;  %v1980_v49 = vsel %vm1139_vm3, %v1863_v60, 0.0  ;;  %v1866_v36 = vmul.f32 %v4453_v7, %v4453_v7 }
 0x256   : > { %v1982_v59 = vsel %vm1139_vm3, %v1864_v61, 0.0  ;;  %v1867_v45 = vmul.f32 %v4456_v26, %v4456_v26  ;;  %v1984_v0 = vsel %vm1139_vm3, %v1865_v29, 0.0  ;;  %v1871_v8 = vmul.f32 %v4468_v35, %v4468_v35 }
 0x257   : > { %v1967_v6 = vadd.f32 %v1966_v46, %v1965_v52  ;;  %v1974_v46 = vsel %vm1139_vm3, %v1860_v53, 0.0  ;;  %v1986_v11 = vsel %vm1139_vm3, %v1866_v36, 0.0  ;;  %v1869_v53 = vmul.f32 %v4462_v40, %v4462_v40 }
 0x258   : > { %v1988_v7 = vsel %vm1139_vm3, %v1867_v45, 0.0  ;;  %v1873_v63 = vmul.f32 %v4474_v57, %v4474_v57  ;;  %v1876_v61 = vmul.f32 %v4483_v48, %v4483_v48  ;;  %v1879_v36 = vmul.f32 %v4492_v42, %v4492_v42 }
 0x259   : > { %v1969_v47 = vadd.f32 %v1968_v24, %v1967_v6 }
 0x25b   : > { %v1971_v37 = vadd.f32 %v1970_v4, %v1969_v47  ;;  %v1868_v47 = vmul.f32 %v4459_v21, %v4459_v21  ;;  %v1992_v21 = vsel %vm1139_vm3, %v1869_v53, 0.0 }
 0x25d   : > { %v1973_v55 = vadd.f32 %v1972_v30, %v1971_v37  ;;  %v1870_v37 = vmul.f32 %v4465_v58, %v4465_v58  ;;  %v1990_v26 = vsel %vm1139_vm3, %v1868_v47, 0.0  ;;  %v1996_v58 = vsel %vm1139_vm3, %v1871_v8, 0.0 }
 0x25e   : > { %v1882_v47 = vmul.f32 %v4501_v23, %v4501_v23 }
 0x25f   : > { %v1975_v27 = vadd.f32 %v1974_v46, %v1973_v55  ;;  %v1872_v55 = vmul.f32 %v4471_v39, %v4471_v39  ;;  %v1994_v40 = vsel %vm1139_vm3, %v1870_v37, 0.0  ;;  %v2000_v39 = vsel %vm1139_vm3, %v1873_v63, 0.0 }
 0x260   : > { %v1885_v37 = vmul.f32 %v4510_v25, %v4510_v25 }
 0x261   : > { %v1977_v13 = vadd.f32 %v1976_v31, %v1975_v27  ;;  %v1874_v27 = vmul.f32 %v4477_v3, %v4477_v3  ;;  %v1998_v35 = vsel %vm1139_vm3, %v1872_v55, 0.0  ;;  %v1875_v31 = vmul.f32 %v4480_v32, %v4480_v32 }
 0x262   : > { %v2006_v32 = vsel %vm1139_vm3, %v1876_v61, 0.0  ;;  %v1888_v55 = vmul.f32 %v4519_v22, %v4519_v22  ;;  %v1894_v61 = vmul.f32 %v4537_v50, %v4537_v50 }
 0x263   : > { %v1979_v17 = vadd.f32 %v1978_v28, %v1977_v13  ;;  %v2002_v57 = vsel %vm1139_vm3, %v1874_v27, 0.0  ;;  %v2004_v3 = vsel %vm1139_vm3, %v1875_v31, 0.0  ;;  %v1891_v27 = vmul.f32 %v4528_v2, %v4528_v2 }
 0x265   : > { %v1981_v52 = vadd.f32 %v1980_v49, %v1979_v17  ;;  %v1877_v17 = vmul.f32 %v4486_v41, %v4486_v41  ;;  %v1878_v49 = vmul.f32 %v4489_v54, %v4489_v54  ;;  %v2012_v54 = vsel %vm1139_vm3, %v1879_v36, 0.0 }
 0x267   : > { %v1983_v6 = vadd.f32 %v1982_v59, %v1981_v52  ;;  %v2008_v48 = vsel %vm1139_vm3, %v1877_v17, 0.0  ;;  %v2010_v41 = vsel %vm1139_vm3, %v1878_v49, 0.0  ;;  %v1897_v49 = vmul.f32 %v4546_v12, %v4546_v12 }
 0x269   : > { %v1985_v24 = vadd.f32 %v1984_v0, %v1983_v6  ;;  %v1880_v6 = vmul.f32 %v4495_v20, %v4495_v20  ;;  %v1881_v0 = vmul.f32 %v4498_v33, %v4498_v33  ;;  %v2018_v33 = vsel %vm1139_vm3, %v1882_v47, 0.0 }
 0x26b   : > { %v1987_v5 = vadd.f32 %v1986_v11, %v1985_v24  ;;  %v2014_v42 = vsel %vm1139_vm3, %v1880_v6, 0.0  ;;  %v2016_v20 = vsel %vm1139_vm3, %v1881_v0, 0.0 }
 0x26d   : > { %v1989_v4 = vadd.f32 %v1988_v7, %v1987_v5  ;;  %v1883_v5 = vmul.f32 %v4504_v16, %v4504_v16  ;;  %v1884_v7 = vmul.f32 %v4507_v10, %v4507_v10  ;;  %v2024_v10 = vsel %vm1139_vm3, %v1885_v37, 0.0 }
 0x26f   : > { %v1991_v38 = vadd.f32 %v1990_v26, %v1989_v4  ;;  %v2020_v23 = vsel %vm1139_vm3, %v1883_v5, 0.0  ;;  %v2022_v16 = vsel %vm1139_vm3, %v1884_v7, 0.0  ;;  %v6503_v5 = vld [vmem:[#allocation109_spill] sm:$0xff] }
 0x271   : > { %v1993_v30 = vadd.f32 %v1992_v21, %v1991_v38  ;;  %v1886_v38 = vmul.f32 %v4513_v15, %v4513_v15  ;;  %v1887_v21 = vmul.f32 %v4516_v34, %v4516_v34  ;;  %v2030_v34 = vsel %vm1139_vm3, %v1888_v55, 0.0 }
 0x273   : > { %v1995_v44 = vadd.f32 %v1994_v40, %v1993_v30  ;;  %v2026_v25 = vsel %vm1139_vm3, %v1886_v38, 0.0  ;;  %v2028_v15 = vsel %vm1139_vm3, %v1887_v21, 0.0  ;;  %v6506_v21 = vld [vmem:[#allocation112_spill] sm:$0xff] }
 0x275   : > { %v1997_v46 = vadd.f32 %v1996_v58, %v1995_v44  ;;  %v1889_v44 = vmul.f32 %v4522_v18, %v4522_v18  ;;  %v1890_v58 = vmul.f32 %v4525_v43, %v4525_v43  ;;  %v2036_v43 = vsel %vm1139_vm3, %v1891_v27, 0.0  ;;  %v6509_v27 = vld [vmem:[#allocation115_spill] sm:$0xff] }
 0x277   : > { %v1999_v60 = vadd.f32 %v1998_v35, %v1997_v46  ;;  %v2032_v22 = vsel %vm1139_vm3, %v1889_v44, 0.0  ;;  %v2034_v18 = vsel %vm1139_vm3, %v1890_v58, 0.0 }
 0x279   : > { %v2001_v13 = vadd.f32 %v2000_v39, %v1999_v60  ;;  %v1892_v60 = vmul.f32 %v4531_v62, %v4531_v62  ;;  %v1893_v39 = vmul.f32 %v4534_v14, %v4534_v14  ;;  %v2042_v14 = vsel %vm1139_vm3, %v1894_v61, 0.0 }
 0x27b   : > { %v2003_v28 = vadd.f32 %v2002_v57, %v2001_v13  ;;  %v2038_v2 = vsel %vm1139_vm3, %v1892_v60, 0.0  ;;  %v2040_v62 = vsel %vm1139_vm3, %v1893_v39, 0.0 }
 0x27d   : > { %v2005_v29 = vadd.f32 %v2004_v3, %v2003_v28  ;;  %v1895_v28 = vmul.f32 %v4540_v19, %v4540_v19  ;;  %v1896_v3 = vmul.f32 %v4543_v9, %v4543_v9  ;;  %v2048_v9 = vsel %vm1139_vm3, %v1897_v49, 0.0 }
 0x27f   : > { %v2007_v52 = vadd.f32 %v2006_v32, %v2005_v29  ;;  %v2044_v50 = vsel %vm1139_vm3, %v1895_v28, 0.0  ;;  %v2046_v19 = vsel %vm1139_vm3, %v1896_v3, 0.0  ;;  %v6512_v28 = vld [vmem:[#allocation118_spill] sm:$0xff] }
 0x281   : > { %v2009_v59 = vadd.f32 %v2008_v48, %v2007_v52  ;;  %v6499_v52 = vld [vmem:[#allocation105_spill] sm:$0xff] }
 0x282   : > { %v1898_v36 = vmul.f32 %v6499_v52, %v6499_v52 }
 0x283   : > { %v2011_v45 = vadd.f32 %v2010_v41, %v2009_v59  ;;  %v6500_v59 = vld [vmem:[#allocation106_spill] sm:$0xff] }
 0x284   : > { %v1899_v6 = vmul.f32 %v6500_v59, %v6500_v59  ;;  %v2050_v12 = vsel %vm1139_vm3, %v1898_v36, 0.0 }
 0x285   : > { %v2013_v24 = vadd.f32 %v2012_v54, %v2011_v45  ;;  %v6501_v45 = vld [vmem:[#allocation107_spill] sm:$0xff] }
 0x286   : > { %v1900_v0 = vmul.f32 %v6501_v45, %v6501_v45 }
 0x287   : > { %v2015_v11 = vadd.f32 %v2014_v42, %v2013_v24  ;;  %v6502_v24 = vld [vmem:[#allocation108_spill] sm:$0xff]  ;;  %v2052_v42 = vsel %vm1139_vm3, %v1899_v6, 0.0 }
 0x288   : > { %v1901_v47 = vmul.f32 %v6502_v24, %v6502_v24  ;;  %v2087_v24 = vld [vmem:[%s263_s25] sm:$0x1] }
 0x289   : > { %v2017_v53 = vadd.f32 %v2016_v20, %v2015_v11  ;;  %v1902_v20 = vmul.f32 %v6503_v5, %v6503_v5 }
 0x28a   : > { %v2056_v37 = vsel %vm1139_vm3, %v1901_v47, 0.0 }
 0x28b   : > { %v2019_v4 = vadd.f32 %v2018_v33, %v2017_v53  ;;  %v2054_v53 = vsel %vm1139_vm3, %v1900_v0, 0.0  ;;  %v6504_v33 = vld [vmem:[#allocation110_spill] sm:$0xff]  ;;  %v6514_v0 = vld [vmem:[#allocation149_spill] sm:$0xff] }
 0x28d   : > { %v2021_v26 = vadd.f32 %v2020_v23, %v2019_v4  ;;  %v1903_v4 = vmul.f32 %v6504_v33, %v6504_v33  ;;  %v6516_v33 = vld [vmem:[#allocation12_spill] sm:$0xff] }
 0x28f   : > { %v2023_v8 = vadd.f32 %v2022_v16, %v2021_v26  ;;  %v6505_v26 = vld [vmem:[#allocation111_spill] sm:$0xff]  ;;  %v2058_v16 = vsel %vm1139_vm3, %v1902_v20, 0.0  ;;  %v6515_v20 = vld [vmem:[#allocation148_spill] sm:$0xff] }
 0x290   : > { %v1904_v38 = vmul.f32 %v6505_v26, %v6505_v26  ;;  %v6518_v26 = vld [vmem:[#allocation11_spill] sm:$0xff] }
 0x291   : > { %v2025_v30 = vadd.f32 %v2024_v10, %v2023_v8  ;;  %v1905_v10 = vmul.f32 %v6506_v21, %v6506_v21 }
 0x292   : > { %v2062_v44 = vsel %vm1139_vm3, %v1904_v38, 0.0 }
 0x293   : > { %v2027_v40 = vadd.f32 %v2026_v25, %v2025_v30  ;;  %v2060_v30 = vsel %vm1139_vm3, %v1903_v4, 0.0  ;;  %v6507_v25 = vld [vmem:[#allocation113_spill] sm:$0xff] }
 0x295   : > { %v2029_v63 = vadd.f32 %v2028_v15, %v2027_v40  ;;  %v1906_v40 = vmul.f32 %v6507_v25, %v6507_v25 }
 0x297   : > { %v2031_v46 = vadd.f32 %v2030_v34, %v2029_v63  ;;  %v6508_v63 = vld [vmem:[#allocation114_spill] sm:$0xff]  ;;  %v2064_v34 = vsel %vm1139_vm3, %v1905_v10, 0.0 }
 0x298   : > { %v1907_v58 = vmul.f32 %v6508_v63, %v6508_v63  ;;  %v6521_v10 = vld [vmem:[#allocation18_spill] sm:$0xff] }
 0x299   : > { %v2033_v35 = vadd.f32 %v2032_v22, %v2031_v46  ;;  %v1908_v22 = vmul.f32 %v6509_v27, %v6509_v27 }
 0x29a   : > { %v2068_v39 = vsel %vm1139_vm3, %v1907_v58, 0.0  ;;  %v6525_v58 = vld [vmem:[#allocation23_spill] sm:$0xff] }
 0x29b   : > { %v2035_v31 = vadd.f32 %v2034_v18, %v2033_v35  ;;  %v2066_v35 = vsel %vm1139_vm3, %v1906_v40, 0.0  ;;  %v6510_v18 = vld [vmem:[#allocation116_spill] sm:$0xff]  ;;  %v6523_v40 = vld [vmem:[#allocation17_spill] sm:$0xff] }
 0x29d   : > { %v2037_v13 = vadd.f32 %v2036_v43, %v2035_v31  ;;  %v1909_v31 = vmul.f32 %v6510_v18, %v6510_v18 }
 0x29f   : > { %v2039_v57 = vadd.f32 %v2038_v2, %v2037_v13  ;;  %v6511_v13 = vld [vmem:[#allocation117_spill] sm:$0xff]  ;;  %v2070_v2 = vsel %vm1139_vm3, %v1908_v22, 0.0 }
 0x2a0   : > { %v1910_v61 = vmul.f32 %v6511_v13, %v6511_v13  ;;  %v6527_v22 = vld [vmem:[#allocation21_spill] sm:$0xff] }
 0x2a1   : > { %v2041_v17 = vadd.f32 %v2040_v62, %v2039_v57  ;;  %v1911_v62 = vmul.f32 %v6512_v28, %v6512_v28 }
 0x2a2   : > { %v2074_v49 = vsel %vm1139_vm3, %v1910_v61, 0.0  ;;  %v6531_v61 = vld [vmem:[#allocation29_spill] sm:$0xff] }
 0x2a3   : > { %v2043_v29 = vadd.f32 %v2042_v14, %v2041_v17  ;;  %v2072_v17 = vsel %vm1139_vm3, %v1909_v31, 0.0  ;;  %v6513_v14 = vld [vmem:[#allocation119_spill] sm:$0xff] }
 0x2a4   : > { %v6529_v31 = vld [vmem:[#allocation31_spill] sm:$0xff] }
 0x2a5   : > { %v2045_v32 = vadd.f32 %v2044_v50, %v2043_v29  ;;  %v1912_v29 = vmul.f32 %v6513_v14, %v6513_v14 }
 0x2a7   : > { %v2047_v48 = vadd.f32 %v2046_v19, %v2045_v32  ;;  %v2076_v32 = vsel %vm1139_vm3, %v1911_v62, 0.0  ;;  %v2078_v36 = vsel %vm1139_vm3, %v1912_v29, 0.0  ;;  %v6533_v62 = vld [vmem:[#allocation39_spill] sm:$0xff]  ;;  %v6535_v29 = vld [vmem:[#allocation37_spill] sm:$0xff] }
 0x2a9   : > { %v2049_v41 = vadd.f32 %v2048_v9, %v2047_v48 }
 0x2ab   : > { %v2051_v54 = vadd.f32 %v2050_v12, %v2049_v41 }
 0x2ad   : > { %v2053_v11 = vadd.f32 %v2052_v42, %v2051_v54 }
 0x2af   : > { %v2055_v7 = vadd.f32 %v2054_v53, %v2053_v11  ;;  %v4983_v11 = vld [vmem:[%s271_s26] sm:$0x1] }
 0x2b1   : > { %v2057_v23 = vadd.f32 %v2056_v37, %v2055_v7  ;;  %v6517_v37 = vld [vmem:[#allocation14_spill] sm:$0xff] }
 0x2b2   : > { %v6573_v7 = vld [vmem:[#allocation38_spill] sm:$0xff] }
 0x2b3   : > { %v2059_v8 = vadd.f32 %v2058_v16, %v2057_v23 }
 0x2b5   : > { %v2061_v55 = vadd.f32 %v2060_v30, %v2059_v8  ;;  %v6520_v8 = vld [vmem:[#allocation16_spill] sm:$0xff] }
 0x2b7   : > { %v2063_v15 = vadd.f32 %v2062_v44, %v2061_v55  ;;  %v6522_v55 = vld [vmem:[#allocation15_spill] sm:$0xff] }
 0x2b9   : > { %v2065_v46 = vadd.f32 %v2064_v34, %v2063_v15  ;;  %v6524_v15 = vld [vmem:[#allocation20_spill] sm:$0xff] }
 0x2bb   : > { %v2067_v60 = vadd.f32 %v2066_v35, %v2065_v46  ;;  %v6526_v46 = vld [vmem:[#allocation19_spill] sm:$0xff] }
 0x2bd   : > { %v2069_v43 = vadd.f32 %v2068_v39, %v2067_v60  ;;  %v6528_v60 = vld [vmem:[#allocation28_spill] sm:$0xff] }
 0x2bf   : > { %v2071_v57 = vadd.f32 %v2070_v2, %v2069_v43  ;;  %v6530_v43 = vld [vmem:[#allocation27_spill] sm:$0xff] }
 0x2c1   : > { %v2073_v3 = vadd.f32 %v2072_v17, %v2071_v57  ;;  %v6532_v57 = vld [vmem:[#allocation36_spill] sm:$0xff] }
 0x2c3   : > { %v2075_v50 = vadd.f32 %v2074_v49, %v2073_v3  ;;  %v6534_v3 = vld [vmem:[#allocation35_spill] sm:$0xff] }
 0x2c5   : > { %v2077_v52 = vadd.f32 %v2076_v32, %v2075_v50  ;;  %v6536_v50 = vld [vmem:[#allocation44_spill] sm:$0xff] }
 0x2c7   : > { %v2079_v19 = vadd.f32 %v2078_v36, %v2077_v52  ;;  %v6537_v52 = vld [vmem:[#allocation47_spill] sm:$0xff] }
 0x2c9   : > { %v2080_v48 = vrot.slane %v2079_v19, 4 }
 0x2cb   : > { %v2081_v59 = vadd.f32 %v2080_v48, %v2079_v19  ;;  %v6538_v19 = vld [vmem:[#allocation43_spill] sm:$0xff] }
 0x2cd   : > { %v2082_v6 = vrot.slane %v2081_v59, 2 }
 0x2cf   : > { %v2083_v9 = vadd.f32 %v2082_v6, %v2081_v59  ;;  %v6539_v59 = vld [vmem:[#allocation45_spill] sm:$0xff] }
 0x2d1   : > { %v2084_v41 = vrot.slane %v2083_v9, 1 }
 0x2d3   : > { %v2085_v45 = vadd.f32 %v2084_v41, %v2083_v9  ;;  %v6540_v9 = vld [vmem:[#allocation52_spill] sm:$0xff] }
 0x2d5   : > { %v2086_v12 = vmul.f32 %v2085_v45, %v6514_v0  ;;  %v6541_v45 = vld [vmem:[#allocation55_spill] sm:$0xff] }
 0x2d7   : > { %v2088_v54 = vadd.f32 1e-05, %v2086_v12  ;;  %v6542_v12 = vld [vmem:[#allocation51_spill] sm:$0xff] }
 0x2d9   : > { %2966 = vrsqrt.f32 %v2088_v54 }
 0x2e3   : > { %v2967_v47 = vpop.eup %2966 }
 0x2e4   : > { %v2090_v42 = vmul.f32 %v2967_v47, %v2087_v24 }
 0x2e6   : > { %v4986_v5 = vmul.f32 %v2090_v42, %v6463_v56  ;;  %v4989_v53 = vrot.slane %v2090_v42, %v6515_v20  ;;  %v6519_v56 = vld [vmem:[#allocation13_spill] sm:$0xff]  ;;  %v6543_v42 = vld [vmem:[#allocation63_spill] sm:$0xff] }
 0x2e8   : > { %v4995_v4 = vmul.f32 %v4989_v53, %v6516_v33  ;;  %v4999_v23 = vmul.f32 %v4989_v53, %v6517_v37  ;;  %v5003_v38 = vmul.f32 %v6518_v26, %v4989_v53  ;;  %v5007_v16 = vmul.f32 %v6519_v56, %v4989_v53  ;;  %v6544_v37 = vld [vmem:[#allocation59_spill] sm:$0xff]  ;;  %v6545_v56 = vld [vmem:[#allocation61_spill] sm:$0xff] }
 0x2e9   : > { %v5011_v21 = vmul.f32 %v4989_v53, %v6520_v8  ;;  %v5015_v30 = vmul.f32 %v4989_v53, %v6521_v10  ;;  %v5019_v25 = vmul.f32 %v6522_v55, %v4989_v53  ;;  %v5023_v44 = vmul.f32 %v6523_v40, %v4989_v53  ;;  %v6546_v10 = vld [vmem:[#allocation68_spill] sm:$0xff]  ;;  %v6547_v55 = vld [vmem:[#allocation71_spill] sm:$0xff] }
 0x2ea   : > { %v5027_v63 = vmul.f32 %v4989_v53, %v6524_v15  ;;  %v5031_v34 = vmul.f32 %v4989_v53, %v6525_v58  ;;  %v5035_v27 = vmul.f32 %v6526_v46, %v4989_v53  ;;  %v5039_v35 = vmul.f32 %v6527_v22, %v4989_v53  ;;  %v6548_v40 = vld [vmem:[#allocation67_spill] sm:$0xff]  ;;  %v6549_v58 = vld [vmem:[#allocation69_spill] sm:$0xff]  ;;  %v6550_v22 = vld [vmem:[#allocation76_spill] sm:$0xff] }
 0x2eb   : > { %v5043_v18 = vmul.f32 %v4989_v53, %v6528_v60  ;;  %v5047_v39 = vmul.f32 %v4989_v53, %v6529_v31  ;;  %v5051_v13 = vmul.f32 %v6530_v43, %v4989_v53  ;;  %v5055_v2 = vmul.f32 %v6531_v61, %v4989_v53  ;;  %v6551_v31 = vld [vmem:[#allocation79_spill] sm:$0xff] }
 0x2ec   : > { %v5059_v28 = vmul.f32 %v4989_v53, %v6532_v57  ;;  %v5063_v17 = vmul.f32 %v4989_v53, %v6533_v62  ;;  %v5067_v14 = vmul.f32 %v6534_v3, %v4989_v53  ;;  %v5071_v49 = vmul.f32 %v6535_v29, %v4989_v53  ;;  %v6552_v61 = vld [vmem:[#allocation75_spill] sm:$0xff]  ;;  %v6553_v62 = vld [vmem:[#allocation77_spill] sm:$0xff] }
 0x2ed   : > { %v5075_v32 = vmul.f32 %v4989_v53, %v6536_v50  ;;  %v5079_v36 = vmul.f32 %v4989_v53, %v6537_v52  ;;  %v5083_v48 = vmul.f32 %v6538_v19, %v4989_v53  ;;  %v5087_v6 = vmul.f32 %v6539_v59, %v4989_v53  ;;  %v6554_v29 = vld [vmem:[#allocation85_spill] sm:$0xff]  ;;  %v6556_v59 = vld [vmem:[#allocation83_spill] sm:$0xff] }
 0x2ee   : > { %v5091_v41 = vmul.f32 %v4989_v53, %v6540_v9  ;;  %v5095_v0 = vmul.f32 %v4989_v53, %v6541_v45  ;;  %v5099_v54 = vmul.f32 %v6542_v12, %v4989_v53  ;;  %v5103_v24 = vmul.f32 %v6492_v1, %v4989_v53  ;;  %v6555_v52 = vld [vmem:[#allocation89_spill] sm:$0xff]  ;;  %v6557_v45 = vld [vmem:[#allocation86_spill] sm:$0xff] }
 0x2ef   : > { %v5107_v47 = vmul.f32 %v4989_v53, %v6493_v51  ;;  %v5111_v33 = vmul.f32 %v4989_v53, %v6543_v42  ;;  %v5115_v26 = vmul.f32 %v6544_v37, %v4989_v53  ;;  %v5119_v8 = vmul.f32 %v6545_v56, %v4989_v53  ;;  %v6558_v42 = vld [vmem:[#allocation24_spill] sm:$0xff]  ;;  %v6559_v56 = vld [vmem:[#allocation26_spill] sm:$0xff] }
 0x2f0   : > { %v5123_v1 = vmul.f32 %v4989_v53, %v6546_v10  ;;  %v5127_v51 = vmul.f32 %v4989_v53, %v6547_v55  ;;  %v5131_v15 = vmul.f32 %v6548_v40, %v4989_v53  ;;  %v5135_v46 = vmul.f32 %v6549_v58, %v4989_v53  ;;  %v6560_v55 = vld [vmem:[#allocation22_spill] sm:$0xff]  ;;  %v6561_v58 = vld [vmem:[#allocation25_spill] sm:$0xff] }
 0x2f1   : > { %v5139_v60 = vmul.f32 %v4989_v53, %v6550_v22  ;;  %v5143_v43 = vmul.f32 %v4989_v53, %v6551_v31  ;;  %v5147_v57 = vmul.f32 %v6552_v61, %v4989_v53  ;;  %v5151_v3 = vmul.f32 %v6553_v62, %v4989_v53  ;;  %v6562_v31 = vld [vmem:[#allocation32_spill] sm:$0xff]  ;;  %v6563_v62 = vld [vmem:[#allocation34_spill] sm:$0xff] }
 0x2f2   : > { %v5155_v50 = vmul.f32 %v4989_v53, %v6554_v29  ;;  %v5159_v19 = vmul.f32 %v4989_v53, %v6555_v52  ;;  %v5163_v9 = vmul.f32 %v6556_v59, %v4989_v53  ;;  %v5167_v12 = vmul.f32 %v6557_v45, %v4989_v53  ;;  %v6565_v52 = vld [vmem:[#allocation30_spill] sm:$0xff]  ;;  %v6567_v45 = vld [vmem:[#allocation33_spill] sm:$0xff] }
 0x2f3   : > { %v5171_v37 = vmul.f32 %v4989_v53, %v6558_v42  ;;  %v5175_v10 = vmul.f32 %v4989_v53, %v6559_v56  ;;  %v5179_v40 = vmul.f32 %v6560_v55, %v4989_v53  ;;  %v5183_v22 = vmul.f32 %v6561_v58, %v4989_v53  ;;  %v6569_v56 = vld [vmem:[#allocation40_spill] sm:$0xff]  ;;  %v6571_v58 = vld [vmem:[#allocation42_spill] sm:$0xff] }
 0x2f4   : > { %v5187_v61 = vmul.f32 %v4989_v53, %v6562_v31  ;;  %v5191_v29 = vmul.f32 %v4989_v53, %v6563_v62  ;;  %v5195_v59 = vmul.f32 %v6565_v52, %v4989_v53  ;;  %v5199_v42 = vmul.f32 %v6567_v45, %v4989_v53 }
 0x2f5   : > { %v5203_v55 = vmul.f32 %v4989_v53, %v6569_v56  ;;  %v5207_v31 = vmul.f32 %v4989_v53, %v6571_v58  ;;  %v5211_v62 = vmul.f32 %v6573_v7, %v4989_v53 }
 0x2f6   : > { %6564 = vst [vmem:[#allocation120_spill] sm:$0xff] %v5191_v29  ;;  %6566 = vst [vmem:[#allocation121_spill] sm:$0xff] %v5195_v59  ;;  %v6575_v29 = vld [vmem:[#allocation41_spill] sm:$0xff]  ;;  %v6577_v59 = vld [vmem:[#allocation48_spill] sm:$0xff] }
 0x2f7   : > { %6568 = vst [vmem:[#allocation122_spill] sm:$0xff] %v5199_v42  ;;  %6570 = vst [vmem:[#allocation123_spill] sm:$0xff] %v5203_v55  ;;  %v5215_v52 = vmul.f32 %v6575_v29, %v4989_v53  ;;  %v5219_v45 = vmul.f32 %v4989_v53, %v6577_v59  ;;  %v6579_v42 = vld [vmem:[#allocation50_spill] sm:$0xff] }
 0x2f8   : > { %6572 = vst [vmem:[#allocation124_spill] sm:$0xff] %v5207_v31  ;;  %6574 = vst [vmem:[#allocation125_spill] sm:$0xff] %v5211_v62  ;;  %v5223_v56 = vmul.f32 %v4989_v53, %v6579_v42  ;;  %v6581_v55 = vld [vmem:[#allocation46_spill] sm:$0xff]  ;;  %v6583_v31 = vld [vmem:[#allocation49_spill] sm:$0xff] }
 0x2f9   : > { %6576 = vst [vmem:[#allocation126_spill] sm:$0xff] %v5215_v52  ;;  %6578 = vst [vmem:[#allocation127_spill] sm:$0xff] %v5219_v45  ;;  %v5227_v58 = vmul.f32 %v6581_v55, %v4989_v53  ;;  %v5231_v7 = vmul.f32 %v6583_v31, %v4989_v53  ;;  %v6585_v62 = vld [vmem:[#allocation56_spill] sm:$0xff]  ;;  %v6587_v52 = vld [vmem:[#allocation58_spill] sm:$0xff] }
 0x2fa   : > { %6580 = vst [vmem:[#allocation128_spill] sm:$0xff] %v5223_v56  ;;  %v5235_v29 = vmul.f32 %v4989_v53, %v6585_v62  ;;  %v5239_v59 = vmul.f32 %v4989_v53, %v6587_v52  ;;  %v6589_v45 = vld [vmem:[#allocation54_spill] sm:$0xff]  ;;  %v6591_v56 = vld [vmem:[#allocation57_spill] sm:$0xff] }
 0x2fb   : > { %6582 = vst [vmem:[#allocation129_spill] sm:$0xff] %v5227_v58  ;;  %6584 = vst [vmem:[#allocation130_spill] sm:$0xff] %v5231_v7  ;;  %v5243_v42 = vmul.f32 %v6589_v45, %v4989_v53  ;;  %v5247_v55 = vmul.f32 %v6591_v56, %v4989_v53  ;;  %v6593_v58 = vld [vmem:[#allocation64_spill] sm:$0xff]  ;;  %v6595_v7 = vld [vmem:[#allocation66_spill] sm:$0xff] }
 0x2fc   : > { %6586 = vst [vmem:[#allocation131_spill] sm:$0xff] %v5235_v29  ;;  %6588 = vst [vmem:[#allocation132_spill] sm:$0xff] %v5239_v59  ;;  %v5251_v31 = vmul.f32 %v4989_v53, %v6593_v58  ;;  %v5255_v62 = vmul.f32 %v4989_v53, %v6595_v7  ;;  %v6597_v29 = vld [vmem:[#allocation62_spill] sm:$0xff]  ;;  %v6599_v59 = vld [vmem:[#allocation65_spill] sm:$0xff] }
 0x2fd   : > { %6590 = vst [vmem:[#allocation133_spill] sm:$0xff] %v5243_v42  ;;  %6592 = vst [vmem:[#allocation134_spill] sm:$0xff] %v5247_v55  ;;  %v5259_v52 = vmul.f32 %v6597_v29, %v4989_v53  ;;  %v5263_v45 = vmul.f32 %v6599_v59, %v4989_v53  ;;  %v6601_v42 = vld [vmem:[#allocation72_spill] sm:$0xff]  ;;  %v6603_v55 = vld [vmem:[#allocation74_spill] sm:$0xff] }
 0x2fe   : > { %6594 = vst [vmem:[#allocation135_spill] sm:$0xff] %v5251_v31  ;;  %6596 = vst [vmem:[#allocation136_spill] sm:$0xff] %v5255_v62  ;;  %v5267_v56 = vmul.f32 %v4989_v53, %v6601_v42  ;;  %v5271_v58 = vmul.f32 %v4989_v53, %v6603_v55  ;;  %v6605_v31 = vld [vmem:[#allocation70_spill] sm:$0xff]  ;;  %v6607_v62 = vld [vmem:[#allocation73_spill] sm:$0xff] }
 0x2ff   : > { %6598 = vst [vmem:[#allocation137_spill] sm:$0xff] %v5259_v52  ;;  %6600 = vst [vmem:[#allocation138_spill] sm:$0xff] %v5263_v45  ;;  %v5275_v7 = vmul.f32 %v6605_v31, %v4989_v53  ;;  %v5279_v29 = vmul.f32 %v6607_v62, %v4989_v53  ;;  %v6609_v52 = vld [vmem:[#allocation80_spill] sm:$0xff]  ;;  %v6611_v45 = vld [vmem:[#allocation82_spill] sm:$0xff] }
 0x300   : > { %6602 = vst [vmem:[#allocation139_spill] sm:$0xff] %v5267_v56  ;;  %6604 = vst [vmem:[#allocation140_spill] sm:$0xff] %v5271_v58  ;;  %v5283_v59 = vmul.f32 %v4989_v53, %v6609_v52  ;;  %v5287_v42 = vmul.f32 %v4989_v53, %v6611_v45  ;;  %v6613_v56 = vld [vmem:[#allocation78_spill] sm:$0xff]  ;;  %v6615_v58 = vld [vmem:[#allocation81_spill] sm:$0xff] }
 0x301   : > { %6606 = vst [vmem:[#allocation141_spill] sm:$0xff] %v5275_v7  ;;  %6608 = vst [vmem:[#allocation142_spill] sm:$0xff] %v5279_v29  ;;  %v5291_v55 = vmul.f32 %v6613_v56, %v4989_v53  ;;  %v5295_v31 = vmul.f32 %v6615_v58, %v4989_v53  ;;  %v6617_v7 = vld [vmem:[#allocation90_spill] sm:$0xff]  ;;  %v6619_v29 = vld [vmem:[#allocation92_spill] sm:$0xff] }
 0x302   : > { %6610 = vst [vmem:[#allocation143_spill] sm:$0xff] %v5283_v59  ;;  %6612 = vst [vmem:[#allocation144_spill] sm:$0xff] %v5287_v42  ;;  %v5299_v62 = vmul.f32 %v4989_v53, %v6617_v7  ;;  %v5303_v52 = vmul.f32 %v4989_v53, %v6619_v29  ;;  %v6621_v59 = vld [vmem:[#allocation88_spill] sm:$0xff]  ;;  %v6622_v42 = vld [vmem:[#allocation91_spill] sm:$0xff] }
 0x303   : > { %6614 = vst [vmem:[#allocation145_spill] sm:$0xff] %v5291_v55  ;;  %6616 = vst [vmem:[#allocation146_spill] sm:$0xff] %v5295_v31  ;;  %v5307_v45 = vmul.f32 %v6621_v59, %v4989_v53  ;;  %v5311_v56 = vmul.f32 %v6622_v42, %v4989_v53  ;;  %v6624_v55 = vld [vmem:[#allocation94_spill] sm:$0xff]  ;;  %v6625_v31 = vld [vmem:[#allocation96_spill] sm:$0xff]  ;;  %v6628_v42 = vsub.f32 %v4983_v11, %v4986_v5 }
 0x304   : > { %6618 = vst [vmem:[#allocation147_spill] sm:$0xff] %v5299_v62  ;;  %6620 = vst [vmem:[#allocation98_spill] sm:$0xff] %v5303_v52  ;;  %v5315_v58 = vmul.f32 %v4989_v53, %v6624_v55  ;;  %v5319_v7 = vmul.f32 %v4989_v53, %v6625_v31  ;;  %v6626_v62 = vld [vmem:[#allocation93_spill] sm:$0xff]  ;;  %v6627_v52 = vld [vmem:[#allocation95_spill] sm:$0xff] }
 0x305   : > { %6623 = vst [vmem:[#allocation99_spill] sm:$0xff] %v5311_v56  ;;  %v5323_v29 = vmul.f32 %v6626_v62, %v4989_v53  ;;  %v5327_v59 = vmul.f32 %v6627_v52, %v4989_v53  ;;  %v5333_v56 = vrot.slane %v6628_v42, %v6515_v20  ;;  %v6635_v52 = vld [vmem:[#allocation122_spill] sm:$0xff]  ;;  %v6637_v42 = vld [vmem:[#allocation123_spill] sm:$0xff] }
 0x307   : > { %v5337_v55 = vadd.f32 %v5333_v56, %v4995_v4  ;;  %v5341_v31 = vadd.f32 %v5333_v56, %v4999_v23  ;;  %v5345_v62 = vadd.f32 %v5333_v56, %v5003_v38  ;;  %v5349_v53 = vadd.f32 %v5333_v56, %v5007_v16 }
 0x308   : > { %v5353_v11 = vadd.f32 %v5333_v56, %v5011_v21  ;;  %v5357_v5 = vadd.f32 %v5333_v56, %v5015_v30  ;;  %v5361_v20 = vadd.f32 %v5333_v56, %v5019_v25  ;;  %v5365_v4 = vadd.f32 %v5333_v56, %v5023_v44 }
 0x309   : > { %v5369_v23 = vadd.f32 %v5333_v56, %v5027_v63  ;;  %v5373_v38 = vadd.f32 %v5333_v56, %v5031_v34  ;;  %v5377_v16 = vadd.f32 %v5333_v56, %v5035_v27  ;;  %v5381_v21 = vadd.f32 %v5333_v56, %v5039_v35 }
 0x30a   : > { %v5385_v30 = vadd.f32 %v5333_v56, %v5043_v18  ;;  %v5389_v25 = vadd.f32 %v5333_v56, %v5047_v39  ;;  %v5393_v44 = vadd.f32 %v5333_v56, %v5051_v13  ;;  %v5397_v63 = vadd.f32 %v5333_v56, %v5055_v2 }
 0x30b   : > { %v5401_v34 = vadd.f32 %v5333_v56, %v5059_v28  ;;  %v5405_v27 = vadd.f32 %v5333_v56, %v5063_v17  ;;  %v5409_v35 = vadd.f32 %v5333_v56, %v5067_v14  ;;  %v5413_v18 = vadd.f32 %v5333_v56, %v5071_v49 }
 0x30c   : > { %v5417_v39 = vadd.f32 %v5333_v56, %v5075_v32  ;;  %v5421_v13 = vadd.f32 %v5333_v56, %v5079_v36  ;;  %v5425_v2 = vadd.f32 %v5333_v56, %v5083_v48  ;;  %v5429_v28 = vadd.f32 %v5333_v56, %v5087_v6 }
 0x30d   : > { %v5433_v17 = vadd.f32 %v5333_v56, %v5091_v41  ;;  %v5437_v14 = vadd.f32 %v5333_v56, %v5095_v0  ;;  %v5441_v49 = vadd.f32 %v5333_v56, %v5099_v54  ;;  %v5445_v32 = vadd.f32 %v5333_v56, %v5103_v24 }
 0x30e   : > { %v5449_v36 = vadd.f32 %v5333_v56, %v5107_v47  ;;  %v5453_v48 = vadd.f32 %v5333_v56, %v5111_v33  ;;  %v5457_v6 = vadd.f32 %v5333_v56, %v5115_v26  ;;  %v5461_v41 = vadd.f32 %v5333_v56, %v5119_v8 }
 0x30f   : > { %v5465_v0 = vadd.f32 %v5333_v56, %v5123_v1  ;;  %v5469_v54 = vadd.f32 %v5333_v56, %v5127_v51  ;;  %v5473_v24 = vadd.f32 %v5333_v56, %v5131_v15  ;;  %v5477_v47 = vadd.f32 %v5333_v56, %v5135_v46 }
 0x310   : > { %v5481_v33 = vadd.f32 %v5333_v56, %v5139_v60  ;;  %v5485_v26 = vadd.f32 %v5333_v56, %v5143_v43  ;;  %v5489_v8 = vadd.f32 %v5333_v56, %v5147_v57  ;;  %v5493_v1 = vadd.f32 %v5333_v56, %v5151_v3 }
 0x311   : > { %v5497_v51 = vadd.f32 %v5333_v56, %v5155_v50  ;;  %v5501_v15 = vadd.f32 %v5333_v56, %v5159_v19  ;;  %v5505_v46 = vadd.f32 %v5333_v56, %v5163_v9  ;;  %v5509_v60 = vadd.f32 %v5333_v56, %v5167_v12  ;;  %v6631_v9 = vld [vmem:[#allocation120_spill] sm:$0xff] }
 0x312   : > { %v5513_v43 = vadd.f32 %v5333_v56, %v5171_v37  ;;  %v5517_v57 = vadd.f32 %v5333_v56, %v5175_v10  ;;  %v5521_v3 = vadd.f32 %v5333_v56, %v5179_v40  ;;  %v5525_v50 = vadd.f32 %v5333_v56, %v5183_v22  ;;  %v6633_v37 = vld [vmem:[#allocation121_spill] sm:$0xff] }
 0x313   : > { %v5529_v19 = vadd.f32 %v5333_v56, %v5187_v61  ;;  %v5533_v12 = vadd.f32 %v5333_v56, %v6631_v9  ;;  %v5537_v10 = vadd.f32 %v5333_v56, %v6633_v37  ;;  %v5541_v40 = vadd.f32 %v5333_v56, %v6635_v52 }
 0x314   : > { %6629 = vst [vmem:[#allocation100_spill] sm:$0xff] %v5525_v50  ;;  %v5545_v22 = vadd.f32 %v5333_v56, %v6637_v42  ;;  %v6639_v50 = vld [vmem:[#allocation124_spill] sm:$0xff] }
 0x315   : > { %6630 = vst [vmem:[#allocation101_spill] sm:$0xff] %v5529_v19  ;;  %6632 = vst [vmem:[#allocation102_spill] sm:$0xff] %v5533_v12  ;;  %v5549_v61 = vadd.f32 %v5333_v56, %v6639_v50  ;;  %v6641_v19 = vld [vmem:[#allocation125_spill] sm:$0xff]  ;;  %v6643_v12 = vld [vmem:[#allocation126_spill] sm:$0xff] }
 0x316   : > { %6634 = vst [vmem:[#allocation103_spill] sm:$0xff] %v5537_v10  ;;  %6636 = vst [vmem:[#allocation104_spill] sm:$0xff] %v5541_v40  ;;  %v5553_v9 = vadd.f32 %v5333_v56, %v6641_v19  ;;  %v5557_v37 = vadd.f32 %v5333_v56, %v6643_v12  ;;  %v6645_v10 = vld [vmem:[#allocation127_spill] sm:$0xff]  ;;  %v6647_v40 = vld [vmem:[#allocation128_spill] sm:$0xff] }
 0x317   : > { %6638 = vst [vmem:[#allocation84_spill] sm:$0xff] %v5545_v22  ;;  %6640 = vst [vmem:[#allocation97_spill] sm:$0xff] %v5549_v61  ;;  %v5561_v52 = vadd.f32 %v5333_v56, %v6645_v10  ;;  %v5565_v42 = vadd.f32 %v5333_v56, %v6647_v40  ;;  %v6649_v22 = vld [vmem:[#allocation129_spill] sm:$0xff]  ;;  %v6651_v61 = vld [vmem:[#allocation130_spill] sm:$0xff] }
 0x318   : > { %6642 = vst [vmem:[#allocation150_spill] sm:$0xff] %v5553_v9  ;;  %6644 = vst [vmem:[#allocation53_spill] sm:$0xff] %v5557_v37  ;;  %v5569_v50 = vadd.f32 %v5333_v56, %v6649_v22  ;;  %v5573_v19 = vadd.f32 %v5333_v56, %v6651_v61  ;;  %v6653_v9 = vld [vmem:[#allocation131_spill] sm:$0xff]  ;;  %v6655_v37 = vld [vmem:[#allocation132_spill] sm:$0xff] }
 0x319   : > { %6646 = vst [vmem:[#allocation60_spill] sm:$0xff] %v5561_v52  ;;  %6648 = vst [vmem:[#allocation151_spill] sm:$0xff] %v5565_v42  ;;  %v5577_v12 = vadd.f32 %v5333_v56, %v6653_v9  ;;  %v5581_v10 = vadd.f32 %v5333_v56, %v6655_v37  ;;  %v6657_v52 = vld [vmem:[#allocation133_spill] sm:$0xff]  ;;  %v6659_v42 = vld [vmem:[#allocation134_spill] sm:$0xff] }
 0x31a   : > { %6650 = vst [vmem:[#allocation152_spill] sm:$0xff] %v5569_v50  ;;  %6652 = vst [vmem:[#allocation87_spill] sm:$0xff] %v5573_v19  ;;  %v5585_v40 = vadd.f32 %v5333_v56, %v6657_v52  ;;  %v5589_v22 = vadd.f32 %v5333_v56, %v6659_v42  ;;  %v6661_v50 = vld [vmem:[#allocation135_spill] sm:$0xff]  ;;  %v6663_v19 = vld [vmem:[#allocation136_spill] sm:$0xff] }
 0x31b   : > { %6654 = vst [vmem:[#allocation105_spill] sm:$0xff] %v5577_v12  ;;  %6656 = vst [vmem:[#allocation106_spill] sm:$0xff] %v5581_v10  ;;  %v5594_v61 = vadd.f32 %v5333_v56, %v6661_v50  ;;  %v5598_v9 = vadd.f32 %v5333_v56, %v6663_v19  ;;  %v6665_v12 = vld [vmem:[#allocation137_spill] sm:$0xff]  ;;  %v6667_v10 = vld [vmem:[#allocation138_spill] sm:$0xff] }
 0x31c   : > { %6658 = vst [vmem:[#allocation107_spill] sm:$0xff] %v5585_v40  ;;  %6660 = vst [vmem:[#allocation108_spill] sm:$0xff] %v5589_v22  ;;  %v5602_v37 = vadd.f32 %v5333_v56, %v6665_v12  ;;  %v5606_v52 = vadd.f32 %v5333_v56, %v6667_v10  ;;  %v6669_v40 = vld [vmem:[#allocation139_spill] sm:$0xff]  ;;  %v6671_v22 = vld [vmem:[#allocation140_spill] sm:$0xff] }
 0x31d   : > { %6662 = vst [vmem:[#allocation109_spill] sm:$0xff] %v5594_v61  ;;  %6664 = vst [vmem:[#allocation110_spill] sm:$0xff] %v5598_v9  ;;  %v5610_v42 = vadd.f32 %v5333_v56, %v6669_v40  ;;  %v5614_v50 = vadd.f32 %v5333_v56, %v6671_v22  ;;  %v6673_v61 = vld [vmem:[#allocation141_spill] sm:$0xff]  ;;  %v6675_v9 = vld [vmem:[#allocation142_spill] sm:$0xff] }
 0x31e   : > { %6666 = vst [vmem:[#allocation111_spill] sm:$0xff] %v5602_v37  ;;  %6668 = vst [vmem:[#allocation112_spill] sm:$0xff] %v5606_v52  ;;  %v5618_v19 = vadd.f32 %v5333_v56, %v6673_v61  ;;  %v5622_v12 = vadd.f32 %v5333_v56, %v6675_v9  ;;  %v6677_v37 = vld [vmem:[#allocation143_spill] sm:$0xff]  ;;  %v6678_v52 = vld [vmem:[#allocation144_spill] sm:$0xff] }
 0x31f   : > { %6670 = vst [vmem:[#allocation113_spill] sm:$0xff] %v5610_v42  ;;  %6672 = vst [vmem:[#allocation114_spill] sm:$0xff] %v5614_v50  ;;  %v5626_v10 = vadd.f32 %v5333_v56, %v6677_v37  ;;  %v5630_v40 = vadd.f32 %v5333_v56, %v6678_v52  ;;  %v6680_v42 = vld [vmem:[#allocation145_spill] sm:$0xff]  ;;  %v6681_v50 = vld [vmem:[#allocation146_spill] sm:$0xff]  ;;  %v5650_v52 = vadd.f32 %v5333_v56, %v5307_v45 }
 0x320   : > { %6674 = vst [vmem:[#allocation115_spill] sm:$0xff] %v5618_v19  ;;  %6676 = vst [vmem:[#allocation116_spill] sm:$0xff] %v5622_v12  ;;  %v5634_v22 = vadd.f32 %v5333_v56, %v6680_v42  ;;  %v5638_v61 = vadd.f32 %v5333_v56, %v6681_v50  ;;  %v6682_v19 = vld [vmem:[#allocation147_spill] sm:$0xff]  ;;  %v6683_v12 = vld [vmem:[#allocation98_spill] sm:$0xff]  ;;  %v5663_v50 = vadd.f32 %v5333_v56, %v5315_v58  ;;  %v2275_v58 = vmax.f32 %v5341_v31, 0.0 }
 0x321   : > { %6679 = vst [vmem:[#allocation117_spill] sm:$0xff] %v5630_v40  ;;  %v5642_v9 = vadd.f32 %v5333_v56, %v6682_v19  ;;  %v5646_v37 = vadd.f32 %v5333_v56, %v6683_v12  ;;  %v6684_v40 = vld [vmem:[#allocation99_spill] sm:$0xff]  ;;  %v5667_v19 = vadd.f32 %v5333_v56, %v5319_v7  ;;  %v5671_v45 = vadd.f32 %v5333_v56, %v5323_v29 }
 0x322   : > { %v5654_v42 = vadd.f32 %v5333_v56, %v6684_v40  ;;  %6685 = vst [vmem:[#allocation118_spill] sm:$0xff] %v5663_v50  ;;  %v5675_v12 = vadd.f32 %v5333_v56, %v5327_v59  ;;  %v2274_v40 = vmax.f32 %v5337_v55, 0.0  ;;  %v2276_v50 = vmax.f32 %v5345_v62, 0.0  ;;  %2359 = vst.msk [vmem:[%s5659_s18 + $0x8] sm:$0xff] %vm1139_vm3, %v2275_v58 }
 0x323   : > { %6686 = vst [vmem:[#allocation119_spill] sm:$0xff] %v5667_v19  ;;  %6687 = vst [vmem:[#allocation149_spill] sm:$0xff] %v5671_v45  ;;  %v2277_v7 = vmax.f32 %v5349_v53, 0.0  ;;  %v2278_v19 = vmax.f32 %v5353_v11, 0.0  ;;  %v2279_v29 = vmax.f32 %v5357_v5, 0.0  ;;  %v2280_v45 = vmax.f32 %v5361_v20, 0.0 }
 0x324   : > { %v2281_v56 = vmax.f32 %v5365_v4, 0.0  ;;  %v2282_v59 = vmax.f32 %v5369_v23, 0.0  ;;  %v2283_v55 = vmax.f32 %v5373_v38, 0.0  ;;  %v2284_v31 = vmax.f32 %v5377_v16, 0.0  ;;  %2358 = vst.msk [vmem:[%s5659_s18] sm:$0xff] %vm1139_vm3, %v2274_v40  ;;  %2360 = vst.msk [vmem:[%s5659_s18 + $0x10] sm:$0xff] %vm1139_vm3, %v2276_v50 }
 0x325   : > { %v2285_v62 = vmax.f32 %v5381_v21, 0.0  ;;  %2361 = vst.msk [vmem:[%s5659_s18 + $0x18] sm:$0xff] %vm1139_vm3, %v2277_v7  ;;  %v2286_v53 = vmax.f32 %v5385_v30, 0.0  ;;  %v2287_v11 = vmax.f32 %v5389_v25, 0.0  ;;  %v2288_v5 = vmax.f32 %v5393_v44, 0.0  ;;  %2362 = vst.msk [vmem:[%s5659_s18 + $0x20] sm:$0xff] %vm1139_vm3, %v2278_v19 }
 0x326   : > { %v2289_v20 = vmax.f32 %v5397_v63, 0.0  ;;  %2363 = vst.msk [vmem:[%s5659_s18 + $0x28] sm:$0xff] %vm1139_vm3, %v2279_v29  ;;  %2364 = vst.msk [vmem:[%s5659_s18 + $0x30] sm:$0xff] %vm1139_vm3, %v2280_v45  ;;  %v2290_v4 = vmax.f32 %v5401_v34, 0.0  ;;  %v2291_v23 = vmax.f32 %v5405_v27, 0.0  ;;  %v2292_v38 = vmax.f32 %v5409_v35, 0.0 }
 0x327   : > { %2365 = vst.msk [vmem:[%s5659_s18 + $0x38] sm:$0xff] %vm1139_vm3, %v2281_v56  ;;  %v2293_v16 = vmax.f32 %v5413_v18, 0.0  ;;  %2366 = vst.msk [vmem:[%s5659_s18 + $0x40] sm:$0xff] %vm1139_vm3, %v2282_v59  ;;  %v2294_v21 = vmax.f32 %v5417_v39, 0.0  ;;  %v2295_v30 = vmax.f32 %v5421_v13, 0.0  ;;  %v2296_v25 = vmax.f32 %v5425_v2, 0.0 }
 0x328   : > { %2367 = vst.msk [vmem:[%s5659_s18 + $0x48] sm:$0xff] %vm1139_vm3, %v2283_v55  ;;  %2368 = vst.msk [vmem:[%s5659_s18 + $0x50] sm:$0xff] %vm1139_vm3, %v2284_v31  ;;  %v2297_v44 = vmax.f32 %v5429_v28, 0.0  ;;  %v2298_v63 = vmax.f32 %v5433_v17, 0.0  ;;  %v2299_v34 = vmax.f32 %v5437_v14, 0.0  ;;  %v2300_v27 = vmax.f32 %v5441_v49, 0.0 }
 0x329   : > { %2369 = vst.msk [vmem:[%s5659_s18 + $0x58] sm:$0xff] %vm1139_vm3, %v2285_v62  ;;  %2370 = vst.msk [vmem:[%s5659_s18 + $0x60] sm:$0xff] %vm1139_vm3, %v2286_v53  ;;  %v2301_v35 = vmax.f32 %v5445_v32, 0.0  ;;  %v2302_v18 = vmax.f32 %v5449_v36, 0.0  ;;  %v2303_v39 = vmax.f32 %v5453_v48, 0.0  ;;  %v2304_v13 = vmax.f32 %v5457_v6, 0.0 }
 0x32a   : > { %2371 = vst.msk [vmem:[%s5659_s18 + $0x68] sm:$0xff] %vm1139_vm3, %v2287_v11  ;;  %2372 = vst.msk [vmem:[%s5659_s18 + $0x70] sm:$0xff] %vm1139_vm3, %v2288_v5  ;;  %v2305_v2 = vmax.f32 %v5461_v41, 0.0  ;;  %v2306_v28 = vmax.f32 %v5465_v0, 0.0  ;;  %v2307_v17 = vmax.f32 %v5469_v54, 0.0  ;;  %v2308_v14 = vmax.f32 %v5473_v24, 0.0 }
 0x32b   : > { %2373 = vst.msk [vmem:[%s5659_s18 + $0x78] sm:$0xff] %vm1139_vm3, %v2289_v20  ;;  %2374 = vst.msk [vmem:[%s5659_s18 + $0x80] sm:$0xff] %vm1139_vm3, %v2290_v4  ;;  %v2309_v49 = vmax.f32 %v5477_v47, 0.0  ;;  %v2310_v32 = vmax.f32 %v5481_v33, 0.0  ;;  %v2311_v36 = vmax.f32 %v5485_v26, 0.0  ;;  %v2312_v48 = vmax.f32 %v5489_v8, 0.0 }
 0x32c   : > { %2375 = vst.msk [vmem:[%s5659_s18 + $0x88] sm:$0xff] %vm1139_vm3, %v2291_v23  ;;  %2376 = vst.msk [vmem:[%s5659_s18 + $0x90] sm:$0xff] %vm1139_vm3, %v2292_v38  ;;  %v2313_v6 = vmax.f32 %v5493_v1, 0.0  ;;  %v2314_v41 = vmax.f32 %v5497_v51, 0.0  ;;  %v2315_v0 = vmax.f32 %v5501_v15, 0.0  ;;  %v2316_v54 = vmax.f32 %v5505_v46, 0.0 }
 0x32d   : > { %2377 = vst.msk [vmem:[%s5659_s18 + $0x98] sm:$0xff] %vm1139_vm3, %v2293_v16  ;;  %2378 = vst.msk [vmem:[%s5659_s18 + $0xa0] sm:$0xff] %vm1139_vm3, %v2294_v21  ;;  %v2317_v24 = vmax.f32 %v5509_v60, 0.0  ;;  %v2318_v47 = vmax.f32 %v5513_v43, 0.0  ;;  %v2319_v33 = vmax.f32 %v5517_v57, 0.0  ;;  %v2320_v26 = vmax.f32 %v5521_v3, 0.0 }
 0x32e   : > { %2379 = vst.msk [vmem:[%s5659_s18 + $0xa8] sm:$0xff] %vm1139_vm3, %v2295_v30  ;;  %2380 = vst.msk [vmem:[%s5659_s18 + $0xb0] sm:$0xff] %vm1139_vm3, %v2296_v25  ;;  %v6688_v8 = vld [vmem:[#allocation100_spill] sm:$0xff]  ;;  %v6689_v51 = vld [vmem:[#allocation101_spill] sm:$0xff] }
 0x32f   : > { %2381 = vst.msk [vmem:[%s5659_s18 + $0xb8] sm:$0xff] %vm1139_vm3, %v2297_v44  ;;  %2382 = vst.msk [vmem:[%s5659_s18 + $0xc0] sm:$0xff] %vm1139_vm3, %v2298_v63  ;;  %v2321_v1 = vmax.f32 %v6688_v8, 0.0  ;;  %v2322_v15 = vmax.f32 %v6689_v51, 0.0  ;;  %v6690_v46 = vld [vmem:[#allocation102_spill] sm:$0xff]  ;;  %v6691_v43 = vld [vmem:[#allocation103_spill] sm:$0xff] }
 0x330   : > { %2383 = vst.msk [vmem:[%s5659_s18 + $0xc8] sm:$0xff] %vm1139_vm3, %v2299_v34  ;;  %2384 = vst.msk [vmem:[%s5659_s18 + $0xd0] sm:$0xff] %vm1139_vm3, %v2300_v27  ;;  %v2323_v60 = vmax.f32 %v6690_v46, 0.0  ;;  %v2324_v57 = vmax.f32 %v6691_v43, 0.0  ;;  %v6692_v3 = vld [vmem:[#allocation104_spill] sm:$0xff]  ;;  %v6694_v40 = vld [vmem:[#allocation97_spill] sm:$0xff] }
 0x331   : > { %2385 = vst.msk [vmem:[%s5659_s18 + $0xd8] sm:$0xff] %vm1139_vm3, %v2301_v35  ;;  %2386 = vst.msk [vmem:[%s5659_s18 + $0xe0] sm:$0xff] %vm1139_vm3, %v2302_v18  ;;  %v2325_v50 = vmax.f32 %v6692_v3, 0.0  ;;  %v6693_v19 = vld [vmem:[#allocation84_spill] sm:$0xff]  ;;  %v2327_v58 = vmax.f32 %v6694_v40, 0.0  ;;  %v6695_v7 = vld [vmem:[#allocation150_spill] sm:$0xff] }
 0x332   : > { %2387 = vst.msk [vmem:[%s5659_s18 + $0xe8] sm:$0xff] %vm1139_vm3, %v2303_v39  ;;  %2388 = vst.msk [vmem:[%s5659_s18 + $0xf0] sm:$0xff] %vm1139_vm3, %v2304_v13  ;;  %v2326_v45 = vmax.f32 %v6693_v19, 0.0  ;;  %v2328_v29 = vmax.f32 %v6695_v7, 0.0  ;;  %v6696_v56 = vld [vmem:[#allocation53_spill] sm:$0xff]  ;;  %v6697_v55 = vld [vmem:[#allocation60_spill] sm:$0xff] }
 0x333   : > { %2389 = vst.msk [vmem:[%s5659_s18 + $0xf8] sm:$0xff] %vm1139_vm3, %v2305_v2  ;;  %2390 = vst.msk [vmem:[%s5659_s18 + $0x100] sm:$0xff] %vm1139_vm3, %v2306_v28  ;;  %v2329_v59 = vmax.f32 %v6696_v56, 0.0  ;;  %v2330_v31 = vmax.f32 %v6697_v55, 0.0  ;;  %v6698_v62 = vld [vmem:[#allocation151_spill] sm:$0xff]  ;;  %v6699_v11 = vld [vmem:[#allocation152_spill] sm:$0xff] }
 0x334   : > { %2391 = vst.msk [vmem:[%s5659_s18 + $0x108] sm:$0xff] %vm1139_vm3, %v2307_v17  ;;  %2392 = vst.msk [vmem:[%s5659_s18 + $0x110] sm:$0xff] %vm1139_vm3, %v2308_v14  ;;  %v2331_v53 = vmax.f32 %v6698_v62, 0.0  ;;  %v2332_v5 = vmax.f32 %v6699_v11, 0.0  ;;  %v6700_v20 = vld [vmem:[#allocation87_spill] sm:$0xff]  ;;  %v6701_v23 = vld [vmem:[#allocation105_spill] sm:$0xff] }
 0x335   : > { %2393 = vst.msk [vmem:[%s5659_s18 + $0x118] sm:$0xff] %vm1139_vm3, %v2309_v49  ;;  %2394 = vst.msk [vmem:[%s5659_s18 + $0x120] sm:$0xff] %vm1139_vm3, %v2310_v32  ;;  %v2333_v4 = vmax.f32 %v6700_v20, 0.0  ;;  %v2334_v38 = vmax.f32 %v6701_v23, 0.0  ;;  %v6702_v16 = vld [vmem:[#allocation106_spill] sm:$0xff]  ;;  %v6703_v30 = vld [vmem:[#allocation107_spill] sm:$0xff] }
 0x336   : > { %2395 = vst.msk [vmem:[%s5659_s18 + $0x128] sm:$0xff] %vm1139_vm3, %v2311_v36  ;;  %2396 = vst.msk [vmem:[%s5659_s18 + $0x130] sm:$0xff] %vm1139_vm3, %v2312_v48  ;;  %v2335_v21 = vmax.f32 %v6702_v16, 0.0  ;;  %v2336_v25 = vmax.f32 %v6703_v30, 0.0  ;;  %v6704_v44 = vld [vmem:[#allocation108_spill] sm:$0xff]  ;;  %v6705_v34 = vld [vmem:[#allocation109_spill] sm:$0xff] }
 0x337   : > { %2397 = vst.msk [vmem:[%s5659_s18 + $0x138] sm:$0xff] %vm1139_vm3, %v2313_v6  ;;  %2398 = vst.msk [vmem:[%s5659_s18 + $0x140] sm:$0xff] %vm1139_vm3, %v2314_v41  ;;  %v2337_v63 = vmax.f32 %v6704_v44, 0.0  ;;  %v2338_v27 = vmax.f32 %v6705_v34, 0.0  ;;  %v6706_v35 = vld [vmem:[#allocation110_spill] sm:$0xff]  ;;  %v6707_v39 = vld [vmem:[#allocation111_spill] sm:$0xff] }
 0x338   : > { %2399 = vst.msk [vmem:[%s5659_s18 + $0x148] sm:$0xff] %vm1139_vm3, %v2315_v0  ;;  %2400 = vst.msk [vmem:[%s5659_s18 + $0x150] sm:$0xff] %vm1139_vm3, %v2316_v54  ;;  %v2339_v18 = vmax.f32 %v6706_v35, 0.0  ;;  %v2340_v13 = vmax.f32 %v6707_v39, 0.0  ;;  %v6708_v2 = vld [vmem:[#allocation112_spill] sm:$0xff]  ;;  %v6709_v17 = vld [vmem:[#allocation113_spill] sm:$0xff] }
 0x339   : > { %2401 = vst.msk [vmem:[%s5659_s18 + $0x158] sm:$0xff] %vm1139_vm3, %v2317_v24  ;;  %2402 = vst.msk [vmem:[%s5659_s18 + $0x160] sm:$0xff] %vm1139_vm3, %v2318_v47  ;;  %v2341_v28 = vmax.f32 %v6708_v2, 0.0  ;;  %v2342_v14 = vmax.f32 %v6709_v17, 0.0  ;;  %v6710_v49 = vld [vmem:[#allocation114_spill] sm:$0xff]  ;;  %v6711_v36 = vld [vmem:[#allocation115_spill] sm:$0xff] }
 0x33a   : > { %2403 = vst.msk [vmem:[%s5659_s18 + $0x168] sm:$0xff] %vm1139_vm3, %v2319_v33  ;;  %2404 = vst.msk [vmem:[%s5659_s18 + $0x170] sm:$0xff] %vm1139_vm3, %v2320_v26  ;;  %v2343_v32 = vmax.f32 %v6710_v49, 0.0  ;;  %v2344_v48 = vmax.f32 %v6711_v36, 0.0  ;;  %v6712_v6 = vld [vmem:[#allocation116_spill] sm:$0xff]  ;;  %v2346_v0 = vmax.f32 %v5626_v10, 0.0 }
 0x33b   : > { %2405 = vst.msk [vmem:[%s5659_s18 + $0x178] sm:$0xff] %vm1139_vm3, %v2321_v1  ;;  %2406 = vst.msk [vmem:[%s5659_s18 + $0x180] sm:$0xff] %vm1139_vm3, %v2322_v15  ;;  %v2345_v41 = vmax.f32 %v6712_v6, 0.0  ;;  %v6713_v54 = vld [vmem:[#allocation117_spill] sm:$0xff]  ;;  %v2348_v47 = vmax.f32 %v5634_v22, 0.0  ;;  %v2349_v33 = vmax.f32 %v5638_v61, 0.0 }
 0x33c   : > { %2407 = vst.msk [vmem:[%s5659_s18 + $0x188] sm:$0xff] %vm1139_vm3, %v2323_v60  ;;  %2408 = vst.msk [vmem:[%s5659_s18 + $0x190] sm:$0xff] %vm1139_vm3, %v2324_v57  ;;  %v2347_v24 = vmax.f32 %v6713_v54, 0.0  ;;  %v2350_v10 = vmax.f32 %v5642_v9, 0.0  ;;  %v2351_v26 = vmax.f32 %v5646_v37, 0.0  ;;  %v2352_v22 = vmax.f32 %v5650_v52, 0.0 }
 0x33d   : > { %2409 = vst.msk [vmem:[%s5659_s18 + $0x198] sm:$0xff] %vm1139_vm3, %v2325_v50  ;;  %2410 = vst.msk [vmem:[%s5659_s18 + $0x1a0] sm:$0xff] %vm1139_vm3, %v2326_v45  ;;  %v2353_v61 = vmax.f32 %v5654_v42, 0.0  ;;  %v6714_v9 = vld [vmem:[#allocation118_spill] sm:$0xff]  ;;  %v6715_v8 = vld [vmem:[#allocation119_spill] sm:$0xff]  ;;  %v2357_v42 = vmax.f32 %v5675_v12, 0.0 }
 0x33e   : > { %2411 = vst.msk [vmem:[%s5659_s18 + $0x1a8] sm:$0xff] %vm1139_vm3, %v2327_v58  ;;  %2412 = vst.msk [vmem:[%s5659_s18 + $0x1b0] sm:$0xff] %vm1139_vm3, %v2328_v29  ;;  %v2354_v37 = vmax.f32 %v6714_v9, 0.0  ;;  %v2355_v52 = vmax.f32 %v6715_v8, 0.0  ;;  %v6716_v1 = vld [vmem:[#allocation149_spill] sm:$0xff] }
 0x33f   : > { %2413 = vst.msk [vmem:[%s5659_s18 + $0x1b8] sm:$0xff] %vm1139_vm3, %v2329_v59  ;;  %2414 = vst.msk [vmem:[%s5659_s18 + $0x1c0] sm:$0xff] %vm1139_vm3, %v2330_v31  ;;  %v2356_v51 = vmax.f32 %v6716_v1, 0.0 }
 0x340   : > { %2415 = vst.msk [vmem:[%s5659_s18 + $0x1c8] sm:$0xff] %vm1139_vm3, %v2331_v53  ;;  %2416 = vst.msk [vmem:[%s5659_s18 + $0x1d0] sm:$0xff] %vm1139_vm3, %v2332_v5 }
 0x341   : > { %2417 = vst.msk [vmem:[%s5659_s18 + $0x1d8] sm:$0xff] %vm1139_vm3, %v2333_v4  ;;  %2418 = vst.msk [vmem:[%s5659_s18 + $0x1e0] sm:$0xff] %vm1139_vm3, %v2334_v38 }
 0x342   : > { %2419 = vst.msk [vmem:[%s5659_s18 + $0x1e8] sm:$0xff] %vm1139_vm3, %v2335_v21  ;;  %2420 = vst.msk [vmem:[%s5659_s18 + $0x1f0] sm:$0xff] %vm1139_vm3, %v2336_v25 }
 0x343   : > { %2421 = vst.msk [vmem:[%s5659_s18 + $0x1f8] sm:$0xff] %vm1139_vm3, %v2337_v63  ;;  %2422 = vst.msk [vmem:[%s5659_s18 + $0x200] sm:$0xff] %vm1139_vm3, %v2338_v27 }
 0x344   : > { %2423 = vst.msk [vmem:[%s5659_s18 + $0x208] sm:$0xff] %vm1139_vm3, %v2339_v18  ;;  %2424 = vst.msk [vmem:[%s5659_s18 + $0x210] sm:$0xff] %vm1139_vm3, %v2340_v13 }
 0x345   : > { %2425 = vst.msk [vmem:[%s5659_s18 + $0x218] sm:$0xff] %vm1139_vm3, %v2341_v28  ;;  %2426 = vst.msk [vmem:[%s5659_s18 + $0x220] sm:$0xff] %vm1139_vm3, %v2342_v14 }
 0x346   : > { %2427 = vst.msk [vmem:[%s5659_s18 + $0x228] sm:$0xff] %vm1139_vm3, %v2343_v32  ;;  %2428 = vst.msk [vmem:[%s5659_s18 + $0x230] sm:$0xff] %vm1139_vm3, %v2344_v48 }
 0x347   : > { %2429 = vst.msk [vmem:[%s5659_s18 + $0x238] sm:$0xff] %vm1139_vm3, %v2345_v41  ;;  %2430 = vst.msk [vmem:[%s5659_s18 + $0x240] sm:$0xff] %vm1139_vm3, %v2346_v0 }
 0x348   : > { %2431 = vst.msk [vmem:[%s5659_s18 + $0x248] sm:$0xff] %vm1139_vm3, %v2347_v24  ;;  %2432 = vst.msk [vmem:[%s5659_s18 + $0x250] sm:$0xff] %vm1139_vm3, %v2348_v47 }
 0x349   : > { %2433 = vst.msk [vmem:[%s5659_s18 + $0x258] sm:$0xff] %vm1139_vm3, %v2349_v33  ;;  %2434 = vst.msk [vmem:[%s5659_s18 + $0x260] sm:$0xff] %vm1139_vm3, %v2350_v10 }
 0x34a   : > { %2435 = vst.msk [vmem:[%s5659_s18 + $0x268] sm:$0xff] %vm1139_vm3, %v2351_v26  ;;  %2436 = vst.msk [vmem:[%s5659_s18 + $0x270] sm:$0xff] %vm1139_vm3, %v2352_v22 }
 0x34b   : > { %2437 = vst.msk [vmem:[%s5659_s18 + $0x278] sm:$0xff] %vm1139_vm3, %v2353_v61  ;;  %2438 = vst.msk [vmem:[%s5659_s18 + $0x280] sm:$0xff] %vm1139_vm3, %v2354_v37 }
 0x34c   : > { %2439 = vst.msk [vmem:[%s5659_s18 + $0x288] sm:$0xff] %vm1139_vm3, %v2355_v52  ;;  %2440 = vst.msk [vmem:[%s5659_s18 + $0x290] sm:$0xff] %vm1139_vm3, %v2356_v51 }
 0x34d   : > { %2441 = vst.msk [vmem:[%s5659_s18 + $0x298] sm:$0xff] %vm1139_vm3, %v2357_v42 }
 0x34e PF: > { %p23_p11 = scmp.ge.s32.totalorder %s3155_s11, 6   ;;  %s6717_s7 = smov %s3070_s8 }
 0x34f   : > { %s6718_s8 = smov %s3074_s9  ;;  %s6719_s9 = smov %s3165_s14 }
 0x350   : > { %s6720_s10 = smov %s3155_s11  ;;  %25 = sbr.rel (!%p23_p11) target bundleno = 17 (0x11), region = 102 }
 0x357   :  { %2463 = vsyncpa [#allocation5], 1 }
 0x358   :  { %2465 = vsyncpa [#allocation5 + $0x1], 1 }
 0x359   :  { %2466 = vsyncpa [#allocation7], 1 }
 0x35a   :  { %2468 = vsyncpa [#allocation7 + $0x1], 1 }

</bundles_post_ra>
